<compile_context>
chip_gen: v6e
topology: v6e:2x2x1
jax: 0.10.0
libtpu: 0.0.40
codegen_flags: <defaults>
</compile_context>

<pallas_src>
import math

import jax
import jax.numpy as jnp
from jax import lax
from jax.experimental import pallas as pl
from jax.experimental.pallas import tpu as pltpu


# ---------------------------------------------------------------------------
# Fused kernel: crop + concat + zero-pad + [conv3x3 + LeakyReLU(0.1)] * L, one image/step
# ---------------------------------------------------------------------------
def _make_fused_kernel(H, W, C1, C2, crop_h, crop_w, n_layers):
    L = n_layers

    def kernel(*refs):
        x1u_ref, x2_ref = refs[0], refs[1]          # (1,H,W,C1), (1,H2,W2,C2)
        wb_refs = refs[2:2 + 2 * L]                 # per layer: (9,Cin,Cout), (1,Cout)
        o_ref = refs[2 + 2 * L]                     # (1,H,W,Cout_last)
        bufs = refs[2 + 2 * L + 1:]                 # ping-pong padded VMEM scratch

        # Zero the padded scratch: provides the 'padding=1' zero halo for every layer.
        for buf in bufs:
            buf[...] = jnp.zeros_like(buf)

        # Fused crop + concat: layer-0 input = cat([crop(x2), upsample(x1)], channel).
        bufs[0][1:H + 1, 1:W + 1, 0:C2] = (
            x2_ref[0, crop_h:crop_h + H, crop_w:crop_w + W, :].astype(jnp.float32))
        bufs[0][1:H + 1, 1:W + 1, C2:C2 + C1] = x1u_ref[0].astype(jnp.float32)

        cur = 0
        for l in range(L):
            w_ref = wb_refs[2 * l]                  # (9, cin, cout)
            b_ref = wb_refs[2 * l + 1]              # (1, cout)
            cin, cout = w_ref.shape[1], w_ref.shape[2]
            src = bufs[cur]

            # Accumulator initialised with the bias (removes one full-tile add).
            acc = jnp.broadcast_to(b_ref[...].reshape(1, 1, cout),
                                   (H, W, cout)).astype(jnp.float32)

            # 3x3 conv = 9 shifted-window channel contractions; taps are sliced straight
            # from the padded scratch ref so only `acc` is long-lived across the unrolled
            # loop.  The 'hwi,io->hwo' contraction has no batch dims, i.e. it collapses
            # to a single (H*W, cin) @ (cin, cout) MXU matmul per tap.
            for t in range(9):
                dy, dx = t // 3, t % 3
                patch = src[dy:dy + H, dx:dx + W, 0:cin]            # (H, W, cin)
                acc = acc + jnp.einsum(
                    "hwi,io->hwo", patch, w_ref[t],
                    preferred_element_type=jnp.float32)

            y = jnp.where(acc >= 0, acc, 0.1 * acc)                  # LeakyReLU(0.1)

            if l == L - 1:
                o_ref[0] = y.astype(o_ref.dtype)                     # only final result -> HBM
            else:
                nxt = 1 - cur
                bufs[nxt][1:H + 1, 1:W + 1, 0:cout] = y              # stays in VMEM
                cur = nxt

    return kernel


def fused_up_conv_chain(x1u_nhwc, x2_nhwc, conv_params, crop_h, crop_w):
    """x1u_nhwc: (N,H,W,C1) already 2x-upsampled; x2_nhwc: (N,H2,W2,C2) uncropped."""
    N, H, W, C1 = x1u_nhwc.shape
    _, H2, W2, C2 = x2_nhwc.shape
    L = len(conv_params)
    layer_dims = [(w.shape[2], w.shape[3]) for w, _ in conv_params]
    assert layer_dims[0][0] == C1 + C2, (layer_dims, C1, C2)
    c_out_last = layer_dims[-1][1]
    c_max = max(cin for cin, _ in layer_dims)

    flat_params = []
    in_specs = [
        pl.BlockSpec((1, H, W, C1), lambda n: (n, 0, 0, 0)),
        pl.BlockSpec((1, H2, W2, C2), lambda n: (n, 0, 0, 0)),
    ]
    for w, b in conv_params:
        w9 = w.reshape(9, w.shape[2], w.shape[3]).astype(jnp.float32)   # tap-major (dy*3+dx)
        b2 = b.reshape(1, -1).astype(jnp.float32)
        flat_params += [w9, b2]
        # Constant index_maps -> weights stay VMEM-resident across grid steps.
        in_specs += [pl.BlockSpec(w9.shape, lambda n: (0, 0, 0)),
                     pl.BlockSpec(b2.shape, lambda n: (0, 0))]

    n_bufs = 2 if L > 1 else 1
    scratch_shapes = [pltpu.VMEM((H + 2, W + 2, c_max), jnp.float32)
                      for _ in range(n_bufs)]

    kernel = _make_fused_kernel(H, W, C1, C2, crop_h, crop_w, L)

    return pl.pallas_call(
        kernel,
        out_shape=jax.ShapeDtypeStruct((N, H, W, c_out_last), x1u_nhwc.dtype),
        grid_spec=pltpu.PrefetchScalarGridSpec(
            num_scalar_prefetch=0,
            grid=(N,),
            in_specs=in_specs,
            out_specs=pl.BlockSpec((1, H, W, c_out_last), lambda n: (n, 0, 0, 0)),
            scratch_shapes=scratch_shapes,
        ),
        compiler_params=pltpu.CompilerParams(
            dimension_semantics=("parallel",),          # shard batch across TCs (v7x)
            vmem_limit_bytes=32 * 1024 * 1024,          # safe on v5e/v6e/v7x; usage ~1-2 MiB here
        ),
    )(x1u_nhwc, x2_nhwc, *flat_params)


# ---------------------------------------------------------------------------
# Up.forward wrapper (NCHW interface like the PyTorch module)
# ---------------------------------------------------------------------------
def up_forward(x1_nchw, x2_nchw, conv_params):
    N, C1, H1, W1 = x1_nchw.shape
    H, W = 2 * H1, 2 * W1
    _, C2, H2, W2 = x2_nchw.shape

    # PyTorch _crop offsets (ceil on the low side).
    crop_h = math.ceil((H2 - H) / 2)
    crop_w = math.ceil((W2 - W) / 2)

    # Index-only glue kept in XLA: layout change + nearest-2x upsample.
    x1_nhwc = jnp.transpose(x1_nchw, (0, 2, 3, 1))
    x2_nhwc = jnp.transpose(x2_nchw, (0, 2, 3, 1))
    x1u = jnp.repeat(jnp.repeat(x1_nhwc, 2, axis=1), 2, axis=2)

    out_nhwc = fused_up_conv_chain(x1u, x2_nhwc, conv_params, crop_h, crop_w)
    return jnp.transpose(out_nhwc, (0, 3, 1, 2))


# ---------------------------------------------------------------------------
# Deterministic parameter init (mimics nn.Conv2d default uniform bound 1/sqrt(fan_in))
# ---------------------------------------------------------------------------
def init_conv_params(key, n_filters):
    params = []
    for ii in range(len(n_filters) - 1):
        cin, cout = n_filters[ii], n_filters[ii + 1]
        key, kw, kb = jax.random.split(key, 3)
        bound = 1.0 / math.sqrt(cin * 9)
        w = jax.random.uniform(kw, (3, 3, cin, cout), jnp.float32, -bound, bound)  # HWIO
        b = jax.random.uniform(kb, (cout,), jnp.float32, -bound, bound)
        params.append((w, b))
    return params


# Pure-JAX reference (XLA conv, HIGHEST precision) for the correctness check.
def _reference(x1, x2, conv_params):
    x1u = jnp.repeat(jnp.repeat(x1, 2, axis=2), 2, axis=3)
    H, W = x1u.shape[2], x1u.shape[3]
    H2, W2 = x2.shape[2], x2.shape[3]
    c = (H2 - H) / 2
    c1, c2 = math.ceil(c), math.floor(c)
    c = (W2 - W) / 2
    c3, c4 = math.ceil(c), math.floor(c)
    x2c = x2[:, :, c1:H2 - c2, c3:W2 - c4]
    x = jnp.concatenate([x2c, x1u], axis=1)
    for w, b in conv_params:
        w_oihw = jnp.transpose(w, (3, 2, 0, 1))
        x = lax.conv_general_dilated(
            x, w_oihw, window_strides=(1, 1), padding="SAME",
            dimension_numbers=("NCHW", "OIHW", "NCHW"),
            precision=lax.Precision.HIGHEST)
        x = x + b.reshape(1, -1, 1, 1)
        x = jnp.where(x >= 0, x, 0.1 * x)
    return x


if __name__ == "__main__":
    key = jax.random.PRNGKey(0)
    k1, k2, kp = jax.random.split(key, 3)

    # x1: (N, C1, H/2, W/2) gets 2x-upsampled; x2: (N, C2, H2, W2) gets center-cropped
    # to x1's upsampled spatial size (18 -> 16 here exercises a real crop).
    x1 = jax.random.normal(k1, (2, 4, 8, 8), jnp.float32)      # NCHW
    x2 = jax.random.normal(k2, (2, 4, 18, 18), jnp.float32)    # NCHW

    # n_filters (module-level global in hourglass.py); first entry must equal C1 + C2.
    n_filters = [8, 8, 4]
    conv_params = init_conv_params(kp, n_filters)

    up_fn = jax.jit(up_forward)
    out = jax.block_until_ready(up_fn(x1, x2, conv_params))
    assert out.shape == (2, n_filters[-1], 16, 16), out.shape

    ref = jax.block_until_ready(_reference(x1, x2, conv_params))
    # Tolerance note: vs. the HIGHEST-precision XLA reference the only delta is the MXU's
    # fp32 pass decomposition inside the kernel; 1e-2 (5x tighter than before) is robust
    # across TPU generations / precision modes while still catching any real tap / crop /
    # bias / activation bug (those produce O(1) errors).
    max_err = float(jnp.max(jnp.abs(out - ref)))
    assert jnp.allclose(out, ref, atol=1e-2, rtol=1e-2), max_err

    print("KERNEL_OK")
</pallas_src>

<mosaic_0001>
module attributes {stable_mosaic.version = 11 : i64} {
  func.func @kernel(%arg0: i32, %arg1: memref<1x16x16x4xf32, #tpu.memory_space<vmem>>, %arg2: memref<1x18x18x4xf32, #tpu.memory_space<vmem>>, %arg3: memref<9x8x8xf32, #tpu.memory_space<vmem>>, %arg4: memref<1x8xf32, #tpu.memory_space<vmem>>, %arg5: memref<9x8x4xf32, #tpu.memory_space<vmem>>, %arg6: memref<1x4xf32, #tpu.memory_space<vmem>>, %arg7: memref<1x16x16x4xf32, #tpu.memory_space<vmem>>, %arg8: memref<18x18x8xf32, #tpu.memory_space<vmem>>, %arg9: memref<18x18x8xf32, #tpu.memory_space<vmem>>) attributes {dimension_semantics = [#tpu.dimension_semantics<parallel>], iteration_bounds = array<i64: 2>, scalar_prefetch = 0 : i64, scratch_operands = 2 : i64, tpu.core_type = #tpu.core_type<tc>, window_params = [{transform_indices = @transform_0, window_bounds = array<i64: 1, 16, 16, 4>}, {transform_indices = @transform_1, window_bounds = array<i64: 1, 18, 18, 4>}, {pipeline_mode = #tpu.pipeline_mode<synchronous>, transform_indices = @transform_2, window_bounds = array<i64: 9, 8, 8>}, {pipeline_mode = #tpu.pipeline_mode<synchronous>, transform_indices = @transform_3, window_bounds = array<i64: 1, 8>}, {pipeline_mode = #tpu.pipeline_mode<synchronous>, transform_indices = @transform_4, window_bounds = array<i64: 9, 8, 4>}, {pipeline_mode = #tpu.pipeline_mode<synchronous>, transform_indices = @transform_5, window_bounds = array<i64: 1, 4>}, {transform_indices = @transform_6, window_bounds = array<i64: 1, 16, 16, 4>}]} {
    %cst = arith.constant 0.000000e+00 : f32
    %0 = vector.broadcast %cst : f32 to vector<18x18x8xf32>
    %c0 = arith.constant 0 : index
    %c0_0 = arith.constant 0 : index
    %c0_1 = arith.constant 0 : index
    %1 = vector.load %arg8[%c0, %c0_0, %c0_1] : memref<18x18x8xf32, #tpu.memory_space<vmem>>, vector<18x18x8xf32>
    tpu.vector_store %arg8[%c0, %c0_0, %c0_1], %0 {strides = array<i32>} : memref<18x18x8xf32, #tpu.memory_space<vmem>>, vector<18x18x8xf32>,
    %cst_2 = arith.constant 0.000000e+00 : f32
    %2 = vector.broadcast %cst_2 : f32 to vector<18x18x8xf32>
    %c0_3 = arith.constant 0 : index
    %c0_4 = arith.constant 0 : index
    %c0_5 = arith.constant 0 : index
    %3 = vector.load %arg9[%c0_3, %c0_4, %c0_5] : memref<18x18x8xf32, #tpu.memory_space<vmem>>, vector<18x18x8xf32>
    tpu.vector_store %arg9[%c0_3, %c0_4, %c0_5], %2 {strides = array<i32>} : memref<18x18x8xf32, #tpu.memory_space<vmem>>, vector<18x18x8xf32>,
    %c0_6 = arith.constant 0 : index
    %c1 = arith.constant 1 : index
    %c1_7 = arith.constant 1 : index
    %c0_8 = arith.constant 0 : index
    %4 = vector.load %arg2[%c0_6, %c1, %c1_7, %c0_8] : memref<1x18x18x4xf32, #tpu.memory_space<vmem>>, vector<1x16x16x4xf32>
    %5 = vector.shape_cast %4 : vector<1x16x16x4xf32> to vector<16x16x4xf32>
    %c1_9 = arith.constant 1 : index
    %c1_10 = arith.constant 1 : index
    %c0_11 = arith.constant 0 : index
    %6 = vector.load %arg8[%c1_9, %c1_10, %c0_11] : memref<18x18x8xf32, #tpu.memory_space<vmem>>, vector<16x16x4xf32>
    tpu.vector_store %arg8[%c1_9, %c1_10, %c0_11], %5 {strides = array<i32>} : memref<18x18x8xf32, #tpu.memory_space<vmem>>, vector<16x16x4xf32>,
    %c0_12 = arith.constant 0 : index
    %c0_13 = arith.constant 0 : index
    %c0_14 = arith.constant 0 : index
    %c0_15 = arith.constant 0 : index
    %7 = vector.load %arg1[%c0_12, %c0_13, %c0_14, %c0_15] : memref<1x16x16x4xf32, #tpu.memory_space<vmem>>, vector<1x16x16x4xf32>
    %8 = vector.shape_cast %7 : vector<1x16x16x4xf32> to vector<16x16x4xf32>
    %c1_16 = arith.constant 1 : index
    %c1_17 = arith.constant 1 : index
    %c4 = arith.constant 4 : index
    %9 = vector.load %arg8[%c1_16, %c1_17, %c4] : memref<18x18x8xf32, #tpu.memory_space<vmem>>, vector<16x16x4xf32>
    tpu.vector_store %arg8[%c1_16, %c1_17, %c4], %8 {strides = array<i32>} : memref<18x18x8xf32, #tpu.memory_space<vmem>>, vector<16x16x4xf32>,
    %c0_18 = arith.constant 0 : index
    %c0_19 = arith.constant 0 : index
    %10 = vector.load %arg4[%c0_18, %c0_19] : memref<1x8xf32, #tpu.memory_space<vmem>>, vector<1x8xf32>
    %11 = vector.shape_cast %10 : vector<1x8xf32> to vector<1x1x8xf32>
    %12 = vector.shape_cast %11 : vector<1x1x8xf32> to vector<1x1x8xf32>
    %13 = vector.broadcast %12 : vector<1x1x8xf32> to vector<16x16x8xf32>
    %c0_20 = arith.constant 0 : index
    %c0_21 = arith.constant 0 : index
    %c0_22 = arith.constant 0 : index
    %14 = vector.load %arg8[%c0_20, %c0_21, %c0_22] : memref<18x18x8xf32, #tpu.memory_space<vmem>>, vector<16x16x8xf32>
    %c0_23 = arith.constant 0 : index
    %c0_24 = arith.constant 0 : index
    %c0_25 = arith.constant 0 : index
    %15 = vector.load %arg3[%c0_23, %c0_24, %c0_25] : memref<9x8x8xf32, #tpu.memory_space<vmem>>, vector<1x8x8xf32>
    %16 = vector.shape_cast %15 : vector<1x8x8xf32> to vector<8x8xf32>
    "tpu.trace_start"() <{level = 10 : i32, message = "hwi,io->hwo"}> : () -> ()
    %cst_26 = arith.constant dense<0.000000e+00> : vector<16x16x8xf32>
    %17 = tpu.matmul %14, %16, %cst_26 {dimension_numbers = #tpu.dot_dimension_numbers<[2], [0], [0, 1], [1], [0, 0, 0, 1, 1, 1], [], []>} : vector<16x16x8xf32>, vector<8x8xf32>, vector<16x16x8xf32> -> vector<16x16x8xf32>
    "tpu.trace_stop"() : () -> ()
    %18 = arith.addf %13, %17 : vector<16x16x8xf32>
    %c0_27 = arith.constant 0 : index
    %c1_28 = arith.constant 1 : index
    %c0_29 = arith.constant 0 : index
    %19 = vector.load %arg8[%c0_27, %c1_28, %c0_29] : memref<18x18x8xf32, #tpu.memory_space<vmem>>, vector<16x16x8xf32>
    %c1_30 = arith.constant 1 : index
    %c0_31 = arith.constant 0 : index
    %c0_32 = arith.constant 0 : index
    %20 = vector.load %arg3[%c1_30, %c0_31, %c0_32] : memref<9x8x8xf32, #tpu.memory_space<vmem>>, vector<1x8x8xf32>
    %21 = vector.shape_cast %20 : vector<1x8x8xf32> to vector<8x8xf32>
    "tpu.trace_start"() <{level = 10 : i32, message = "hwi,io->hwo"}> : () -> ()
    %cst_33 = arith.constant dense<0.000000e+00> : vector<16x16x8xf32>
    %22 = tpu.matmul %19, %21, %cst_33 {dimension_numbers = #tpu.dot_dimension_numbers<[2], [0], [0, 1], [1], [0, 0, 0, 1, 1, 1], [], []>} : vector<16x16x8xf32>, vector<8x8xf32>, vector<16x16x8xf32> -> vector<16x16x8xf32>
    "tpu.trace_stop"() : () -> ()
    %23 = arith.addf %18, %22 : vector<16x16x8xf32>
    %c0_34 = arith.constant 0 : index
    %c2 = arith.constant 2 : index
    %c0_35 = arith.constant 0 : index
    %24 = vector.load %arg8[%c0_34, %c2, %c0_35] : memref<18x18x8xf32, #tpu.memory_space<vmem>>, vector<16x16x8xf32>
    %c2_36 = arith.constant 2 : index
    %c0_37 = arith.constant 0 : index
    %c0_38 = arith.constant 0 : index
    %25 = vector.load %arg3[%c2_36, %c0_37, %c0_38] : memref<9x8x8xf32, #tpu.memory_space<vmem>>, vector<1x8x8xf32>
    %26 = vector.shape_cast %25 : vector<1x8x8xf32> to vector<8x8xf32>
    "tpu.trace_start"() <{level = 10 : i32, message = "hwi,io->hwo"}> : () -> ()
    %cst_39 = arith.constant dense<0.000000e+00> : vector<16x16x8xf32>
    %27 = tpu.matmul %24, %26, %cst_39 {dimension_numbers = #tpu.dot_dimension_numbers<[2], [0], [0, 1], [1], [0, 0, 0, 1, 1, 1], [], []>} : vector<16x16x8xf32>, vector<8x8xf32>, vector<16x16x8xf32> -> vector<16x16x8xf32>
    "tpu.trace_stop"() : () -> ()
    %28 = arith.addf %23, %27 : vector<16x16x8xf32>
    %c1_40 = arith.constant 1 : index
    %c0_41 = arith.constant 0 : index
    %c0_42 = arith.constant 0 : index
    %29 = vector.load %arg8[%c1_40, %c0_41, %c0_42] : memref<18x18x8xf32, #tpu.memory_space<vmem>>, vector<16x16x8xf32>
    %c3 = arith.constant 3 : index
    %c0_43 = arith.constant 0 : index
    %c0_44 = arith.constant 0 : index
    %30 = vector.load %arg3[%c3, %c0_43, %c0_44] : memref<9x8x8xf32, #tpu.memory_space<vmem>>, vector<1x8x8xf32>
    %31 = vector.shape_cast %30 : vector<1x8x8xf32> to vector<8x8xf32>
    "tpu.trace_start"() <{level = 10 : i32, message = "hwi,io->hwo"}> : () -> ()
    %cst_45 = arith.constant dense<0.000000e+00> : vector<16x16x8xf32>
    %32 = tpu.matmul %29, %31, %cst_45 {dimension_numbers = #tpu.dot_dimension_numbers<[2], [0], [0, 1], [1], [0, 0, 0, 1, 1, 1], [], []>} : vector<16x16x8xf32>, vector<8x8xf32>, vector<16x16x8xf32> -> vector<16x16x8xf32>
    "tpu.trace_stop"() : () -> ()
    %33 = arith.addf %28, %32 : vector<16x16x8xf32>
    %c1_46 = arith.constant 1 : index
    %c1_47 = arith.constant 1 : index
    %c0_48 = arith.constant 0 : index
    %34 = vector.load %arg8[%c1_46, %c1_47, %c0_48] : memref<18x18x8xf32, #tpu.memory_space<vmem>>, vector<16x16x8xf32>
    %c4_49 = arith.constant 4 : index
    %c0_50 = arith.constant 0 : index
    %c0_51 = arith.constant 0 : index
    %35 = vector.load %arg3[%c4_49, %c0_50, %c0_51] : memref<9x8x8xf32, #tpu.memory_space<vmem>>, vector<1x8x8xf32>
    %36 = vector.shape_cast %35 : vector<1x8x8xf32> to vector<8x8xf32>
    "tpu.trace_start"() <{level = 10 : i32, message = "hwi,io->hwo"}> : () -> ()
    %cst_52 = arith.constant dense<0.000000e+00> : vector<16x16x8xf32>
    %37 = tpu.matmul %34, %36, %cst_52 {dimension_numbers = #tpu.dot_dimension_numbers<[2], [0], [0, 1], [1], [0, 0, 0, 1, 1, 1], [], []>} : vector<16x16x8xf32>, vector<8x8xf32>, vector<16x16x8xf32> -> vector<16x16x8xf32>
    "tpu.trace_stop"() : () -> ()
    %38 = arith.addf %33, %37 : vector<16x16x8xf32>
    %c1_53 = arith.constant 1 : index
    %c2_54 = arith.constant 2 : index
    %c0_55 = arith.constant 0 : index
    %39 = vector.load %arg8[%c1_53, %c2_54, %c0_55] : memref<18x18x8xf32, #tpu.memory_space<vmem>>, vector<16x16x8xf32>
    %c5 = arith.constant 5 : index
    %c0_56 = arith.constant 0 : index
    %c0_57 = arith.constant 0 : index
    %40 = vector.load %arg3[%c5, %c0_56, %c0_57] : memref<9x8x8xf32, #tpu.memory_space<vmem>>, vector<1x8x8xf32>
    %41 = vector.shape_cast %40 : vector<1x8x8xf32> to vector<8x8xf32>
    "tpu.trace_start"() <{level = 10 : i32, message = "hwi,io->hwo"}> : () -> ()
    %cst_58 = arith.constant dense<0.000000e+00> : vector<16x16x8xf32>
    %42 = tpu.matmul %39, %41, %cst_58 {dimension_numbers = #tpu.dot_dimension_numbers<[2], [0], [0, 1], [1], [0, 0, 0, 1, 1, 1], [], []>} : vector<16x16x8xf32>, vector<8x8xf32>, vector<16x16x8xf32> -> vector<16x16x8xf32>
    "tpu.trace_stop"() : () -> ()
    %43 = arith.addf %38, %42 : vector<16x16x8xf32>
    %c2_59 = arith.constant 2 : index
    %c0_60 = arith.constant 0 : index
    %c0_61 = arith.constant 0 : index
    %44 = vector.load %arg8[%c2_59, %c0_60, %c0_61] : memref<18x18x8xf32, #tpu.memory_space<vmem>>, vector<16x16x8xf32>
    %c6 = arith.constant 6 : index
    %c0_62 = arith.constant 0 : index
    %c0_63 = arith.constant 0 : index
    %45 = vector.load %arg3[%c6, %c0_62, %c0_63] : memref<9x8x8xf32, #tpu.memory_space<vmem>>, vector<1x8x8xf32>
    %46 = vector.shape_cast %45 : vector<1x8x8xf32> to vector<8x8xf32>
    "tpu.trace_start"() <{level = 10 : i32, message = "hwi,io->hwo"}> : () -> ()
    %cst_64 = arith.constant dense<0.000000e+00> : vector<16x16x8xf32>
    %47 = tpu.matmul %44, %46, %cst_64 {dimension_numbers = #tpu.dot_dimension_numbers<[2], [0], [0, 1], [1], [0, 0, 0, 1, 1, 1], [], []>} : vector<16x16x8xf32>, vector<8x8xf32>, vector<16x16x8xf32> -> vector<16x16x8xf32>
    "tpu.trace_stop"() : () -> ()
    %48 = arith.addf %43, %47 : vector<16x16x8xf32>
    %c2_65 = arith.constant 2 : index
    %c1_66 = arith.constant 1 : index
    %c0_67 = arith.constant 0 : index
    %49 = vector.load %arg8[%c2_65, %c1_66, %c0_67] : memref<18x18x8xf32, #tpu.memory_space<vmem>>, vector<16x16x8xf32>
    %c7 = arith.constant 7 : index
    %c0_68 = arith.constant 0 : index
    %c0_69 = arith.constant 0 : index
    %50 = vector.load %arg3[%c7, %c0_68, %c0_69] : memref<9x8x8xf32, #tpu.memory_space<vmem>>, vector<1x8x8xf32>
    %51 = vector.shape_cast %50 : vector<1x8x8xf32> to vector<8x8xf32>
    "tpu.trace_start"() <{level = 10 : i32, message = "hwi,io->hwo"}> : () -> ()
    %cst_70 = arith.constant dense<0.000000e+00> : vector<16x16x8xf32>
    %52 = tpu.matmul %49, %51, %cst_70 {dimension_numbers = #tpu.dot_dimension_numbers<[2], [0], [0, 1], [1], [0, 0, 0, 1, 1, 1], [], []>} : vector<16x16x8xf32>, vector<8x8xf32>, vector<16x16x8xf32> -> vector<16x16x8xf32>
    "tpu.trace_stop"() : () -> ()
    %53 = arith.addf %48, %52 : vector<16x16x8xf32>
    %c2_71 = arith.constant 2 : index
    %c2_72 = arith.constant 2 : index
    %c0_73 = arith.constant 0 : index
    %54 = vector.load %arg8[%c2_71, %c2_72, %c0_73] : memref<18x18x8xf32, #tpu.memory_space<vmem>>, vector<16x16x8xf32>
    %c8 = arith.constant 8 : index
    %c0_74 = arith.constant 0 : index
    %c0_75 = arith.constant 0 : index
    %55 = vector.load %arg3[%c8, %c0_74, %c0_75] : memref<9x8x8xf32, #tpu.memory_space<vmem>>, vector<1x8x8xf32>
    %56 = vector.shape_cast %55 : vector<1x8x8xf32> to vector<8x8xf32>
    "tpu.trace_start"() <{level = 10 : i32, message = "hwi,io->hwo"}> : () -> ()
    %cst_76 = arith.constant dense<0.000000e+00> : vector<16x16x8xf32>
    %57 = tpu.matmul %54, %56, %cst_76 {dimension_numbers = #tpu.dot_dimension_numbers<[2], [0], [0, 1], [1], [0, 0, 0, 1, 1, 1], [], []>} : vector<16x16x8xf32>, vector<8x8xf32>, vector<16x16x8xf32> -> vector<16x16x8xf32>
    "tpu.trace_stop"() : () -> ()
    %58 = arith.addf %53, %57 : vector<16x16x8xf32>
    %cst_77 = arith.constant 0.000000e+00 : f32
    %59 = vector.broadcast %cst_77 : f32 to vector<16x16x8xf32>
    %60 = arith.cmpf oge, %58, %59 : vector<16x16x8xf32>
    %cst_78 = arith.constant 1.000000e-01 : f32
    %61 = vector.broadcast %cst_78 : f32 to vector<16x16x8xf32>
    %62 = arith.mulf %61, %58 : vector<16x16x8xf32>
    %63 = arith.select %60, %58, %62 : vector<16x16x8xi1>, vector<16x16x8xf32>
    %c1_79 = arith.constant 1 : index
    %c1_80 = arith.constant 1 : index
    %c0_81 = arith.constant 0 : index
    %64 = vector.load %arg9[%c1_79, %c1_80, %c0_81] : memref<18x18x8xf32, #tpu.memory_space<vmem>>, vector<16x16x8xf32>
    tpu.vector_store %arg9[%c1_79, %c1_80, %c0_81], %63 {strides = array<i32>} : memref<18x18x8xf32, #tpu.memory_space<vmem>>, vector<16x16x8xf32>,
    %c0_82 = arith.constant 0 : index
    %c0_83 = arith.constant 0 : index
    %65 = vector.load %arg6[%c0_82, %c0_83] : memref<1x4xf32, #tpu.memory_space<vmem>>, vector<1x4xf32>
    %66 = vector.shape_cast %65 : vector<1x4xf32> to vector<1x1x4xf32>
    %67 = vector.shape_cast %66 : vector<1x1x4xf32> to vector<1x1x4xf32>
    %68 = vector.broadcast %67 : vector<1x1x4xf32> to vector<16x16x4xf32>
    %c0_84 = arith.constant 0 : index
    %c0_85 = arith.constant 0 : index
    %c0_86 = arith.constant 0 : index
    %69 = vector.load %arg9[%c0_84, %c0_85, %c0_86] : memref<18x18x8xf32, #tpu.memory_space<vmem>>, vector<16x16x8xf32>
    %c0_87 = arith.constant 0 : index
    %c0_88 = arith.constant 0 : index
    %c0_89 = arith.constant 0 : index
    %70 = vector.load %arg5[%c0_87, %c0_88, %c0_89] : memref<9x8x4xf32, #tpu.memory_space<vmem>>, vector<1x8x4xf32>
    %71 = vector.shape_cast %70 : vector<1x8x4xf32> to vector<8x4xf32>
    "tpu.trace_start"() <{level = 10 : i32, message = "hwi,io->hwo"}> : () -> ()
    %cst_90 = arith.constant dense<0.000000e+00> : vector<16x16x4xf32>
    %72 = tpu.matmul %69, %71, %cst_90 {dimension_numbers = #tpu.dot_dimension_numbers<[2], [0], [0, 1], [1], [0, 0, 0, 1, 1, 1], [], []>} : vector<16x16x8xf32>, vector<8x4xf32>, vector<16x16x4xf32> -> vector<16x16x4xf32>
    "tpu.trace_stop"() : () -> ()
    %73 = arith.addf %68, %72 : vector<16x16x4xf32>
    %c0_91 = arith.constant 0 : index
    %c1_92 = arith.constant 1 : index
    %c0_93 = arith.constant 0 : index
    %74 = vector.load %arg9[%c0_91, %c1_92, %c0_93] : memref<18x18x8xf32, #tpu.memory_space<vmem>>, vector<16x16x8xf32>
    %c1_94 = arith.constant 1 : index
    %c0_95 = arith.constant 0 : index
    %c0_96 = arith.constant 0 : index
    %75 = vector.load %arg5[%c1_94, %c0_95, %c0_96] : memref<9x8x4xf32, #tpu.memory_space<vmem>>, vector<1x8x4xf32>
    %76 = vector.shape_cast %75 : vector<1x8x4xf32> to vector<8x4xf32>
    "tpu.trace_start"() <{level = 10 : i32, message = "hwi,io->hwo"}> : () -> ()
    %cst_97 = arith.constant dense<0.000000e+00> : vector<16x16x4xf32>
    %77 = tpu.matmul %74, %76, %cst_97 {dimension_numbers = #tpu.dot_dimension_numbers<[2], [0], [0, 1], [1], [0, 0, 0, 1, 1, 1], [], []>} : vector<16x16x8xf32>, vector<8x4xf32>, vector<16x16x4xf32> -> vector<16x16x4xf32>
    "tpu.trace_stop"() : () -> ()
    %78 = arith.addf %73, %77 : vector<16x16x4xf32>
    %c0_98 = arith.constant 0 : index
    %c2_99 = arith.constant 2 : index
    %c0_100 = arith.constant 0 : index
    %79 = vector.load %arg9[%c0_98, %c2_99, %c0_100] : memref<18x18x8xf32, #tpu.memory_space<vmem>>, vector<16x16x8xf32>
    %c2_101 = arith.constant 2 : index
    %c0_102 = arith.constant 0 : index
    %c0_103 = arith.constant 0 : index
    %80 = vector.load %arg5[%c2_101, %c0_102, %c0_103] : memref<9x8x4xf32, #tpu.memory_space<vmem>>, vector<1x8x4xf32>
    %81 = vector.shape_cast %80 : vector<1x8x4xf32> to vector<8x4xf32>
    "tpu.trace_start"() <{level = 10 : i32, message = "hwi,io->hwo"}> : () -> ()
    %cst_104 = arith.constant dense<0.000000e+00> : vector<16x16x4xf32>
    %82 = tpu.matmul %79, %81, %cst_104 {dimension_numbers = #tpu.dot_dimension_numbers<[2], [0], [0, 1], [1], [0, 0, 0, 1, 1, 1], [], []>} : vector<16x16x8xf32>, vector<8x4xf32>, vector<16x16x4xf32> -> vector<16x16x4xf32>
    "tpu.trace_stop"() : () -> ()
    %83 = arith.addf %78, %82 : vector<16x16x4xf32>
    %c1_105 = arith.constant 1 : index
    %c0_106 = arith.constant 0 : index
    %c0_107 = arith.constant 0 : index
    %84 = vector.load %arg9[%c1_105, %c0_106, %c0_107] : memref<18x18x8xf32, #tpu.memory_space<vmem>>, vector<16x16x8xf32>
    %c3_108 = arith.constant 3 : index
    %c0_109 = arith.constant 0 : index
    %c0_110 = arith.constant 0 : index
    %85 = vector.load %arg5[%c3_108, %c0_109, %c0_110] : memref<9x8x4xf32, #tpu.memory_space<vmem>>, vector<1x8x4xf32>
    %86 = vector.shape_cast %85 : vector<1x8x4xf32> to vector<8x4xf32>
    "tpu.trace_start"() <{level = 10 : i32, message = "hwi,io->hwo"}> : () -> ()
    %cst_111 = arith.constant dense<0.000000e+00> : vector<16x16x4xf32>
    %87 = tpu.matmul %84, %86, %cst_111 {dimension_numbers = #tpu.dot_dimension_numbers<[2], [0], [0, 1], [1], [0, 0, 0, 1, 1, 1], [], []>} : vector<16x16x8xf32>, vector<8x4xf32>, vector<16x16x4xf32> -> vector<16x16x4xf32>
    "tpu.trace_stop"() : () -> ()
    %88 = arith.addf %83, %87 : vector<16x16x4xf32>
    %c1_112 = arith.constant 1 : index
    %c1_113 = arith.constant 1 : index
    %c0_114 = arith.constant 0 : index
    %89 = vector.load %arg9[%c1_112, %c1_113, %c0_114] : memref<18x18x8xf32, #tpu.memory_space<vmem>>, vector<16x16x8xf32>
    %c4_115 = arith.constant 4 : index
    %c0_116 = arith.constant 0 : index
    %c0_117 = arith.constant 0 : index
    %90 = vector.load %arg5[%c4_115, %c0_116, %c0_117] : memref<9x8x4xf32, #tpu.memory_space<vmem>>, vector<1x8x4xf32>
    %91 = vector.shape_cast %90 : vector<1x8x4xf32> to vector<8x4xf32>
    "tpu.trace_start"() <{level = 10 : i32, message = "hwi,io->hwo"}> : () -> ()
    %cst_118 = arith.constant dense<0.000000e+00> : vector<16x16x4xf32>
    %92 = tpu.matmul %89, %91, %cst_118 {dimension_numbers = #tpu.dot_dimension_numbers<[2], [0], [0, 1], [1], [0, 0, 0, 1, 1, 1], [], []>} : vector<16x16x8xf32>, vector<8x4xf32>, vector<16x16x4xf32> -> vector<16x16x4xf32>
    "tpu.trace_stop"() : () -> ()
    %93 = arith.addf %88, %92 : vector<16x16x4xf32>
    %c1_119 = arith.constant 1 : index
    %c2_120 = arith.constant 2 : index
    %c0_121 = arith.constant 0 : index
    %94 = vector.load %arg9[%c1_119, %c2_120, %c0_121] : memref<18x18x8xf32, #tpu.memory_space<vmem>>, vector<16x16x8xf32>
    %c5_122 = arith.constant 5 : index
    %c0_123 = arith.constant 0 : index
    %c0_124 = arith.constant 0 : index
    %95 = vector.load %arg5[%c5_122, %c0_123, %c0_124] : memref<9x8x4xf32, #tpu.memory_space<vmem>>, vector<1x8x4xf32>
    %96 = vector.shape_cast %95 : vector<1x8x4xf32> to vector<8x4xf32>
    "tpu.trace_start"() <{level = 10 : i32, message = "hwi,io->hwo"}> : () -> ()
    %cst_125 = arith.constant dense<0.000000e+00> : vector<16x16x4xf32>
    %97 = tpu.matmul %94, %96, %cst_125 {dimension_numbers = #tpu.dot_dimension_numbers<[2], [0], [0, 1], [1], [0, 0, 0, 1, 1, 1], [], []>} : vector<16x16x8xf32>, vector<8x4xf32>, vector<16x16x4xf32> -> vector<16x16x4xf32>
    "tpu.trace_stop"() : () -> ()
    %98 = arith.addf %93, %97 : vector<16x16x4xf32>
    %c2_126 = arith.constant 2 : index
    %c0_127 = arith.constant 0 : index
    %c0_128 = arith.constant 0 : index
    %99 = vector.load %arg9[%c2_126, %c0_127, %c0_128] : memref<18x18x8xf32, #tpu.memory_space<vmem>>, vector<16x16x8xf32>
    %c6_129 = arith.constant 6 : index
    %c0_130 = arith.constant 0 : index
    %c0_131 = arith.constant 0 : index
    %100 = vector.load %arg5[%c6_129, %c0_130, %c0_131] : memref<9x8x4xf32, #tpu.memory_space<vmem>>, vector<1x8x4xf32>
    %101 = vector.shape_cast %100 : vector<1x8x4xf32> to vector<8x4xf32>
    "tpu.trace_start"() <{level = 10 : i32, message = "hwi,io->hwo"}> : () -> ()
    %cst_132 = arith.constant dense<0.000000e+00> : vector<16x16x4xf32>
    %102 = tpu.matmul %99, %101, %cst_132 {dimension_numbers = #tpu.dot_dimension_numbers<[2], [0], [0, 1], [1], [0, 0, 0, 1, 1, 1], [], []>} : vector<16x16x8xf32>, vector<8x4xf32>, vector<16x16x4xf32> -> vector<16x16x4xf32>
    "tpu.trace_stop"() : () -> ()
    %103 = arith.addf %98, %102 : vector<16x16x4xf32>
    %c2_133 = arith.constant 2 : index
    %c1_134 = arith.constant 1 : index
    %c0_135 = arith.constant 0 : index
    %104 = vector.load %arg9[%c2_133, %c1_134, %c0_135] : memref<18x18x8xf32, #tpu.memory_space<vmem>>, vector<16x16x8xf32>
    %c7_136 = arith.constant 7 : index
    %c0_137 = arith.constant 0 : index
    %c0_138 = arith.constant 0 : index
    %105 = vector.load %arg5[%c7_136, %c0_137, %c0_138] : memref<9x8x4xf32, #tpu.memory_space<vmem>>, vector<1x8x4xf32>
    %106 = vector.shape_cast %105 : vector<1x8x4xf32> to vector<8x4xf32>
    "tpu.trace_start"() <{level = 10 : i32, message = "hwi,io->hwo"}> : () -> ()
    %cst_139 = arith.constant dense<0.000000e+00> : vector<16x16x4xf32>
    %107 = tpu.matmul %104, %106, %cst_139 {dimension_numbers = #tpu.dot_dimension_numbers<[2], [0], [0, 1], [1], [0, 0, 0, 1, 1, 1], [], []>} : vector<16x16x8xf32>, vector<8x4xf32>, vector<16x16x4xf32> -> vector<16x16x4xf32>
    "tpu.trace_stop"() : () -> ()
    %108 = arith.addf %103, %107 : vector<16x16x4xf32>
    %c2_140 = arith.constant 2 : index
    %c2_141 = arith.constant 2 : index
    %c0_142 = arith.constant 0 : index
    %109 = vector.load %arg9[%c2_140, %c2_141, %c0_142] : memref<18x18x8xf32, #tpu.memory_space<vmem>>, vector<16x16x8xf32>
    %c8_143 = arith.constant 8 : index
    %c0_144 = arith.constant 0 : index
    %c0_145 = arith.constant 0 : index
    %110 = vector.load %arg5[%c8_143, %c0_144, %c0_145] : memref<9x8x4xf32, #tpu.memory_space<vmem>>, vector<1x8x4xf32>
    %111 = vector.shape_cast %110 : vector<1x8x4xf32> to vector<8x4xf32>
    "tpu.trace_start"() <{level = 10 : i32, message = "hwi,io->hwo"}> : () -> ()
    %cst_146 = arith.constant dense<0.000000e+00> : vector<16x16x4xf32>
    %112 = tpu.matmul %109, %111, %cst_146 {dimension_numbers = #tpu.dot_dimension_numbers<[2], [0], [0, 1], [1], [0, 0, 0, 1, 1, 1], [], []>} : vector<16x16x8xf32>, vector<8x4xf32>, vector<16x16x4xf32> -> vector<16x16x4xf32>
    "tpu.trace_stop"() : () -> ()
    %113 = arith.addf %108, %112 : vector<16x16x4xf32>
    %cst_147 = arith.constant 0.000000e+00 : f32
    %114 = vector.broadcast %cst_147 : f32 to vector<16x16x4xf32>
    %115 = arith.cmpf oge, %113, %114 : vector<16x16x4xf32>
    %cst_148 = arith.constant 1.000000e-01 : f32
    %116 = vector.broadcast %cst_148 : f32 to vector<16x16x4xf32>
    %117 = arith.mulf %116, %113 : vector<16x16x4xf32>
    %118 = arith.select %115, %113, %117 : vector<16x16x4xi1>, vector<16x16x4xf32>
    %c0_149 = arith.constant 0 : index
    %c0_150 = arith.constant 0 : index
    %c0_151 = arith.constant 0 : index
    %c0_152 = arith.constant 0 : index
    %119 = vector.load %arg7[%c0_149, %c0_150, %c0_151, %c0_152] : memref<1x16x16x4xf32, #tpu.memory_space<vmem>>, vector<1x16x16x4xf32>
    %120 = vector.shape_cast %119 : vector<1x16x16x4xf32> to vector<16x16x4xf32>
    %121 = vector.shape_cast %118 : vector<16x16x4xf32> to vector<1x16x16x4xf32>
    tpu.vector_store %arg7[%c0_149, %c0_150, %c0_151, %c0_152], %121 {strides = array<i32>} : memref<1x16x16x4xf32, #tpu.memory_space<vmem>>, vector<1x16x16x4xf32>,
    return
  }
  func.func @transform_0(%arg0: i32) -> (i32, i32, i32, i32) {
    %c0_i32 = arith.constant 0 : i32
    %c0_i32_0 = arith.constant 0 : i32
    %c0_i32_1 = arith.constant 0 : i32
    %c0_i32_2 = arith.constant 0 : i32
    return %arg0, %c0_i32, %c0_i32_0, %c0_i32_1 : i32, i32, i32, i32
  }
  func.func @transform_1(%arg0: i32) -> (i32, i32, i32, i32) {
    %c0_i32 = arith.constant 0 : i32
    %c0_i32_0 = arith.constant 0 : i32
    %c0_i32_1 = arith.constant 0 : i32
    %c0_i32_2 = arith.constant 0 : i32
    return %arg0, %c0_i32, %c0_i32_0, %c0_i32_1 : i32, i32, i32, i32
  }
  func.func @transform_2(%arg0: i32) -> (i32, i32, i32) {
    %c0_i32 = arith.constant 0 : i32
    %c0_i32_0 = arith.constant 0 : i32
    %c0_i32_1 = arith.constant 0 : i32
    %c0_i32_2 = arith.constant 0 : i32
    return %c0_i32, %c0_i32_0, %c0_i32_1 : i32, i32, i32
  }
  func.func @transform_3(%arg0: i32) -> (i32, i32) {
    %c0_i32 = arith.constant 0 : i32
    %c0_i32_0 = arith.constant 0 : i32
    %c0_i32_1 = arith.constant 0 : i32
    return %c0_i32, %c0_i32_0 : i32, i32
  }
  func.func @transform_4(%arg0: i32) -> (i32, i32, i32) {
    %c0_i32 = arith.constant 0 : i32
    %c0_i32_0 = arith.constant 0 : i32
    %c0_i32_1 = arith.constant 0 : i32
    %c0_i32_2 = arith.constant 0 : i32
    return %c0_i32, %c0_i32_0, %c0_i32_1 : i32, i32, i32
  }
  func.func @transform_5(%arg0: i32) -> (i32, i32) {
    %c0_i32 = arith.constant 0 : i32
    %c0_i32_0 = arith.constant 0 : i32
    %c0_i32_1 = arith.constant 0 : i32
    return %c0_i32, %c0_i32_0 : i32, i32
  }
  func.func @transform_6(%arg0: i32) -> (i32, i32, i32, i32) {
    %c0_i32 = arith.constant 0 : i32
    %c0_i32_0 = arith.constant 0 : i32
    %c0_i32_1 = arith.constant 0 : i32
    %c0_i32_2 = arith.constant 0 : i32
    return %arg0, %c0_i32, %c0_i32_0, %c0_i32_1 : i32, i32, i32, i32
  }
}

</mosaic_0001>

<bundles_post_ra>
// kernel: up_forward.1
= control target key start
LH: loop header
LB: loop body
LE: loop exit
PB: predicated region body
PF: predicated region fallthrough
CT: control target
= control target key end

     0   :  { %s10138_s21 = smov 0   ;;  %s13488_s0 = inlined_call_operand.vmem [shape: f32[2,16,16,4], index: 0, kind: input, shape index: {}]   ;;  %s13489_s1 = inlined_call_operand.vmem [shape: f32[2,18,18,4], index: 1, kind: input, shape index: {}]   ;;  %s13490_s2 = inlined_call_operand.vmem [shape: f32[9,8,8], index: 2, kind: input, shape index: {}]   ;;  %s13491_s3 = inlined_call_operand.vmem [shape: f32[1,8], index: 3, kind: input, shape index: {}]   ;;  %s13492_s4 = inlined_call_operand.vmem [shape: f32[9,8,4], index: 4, kind: input, shape index: {}]   ;;  %s13493_s5 = inlined_call_operand.vmem [shape: f32[1,4], index: 5, kind: input, shape index: {}]   ;;  %s13494_s6 = inlined_call_operand.vmem [shape: f32[2,16,16,4], index: 6, kind: output, shape index: {}]  }
   0x1 LB: > { %s7946_s22 = sadd.s32 4294967295, %s10099_s21   ;;  %p7950_p0 = scmp.ge.s32.totalorder %s10099_s21, 1  ;;  %s10099_s21 = sphi %s10138_s21, %s16_s21  }
   0x2   : > { %p222_p1 = scmp.lt.s32.totalorder %s10099_s21, 3 }
   0x4   : > { %p223_p2 = pnand %p7950_p0, %p222_p1 }
   0x6   : > { %226 = sbr.rel (%p223_p2) target bundleno = 1139 (0x473), region = 44 }
   0xb   : > { %p10148_p3 = scmp.lt.s32.totalorder %s7946_s22, 1  ;;  %vm272_vm0 = vcmask 64512   ;;  %v10101_v0 = vmov 0.0   ;;  %vm275_vm1 = vcmask 58368   ;;  %v681_v1 = vld [vmem:[%s13490_s2] sm:$0xff]  ;;  %v8021_v2 = vld [vmem:[%s13490_s2 + $0x8] sm:$0xff] }
   0xc   : > { %280 = vst.msk [vmem:[#allocation2 + $0x30] sm:$0xff] %vm272_vm0, %v10101_v0  ;;  %281 = vst.msk [vmem:[#allocation2 + $0x38] sm:$0xff] %vm272_vm0, %v10101_v0  ;;  %v10305_v3 = vld [vmem:[%s13490_s2 + $0x10] sm:$0xff]  ;;  %9180 = vmatprep.subr.mxu0 %v681_v1  ;;  %9230 = vmatprep.subr.mxu1 %v8021_v2  ;;  %s10102_s10 = smov 4   ;;  %vm416_vm2 = vcmask 31744   ;;  %vm609_vm3 = vcmask 64544  }
   0xd   : > { %273 = vst.msk [vmem:[#allocation2] sm:$0xff] %vm272_vm0, %v10101_v0  ;;  %274 = vst.msk [vmem:[#allocation2 + $0x8] sm:$0xff] %vm272_vm0, %v10101_v0  ;;  %s13992_s22 = smov (!%p10148_p3, %s7946_s22), 1  ;;  %9181 = vmatpush3.msra.mxu0 %v681_v1  ;;  %9231 = vmatpush3.msra.mxu1 %v8021_v2 }
   0xe   : > { %277 = vst.msk [vmem:[#allocation2 + $0x18] sm:$0xff] %vm272_vm0, %v10101_v0  ;;  %278 = vst.msk [vmem:[#allocation2 + $0x20] sm:$0xff] %vm272_vm0, %v10101_v0  ;;  %s8584_s30 = sshll.u32 %s13992_s22, 8  ;;  %9280 = vmatprep.subr.mxu0 %v10305_v3  ;;  %s10080_s11 = smul.u32 432, %s13992_s22 }
   0xf   : > { %283 = vst.msk [vmem:[#allocation2 + $0x48] sm:$0xff] %vm272_vm0, %v10101_v0  ;;  %284 = vst.msk [vmem:[#allocation2 + $0x50] sm:$0xff] %vm272_vm0, %v10101_v0  ;;  %s10392_s9 = scalar_lea.vmem %s13488_s0, %s8584_s30  ;;  %s13299_s13 = scalar_lea.vmem %s13494_s6, %s8584_s30 }
  0x10   : > { %286 = vst.msk [vmem:[#allocation2 + $0x60] sm:$0xff] %vm272_vm0, %v10101_v0  ;;  %287 = vst.msk [vmem:[#allocation2 + $0x68] sm:$0xff] %vm272_vm0, %v10101_v0  ;;  %v451_v4 = vld [vmem:[%s10392_s9 + $0x10] sm:$0xff]  ;;  %v449_v5 = vld [vmem:[%s10392_s9] sm:$0xff]  ;;  %s10409_s14 = scalar_lea.vmem %s13489_s1, %s10080_s11 }
  0x11   : > { %289 = vst.msk [vmem:[#allocation2 + $0x78] sm:$0xff] %vm272_vm0, %v10101_v0  ;;  %290 = vst.msk [vmem:[#allocation2 + $0x80] sm:$0xff] %vm272_vm0, %v10101_v0  ;;  %517 = vrot.lane.b32.xlu1 %v451_v4, %s10102_s10  ;;  %513 = vrot.lane.b32.xlu0 %v449_v5, %s10102_s10  ;;  %v452_v6 = vld [vmem:[%s10392_s9 + $0x18] sm:$0xff]  ;;  %v450_v7 = vld [vmem:[%s10392_s9 + $0x8] sm:$0xff] }
  0x12   : > { %292 = vst.msk [vmem:[#allocation2 + $0x90] sm:$0xff] %vm272_vm0, %v10101_v0  ;;  %293 = vst.msk [vmem:[#allocation2 + $0x98] sm:$0xff] %vm272_vm0, %v10101_v0  ;;  %v454_v9 = vld [vmem:[%s10392_s9 + $0x28] sm:$0xff]  ;;  %v453_v10 = vld [vmem:[%s10392_s9 + $0x20] sm:$0xff] }
  0x13   : > { %295 = vst.msk [vmem:[#allocation2 + $0xa8] sm:$0xff] %vm272_vm0, %v10101_v0  ;;  %296 = vst.msk [vmem:[#allocation2 + $0xb0] sm:$0xff] %vm272_vm0, %v10101_v0  ;;  %v456_v12 = vld [vmem:[%s10392_s9 + $0x38] sm:$0xff]  ;;  %v455_v13 = vld [vmem:[%s10392_s9 + $0x30] sm:$0xff] }
  0x14   : > { %298 = vst.msk [vmem:[#allocation2 + $0xc0] sm:$0xff] %vm272_vm0, %v10101_v0  ;;  %299 = vst.msk [vmem:[#allocation2 + $0xc8] sm:$0xff] %vm272_vm0, %v10101_v0  ;;  %v649_v8 = vld [vmem:[#allocation2] sm:$0xff]  ;;  %v650_v11 = vld [vmem:[#allocation2 + $0x8] sm:$0xff] }
  0x15   : > { %301 = vst.msk [vmem:[#allocation2 + $0xd8] sm:$0xff] %vm272_vm0, %v10101_v0  ;;  %302 = vst.msk [vmem:[#allocation2 + $0xe0] sm:$0xff] %vm272_vm0, %v10101_v0  ;;  %519 = vrot.lane.b32.xlu1 %v452_v6, %s10102_s10  ;;  %515 = vrot.lane.b32.xlu0 %v450_v7, %s10102_s10  ;;  %v7958_v14 = vld [vmem:[%s10409_s14 + $0x31] sm:$0xff]  ;;  %v7956_v15 = vld [vmem:[%s10409_s14 + $0x19] sm:$0xff] }
  0x16   : > { %304 = vst.msk [vmem:[#allocation2 + $0xf0] sm:$0xff] %vm272_vm0, %v10101_v0  ;;  %305 = vst.msk [vmem:[#allocation2 + $0xf8] sm:$0xff] %vm272_vm0, %v10101_v0  ;;  %9182 = vmatprep.mubr.msk.f32.mxu0 %vm272_vm0, %v649_v8  ;;  %v7959_v16 = vld [vmem:[%s10409_s14 + $0x39] sm:$0xff]  ;;  %v7957_v17 = vld [vmem:[%s10409_s14 + $0x21] sm:$0xff] }
  0x17   : > { %307 = vst.msk [vmem:[#allocation2 + $0x108] sm:$0xff] %vm272_vm0, %v10101_v0  ;;  %308 = vst.msk [vmem:[#allocation2 + $0x110] sm:$0xff] %vm272_vm0, %v10101_v0  ;;  %9183 = vmatmul.mubr.msk.f32.vlgmr.msra.gmra.mxu0 %vm272_vm0, %v650_v11  ;;  %v1035_v18 = vld [vmem:[#allocation2 + $0x1] sm:$0xff]  ;;  %v7961_v22 = vld [vmem:[%s10409_s14 + $0x51] sm:$0xff] }
  0x18   : > { %310 = vst.msk [vmem:[#allocation2 + $0x120] sm:$0xff] %vm272_vm0, %v10101_v0  ;;  %311 = vst.msk [vmem:[#allocation2 + $0x128] sm:$0xff] %vm272_vm0, %v10101_v0  ;;  %9281 = vmatpush3.msra.mxu0 %v10305_v3  ;;  %v458_v20 = vld [vmem:[%s10392_s9 + $0x48] sm:$0xff]  ;;  %v457_v21 = vld [vmem:[%s10392_s9 + $0x40] sm:$0xff]  ;;  %9232 = vmatprep.mubr.msk.f32.mxu1 %vm272_vm0, %v1035_v18 }
  0x19   : > { %313 = vst.msk [vmem:[#allocation2 + $0x138] sm:$0xff] %vm272_vm0, %v10101_v0  ;;  %314 = vst.msk [vmem:[#allocation2 + $0x140] sm:$0xff] %vm272_vm0, %v10101_v0  ;;  %523 = vrot.lane.b32.xlu1 %v454_v9, %s10102_s10  ;;  %521 = vrot.lane.b32.xlu0 %v453_v10, %s10102_s10  ;;  %v7960_v23 = vld [vmem:[%s10409_s14 + $0x49] sm:$0xff]  ;;  %v7962_v25 = vld [vmem:[%s10409_s14 + $0x61] sm:$0xff] }
  0x1a   : > { %316 = vst.msk [vmem:[#allocation2 + $0x150] sm:$0xff] %vm272_vm0, %v10101_v0  ;;  %317 = vst.msk [vmem:[#allocation2 + $0x158] sm:$0xff] %vm272_vm0, %v10101_v0  ;;  %v7963_v24 = vld [vmem:[%s10409_s14 + $0x69] sm:$0xff]  ;;  %v7965_v26 = vld [vmem:[%s10409_s14 + $0x81] sm:$0xff] }
  0x1b   : > { %319 = vst.msk [vmem:[#allocation2 + $0x168] sm:$0xff] %vm272_vm0, %v10101_v0  ;;  %320 = vst.msk [vmem:[#allocation2 + $0x170] sm:$0xff] %vm272_vm0, %v10101_v0  ;;  %v7964_v27 = vld [vmem:[%s10409_s14 + $0x79] sm:$0xff]  ;;  %v7966_v29 = vld [vmem:[%s10409_s14 + $0x91] sm:$0xff] }
  0x1c   : > { %322 = vst.msk [vmem:[#allocation2 + $0x180] sm:$0xff] %vm272_vm0, %v10101_v0  ;;  %323 = vst.msk [vmem:[#allocation2 + $0x188] sm:$0xff] %vm272_vm0, %v10101_v0  ;;  %v7967_v28 = vld [vmem:[%s10409_s14 + $0x99] sm:$0xff]  ;;  %v7969_v30 = vld [vmem:[%s10409_s14 + $0xb1] sm:$0xff] }
  0x1d   : > { %325 = vst.msk [vmem:[#allocation2 + $0x198] sm:$0xff] %vm272_vm0, %v10101_v0  ;;  %326 = vst.msk [vmem:[#allocation2 + $0x1a0] sm:$0xff] %vm272_vm0, %v10101_v0  ;;  %527 = vrot.lane.b32.xlu1 %v456_v12, %s10102_s10  ;;  %525 = vrot.lane.b32.xlu0 %v455_v13, %s10102_s10  ;;  %v7968_v31 = vld [vmem:[%s10409_s14 + $0xa9] sm:$0xff]  ;;  %v460_v33 = vld [vmem:[%s10392_s9 + $0x58] sm:$0xff] }
  0x1e   : > { %328 = vst.msk [vmem:[#allocation3] sm:$0xff] %vm272_vm0, %v10101_v0  ;;  %329 = vst.msk [vmem:[#allocation3 + $0x8] sm:$0xff] %vm272_vm0, %v10101_v0  ;;  %v7971_v32 = vld [vmem:[%s10409_s14 + $0xc9] sm:$0xff]  ;;  %v7970_v35 = vld [vmem:[%s10409_s14 + $0xc1] sm:$0xff] }
  0x1f   : > { %331 = vst.msk [vmem:[#allocation3 + $0x18] sm:$0xff] %vm272_vm0, %v10101_v0  ;;  %332 = vst.msk [vmem:[#allocation3 + $0x20] sm:$0xff] %vm272_vm0, %v10101_v0  ;;  %v459_v34 = vld [vmem:[%s10392_s9 + $0x50] sm:$0xff]  ;;  %v7973_v36 = vld [vmem:[%s10409_s14 + $0xe1] sm:$0xff] }
  0x20   : > { %334 = vst.msk [vmem:[#allocation3 + $0x30] sm:$0xff] %vm272_vm0, %v10101_v0  ;;  %335 = vst.msk [vmem:[#allocation3 + $0x38] sm:$0xff] %vm272_vm0, %v10101_v0  ;;  %v7972_v37 = vld [vmem:[%s10409_s14 + $0xd9] sm:$0xff]  ;;  %v462_v38 = vld [vmem:[%s10392_s9 + $0x68] sm:$0xff] }
  0x21   : > { %337 = vst.msk [vmem:[#allocation3 + $0x48] sm:$0xff] %vm272_vm0, %v10101_v0  ;;  %338 = vst.msk [vmem:[#allocation3 + $0x50] sm:$0xff] %vm272_vm0, %v10101_v0  ;;  %531 = vrot.lane.b32.xlu1 %v458_v20, %s10102_s10  ;;  %529 = vrot.lane.b32.xlu0 %v457_v21, %s10102_s10  ;;  %v461_v39 = vld [vmem:[%s10392_s9 + $0x60] sm:$0xff]  ;;  %v7974_v41 = vld [vmem:[%s10409_s14 + $0xf1] sm:$0xff] }
  0x22   : > { %340 = vst.msk [vmem:[#allocation3 + $0x60] sm:$0xff] %vm272_vm0, %v10101_v0  ;;  %341 = vst.msk [vmem:[#allocation3 + $0x68] sm:$0xff] %vm272_vm0, %v10101_v0  ;;  %v7975_v40 = vld [vmem:[%s10409_s14 + $0xf9] sm:$0xff]  ;;  %v463_v43 = vld [vmem:[%s10392_s9 + $0x70] sm:$0xff] }
  0x23   : > { %343 = vst.msk [vmem:[#allocation3 + $0x78] sm:$0xff] %vm272_vm0, %v10101_v0  ;;  %344 = vst.msk [vmem:[#allocation3 + $0x80] sm:$0xff] %vm272_vm0, %v10101_v0  ;;  %v464_v42 = vld [vmem:[%s10392_s9 + $0x78] sm:$0xff]  ;;  %v7976_v45 = vld [vmem:[%s10409_s14 + $0x109] sm:$0xff] }
  0x24   : > { %346 = vst.msk [vmem:[#allocation3 + $0x90] sm:$0xff] %vm272_vm0, %v10101_v0  ;;  %347 = vst.msk [vmem:[#allocation3 + $0x98] sm:$0xff] %vm272_vm0, %v10101_v0  ;;  %v7977_v44 = vld [vmem:[%s10409_s14 + $0x111] sm:$0xff]  ;;  %v466_v46 = vld [vmem:[%s10392_s9 + $0x88] sm:$0xff] }
  0x25   : > { %349 = vst.msk [vmem:[#allocation3 + $0xa8] sm:$0xff] %vm272_vm0, %v10101_v0  ;;  %350 = vst.msk [vmem:[#allocation3 + $0xb0] sm:$0xff] %vm272_vm0, %v10101_v0  ;;  %535 = vrot.lane.b32.xlu1 %v460_v33, %s10102_s10  ;;  %533 = vrot.lane.b32.xlu0 %v459_v34, %s10102_s10  ;;  %v465_v47 = vld [vmem:[%s10392_s9 + $0x80] sm:$0xff]  ;;  %v7979_v48 = vld [vmem:[%s10409_s14 + $0x129] sm:$0xff] }
  0x26   : > { %352 = vst.msk [vmem:[#allocation3 + $0xc0] sm:$0xff] %vm272_vm0, %v10101_v0  ;;  %353 = vst.msk [vmem:[#allocation3 + $0xc8] sm:$0xff] %vm272_vm0, %v10101_v0  ;;  %v7978_v49 = vld [vmem:[%s10409_s14 + $0x121] sm:$0xff]  ;;  %v468_v50 = vld [vmem:[%s10392_s9 + $0x98] sm:$0xff] }
  0x27   : > { %355 = vst.msk [vmem:[#allocation3 + $0xd8] sm:$0xff] %vm272_vm0, %v10101_v0  ;;  %356 = vst.msk [vmem:[#allocation3 + $0xe0] sm:$0xff] %vm272_vm0, %v10101_v0  ;;  %v467_v51 = vld [vmem:[%s10392_s9 + $0x90] sm:$0xff]  ;;  %v7981_v52 = vld [vmem:[%s10409_s14 + $0x141] sm:$0xff] }
  0x28   : > { %358 = vst.msk [vmem:[#allocation3 + $0xf0] sm:$0xff] %vm272_vm0, %v10101_v0  ;;  %359 = vst.msk [vmem:[#allocation3 + $0xf8] sm:$0xff] %vm272_vm0, %v10101_v0  ;;  %v7980_v53 = vld [vmem:[%s10409_s14 + $0x139] sm:$0xff]  ;;  %v470_v54 = vld [vmem:[%s10392_s9 + $0xa8] sm:$0xff] }
  0x29   : > { %361 = vst.msk [vmem:[#allocation3 + $0x108] sm:$0xff] %vm272_vm0, %v10101_v0  ;;  %362 = vst.msk [vmem:[#allocation3 + $0x110] sm:$0xff] %vm272_vm0, %v10101_v0  ;;  %539 = vrot.lane.b32.xlu1 %v462_v38, %s10102_s10  ;;  %537 = vrot.lane.b32.xlu0 %v461_v39, %s10102_s10  ;;  %v469_v55 = vld [vmem:[%s10392_s9 + $0xa0] sm:$0xff]  ;;  %v7982_v57 = vld [vmem:[%s10409_s14 + $0x151] sm:$0xff] }
  0x2a   : > { %364 = vst.msk [vmem:[#allocation3 + $0x120] sm:$0xff] %vm272_vm0, %v10101_v0  ;;  %365 = vst.msk [vmem:[#allocation3 + $0x128] sm:$0xff] %vm272_vm0, %v10101_v0  ;;  %v7983_v56 = vld [vmem:[%s10409_s14 + $0x159] sm:$0xff]  ;;  %v471_v59 = vld [vmem:[%s10392_s9 + $0xb0] sm:$0xff] }
  0x2b   : > { %367 = vst.msk [vmem:[#allocation3 + $0x138] sm:$0xff] %vm272_vm0, %v10101_v0  ;;  %368 = vst.msk [vmem:[#allocation3 + $0x140] sm:$0xff] %vm272_vm0, %v10101_v0  ;;  %v472_v58 = vld [vmem:[%s10392_s9 + $0xb8] sm:$0xff]  ;;  %v7984_v61 = vld [vmem:[%s10409_s14 + $0x169] sm:$0xff] }
  0x2c   : > { %370 = vst.msk [vmem:[#allocation3 + $0x150] sm:$0xff] %vm272_vm0, %v10101_v0  ;;  %371 = vst.msk [vmem:[#allocation3 + $0x158] sm:$0xff] %vm272_vm0, %v10101_v0  ;;  %v7985_v60 = vld [vmem:[%s10409_s14 + $0x171] sm:$0xff]  ;;  %v474_v62 = vld [vmem:[%s10392_s9 + $0xc8] sm:$0xff] }
  0x2d   : > { %373 = vst.msk [vmem:[#allocation3 + $0x168] sm:$0xff] %vm272_vm0, %v10101_v0  ;;  %374 = vst.msk [vmem:[#allocation3 + $0x170] sm:$0xff] %vm272_vm0, %v10101_v0  ;;  %543 = vrot.lane.b32.xlu1 %v464_v42, %s10102_s10  ;;  %541 = vrot.lane.b32.xlu0 %v463_v43, %s10102_s10  ;;  %v473_v63 = vld [vmem:[%s10392_s9 + $0xc0] sm:$0xff]  ;;  %v475_v1 = vld [vmem:[%s10392_s9 + $0xd0] sm:$0xff] }
  0x2e   : > { %376 = vst.msk [vmem:[#allocation3 + $0x180] sm:$0xff] %vm272_vm0, %v10101_v0  ;;  %377 = vst.msk [vmem:[#allocation3 + $0x188] sm:$0xff] %vm272_vm0, %v10101_v0  ;;  %v478_v2 = vld [vmem:[%s10392_s9 + $0xe8] sm:$0xff]  ;;  %v477_v3 = vld [vmem:[%s10392_s9 + $0xe0] sm:$0xff] }
  0x2f   : > { %379 = vst.msk [vmem:[#allocation3 + $0x198] sm:$0xff] %vm272_vm0, %v10101_v0  ;;  %380 = vst.msk [vmem:[#allocation3 + $0x1a0] sm:$0xff] %vm272_vm0, %v10101_v0  ;;  %v8087_v4 = vld [vmem:[%s13490_s2 + $0x18] sm:$0xff]  ;;  %v10531_v5 = vld [vmem:[%s13490_s2 + $0x20] sm:$0xff] }
  0x30   : > { %282 = vst.msk [vmem:[#allocation2 + $0x40] sm:$0x3] %vm275_vm1, %v10101_v0  ;;  %276 = vst.msk [vmem:[#allocation2 + $0x10] sm:$0x3] %vm275_vm1, %v10101_v0  ;;  %v479_v6 = vld [vmem:[%s10392_s9 + $0xf0] sm:$0xff]  ;;  %v480_v7 = vld [vmem:[%s10392_s9 + $0xf8] sm:$0xff]  ;;  %9330 = vmatprep.subr.mxu1 %v8087_v4  ;;  %9380 = vmatprep.subr.mxu0 %v10531_v5 }
  0x31   : > { %279 = vst.msk [vmem:[#allocation2 + $0x28] sm:$0x3] %vm275_vm1, %v10101_v0  ;;  %285 = vst.msk [vmem:[#allocation2 + $0x58] sm:$0x3] %vm275_vm1, %v10101_v0  ;;  %547 = vrot.lane.b32.xlu1 %v466_v46, %s10102_s10  ;;  %545 = vrot.lane.b32.xlu0 %v465_v47, %s10102_s10  ;;  %v7986_v8 = vld [vmem:[%s10409_s14 + $0x181] sm:$0xff]  ;;  %v7987_v9 = vld [vmem:[%s10409_s14 + $0x189] sm:$0xff] }
  0x32   : > { %288 = vst.msk [vmem:[#allocation2 + $0x70] sm:$0x3] %vm275_vm1, %v10101_v0  ;;  %291 = vst.msk [vmem:[#allocation2 + $0x88] sm:$0x3] %vm275_vm1, %v10101_v0 }
  0x33   : > { %294 = vst.msk [vmem:[#allocation2 + $0xa0] sm:$0x3] %vm275_vm1, %v10101_v0  ;;  %297 = vst.msk [vmem:[#allocation2 + $0xb8] sm:$0x3] %vm275_vm1, %v10101_v0 }
  0x34   : > { %300 = vst.msk [vmem:[#allocation2 + $0xd0] sm:$0x3] %vm275_vm1, %v10101_v0  ;;  %303 = vst.msk [vmem:[#allocation2 + $0xe8] sm:$0x3] %vm275_vm1, %v10101_v0 }
  0x35   : > { %306 = vst.msk [vmem:[#allocation2 + $0x100] sm:$0x3] %vm275_vm1, %v10101_v0  ;;  %309 = vst.msk [vmem:[#allocation2 + $0x118] sm:$0x3] %vm275_vm1, %v10101_v0  ;;  %551 = vrot.lane.b32.xlu1 %v468_v50, %s10102_s10  ;;  %549 = vrot.lane.b32.xlu0 %v467_v51, %s10102_s10 }
  0x36   : > { %312 = vst.msk [vmem:[#allocation2 + $0x130] sm:$0x3] %vm275_vm1, %v10101_v0  ;;  %315 = vst.msk [vmem:[#allocation2 + $0x148] sm:$0x3] %vm275_vm1, %v10101_v0 }
  0x37   : > { %318 = vst.msk [vmem:[#allocation2 + $0x160] sm:$0x3] %vm275_vm1, %v10101_v0  ;;  %321 = vst.msk [vmem:[#allocation2 + $0x178] sm:$0x3] %vm275_vm1, %v10101_v0  ;;  %v1036_v19 = vld [vmem:[#allocation2 + $0x9] sm:$0xff] }
  0x38   : > { %324 = vst.msk [vmem:[#allocation2 + $0x190] sm:$0x3] %vm275_vm1, %v10101_v0  ;;  %327 = vst.msk [vmem:[#allocation2 + $0x1a8] sm:$0x3] %vm275_vm1, %v10101_v0  ;;  %9233 = vmatmul.mubr.msk.f32.vlgmr.msra.gmra.mxu1 %vm272_vm0, %v1036_v19 }
  0x39   : > { %330 = vst.msk [vmem:[#allocation3 + $0x10] sm:$0x3] %vm275_vm1, %v10101_v0  ;;  %333 = vst.msk [vmem:[#allocation3 + $0x28] sm:$0x3] %vm275_vm1, %v10101_v0  ;;  %555 = vrot.lane.b32.xlu1 %v470_v54, %s10102_s10  ;;  %553 = vrot.lane.b32.xlu0 %v469_v55, %s10102_s10 }
  0x3a   : > { %336 = vst.msk [vmem:[#allocation3 + $0x40] sm:$0x3] %vm275_vm1, %v10101_v0  ;;  %339 = vst.msk [vmem:[#allocation3 + $0x58] sm:$0x3] %vm275_vm1, %v10101_v0  ;;  %9331 = vmatpush3.msra.mxu1 %v8087_v4 }
  0x3b   : > { %342 = vst.msk [vmem:[#allocation3 + $0x70] sm:$0x3] %vm275_vm1, %v10101_v0  ;;  %345 = vst.msk [vmem:[#allocation3 + $0x88] sm:$0x3] %vm275_vm1, %v10101_v0 }
  0x3c   : > { %348 = vst.msk [vmem:[#allocation3 + $0xa0] sm:$0x3] %vm275_vm1, %v10101_v0  ;;  %351 = vst.msk [vmem:[#allocation3 + $0xb8] sm:$0x3] %vm275_vm1, %v10101_v0 }
  0x3d   : > { %354 = vst.msk [vmem:[#allocation3 + $0xd0] sm:$0x3] %vm275_vm1, %v10101_v0  ;;  %357 = vst.msk [vmem:[#allocation3 + $0xe8] sm:$0x3] %vm275_vm1, %v10101_v0  ;;  %559 = vrot.lane.b32.xlu1 %v472_v58, %s10102_s10  ;;  %557 = vrot.lane.b32.xlu0 %v471_v59, %s10102_s10 }
  0x3e   : > { %360 = vst.msk [vmem:[#allocation3 + $0x100] sm:$0x3] %vm275_vm1, %v10101_v0  ;;  %363 = vst.msk [vmem:[#allocation3 + $0x118] sm:$0x3] %vm275_vm1, %v10101_v0 }
  0x3f   : > { %366 = vst.msk [vmem:[#allocation3 + $0x130] sm:$0x3] %vm275_vm1, %v10101_v0  ;;  %369 = vst.msk [vmem:[#allocation3 + $0x148] sm:$0x3] %vm275_vm1, %v10101_v0 }
  0x40   : > { %372 = vst.msk [vmem:[#allocation3 + $0x160] sm:$0x3] %vm275_vm1, %v10101_v0  ;;  %375 = vst.msk [vmem:[#allocation3 + $0x178] sm:$0x3] %vm275_vm1, %v10101_v0 }
  0x41   : > { %378 = vst.msk [vmem:[#allocation3 + $0x190] sm:$0x3] %vm275_vm1, %v10101_v0  ;;  %381 = vst.msk [vmem:[#allocation3 + $0x1a8] sm:$0x3] %vm275_vm1, %v10101_v0  ;;  %563 = vrot.lane.b32.xlu1 %v474_v62, %s10102_s10  ;;  %561 = vrot.lane.b32.xlu0 %v473_v63, %s10102_s10  ;;  %v476_v0 = vld [vmem:[%s10392_s9 + $0xd8] sm:$0xff] }
  0x42   : > { %419 = vst.msk [vmem:[#allocation2 + $0x31] sm:$0xff] %vm416_vm2, %v7958_v14  ;;  %417 = vst.msk [vmem:[#allocation2 + $0x19] sm:$0xff] %vm416_vm2, %v7956_v15  ;;  %v10549_v14 = vld [vmem:[%s13490_s2 + $0x28] sm:$0xff] }
  0x43   : > { %420 = vst.msk [vmem:[#allocation2 + $0x39] sm:$0xff] %vm416_vm2, %v7959_v16  ;;  %418 = vst.msk [vmem:[#allocation2 + $0x21] sm:$0xff] %vm416_vm2, %v7957_v17  ;;  %9430 = vmatprep.subr.mxu1 %v10549_v14 }
  0x44   : > { %422 = vst.msk [vmem:[#allocation2 + $0x51] sm:$0xff] %vm416_vm2, %v7961_v22  ;;  %421 = vst.msk [vmem:[#allocation2 + $0x49] sm:$0xff] %vm416_vm2, %v7960_v23 }
  0x45   : > { %424 = vst.msk [vmem:[#allocation2 + $0x69] sm:$0xff] %vm416_vm2, %v7963_v24  ;;  %423 = vst.msk [vmem:[#allocation2 + $0x61] sm:$0xff] %vm416_vm2, %v7962_v25  ;;  %567 = vrot.lane.b32.xlu1 %v476_v0, %s10102_s10  ;;  %565 = vrot.lane.b32.xlu0 %v475_v1, %s10102_s10 }
  0x46   : > { %426 = vst.msk [vmem:[#allocation2 + $0x81] sm:$0xff] %vm416_vm2, %v7965_v26  ;;  %425 = vst.msk [vmem:[#allocation2 + $0x79] sm:$0xff] %vm416_vm2, %v7964_v27 }
  0x47   : > { %428 = vst.msk [vmem:[#allocation2 + $0x99] sm:$0xff] %vm416_vm2, %v7967_v28  ;;  %427 = vst.msk [vmem:[#allocation2 + $0x91] sm:$0xff] %vm416_vm2, %v7966_v29 }
  0x48   : > { %430 = vst.msk [vmem:[#allocation2 + $0xb1] sm:$0xff] %vm416_vm2, %v7969_v30  ;;  %429 = vst.msk [vmem:[#allocation2 + $0xa9] sm:$0xff] %vm416_vm2, %v7968_v31 }
  0x49   : > { %432 = vst.msk [vmem:[#allocation2 + $0xc9] sm:$0xff] %vm416_vm2, %v7971_v32  ;;  %431 = vst.msk [vmem:[#allocation2 + $0xc1] sm:$0xff] %vm416_vm2, %v7970_v35  ;;  %571 = vrot.lane.b32.xlu1 %v478_v2, %s10102_s10  ;;  %569 = vrot.lane.b32.xlu0 %v477_v3, %s10102_s10 }
  0x4a   : > { %434 = vst.msk [vmem:[#allocation2 + $0xe1] sm:$0xff] %vm416_vm2, %v7973_v36  ;;  %433 = vst.msk [vmem:[#allocation2 + $0xd9] sm:$0xff] %vm416_vm2, %v7972_v37 }
  0x4b   : > { %436 = vst.msk [vmem:[#allocation2 + $0xf9] sm:$0xff] %vm416_vm2, %v7975_v40  ;;  %435 = vst.msk [vmem:[#allocation2 + $0xf1] sm:$0xff] %vm416_vm2, %v7974_v41 }
  0x4c   : > { %438 = vst.msk [vmem:[#allocation2 + $0x111] sm:$0xff] %vm416_vm2, %v7977_v44  ;;  %437 = vst.msk [vmem:[#allocation2 + $0x109] sm:$0xff] %vm416_vm2, %v7976_v45 }
  0x4d   : > { %440 = vst.msk [vmem:[#allocation2 + $0x129] sm:$0xff] %vm416_vm2, %v7979_v48  ;;  %439 = vst.msk [vmem:[#allocation2 + $0x121] sm:$0xff] %vm416_vm2, %v7978_v49  ;;  %573 = vrot.lane.b32.xlu0 %v479_v6, %s10102_s10  ;;  %575 = vrot.lane.b32.xlu1 %v480_v7, %s10102_s10 }
  0x4e   : > { %442 = vst.msk [vmem:[#allocation2 + $0x141] sm:$0xff] %vm416_vm2, %v7981_v52  ;;  %441 = vst.msk [vmem:[#allocation2 + $0x139] sm:$0xff] %vm416_vm2, %v7980_v53 }
  0x4f   : > { %444 = vst.msk [vmem:[#allocation2 + $0x159] sm:$0xff] %vm416_vm2, %v7983_v56  ;;  %443 = vst.msk [vmem:[#allocation2 + $0x151] sm:$0xff] %vm416_vm2, %v7982_v57 }
  0x50   : > { %446 = vst.msk [vmem:[#allocation2 + $0x171] sm:$0xff] %vm416_vm2, %v7985_v60  ;;  %445 = vst.msk [vmem:[#allocation2 + $0x169] sm:$0xff] %vm416_vm2, %v7984_v61 }
  0x51   : > { %447 = vst.msk [vmem:[#allocation2 + $0x181] sm:$0xff] %vm416_vm2, %v7986_v8  ;;  %448 = vst.msk [vmem:[#allocation2 + $0x189] sm:$0xff] %vm416_vm2, %v7987_v9 }
  0x83   : > { %v518_v10 = vpop.permute.xlu1 %517  ;;  %v514_v11 = vpop.permute.xlu0 %513 }
  0x84   : > { %612 = vst.msk [vmem:[#allocation2 + $0x31] sm:$0xff] %vm609_vm3, %v518_v10  ;;  %610 = vst.msk [vmem:[#allocation2 + $0x19] sm:$0xff] %vm609_vm3, %v514_v11 }
  0x87   : > { %v520_v12 = vpop.permute.xlu1 %519  ;;  %v516_v13 = vpop.permute.xlu0 %515 }
  0x88   : > { %613 = vst.msk [vmem:[#allocation2 + $0x39] sm:$0xff] %vm609_vm3, %v520_v12  ;;  %611 = vst.msk [vmem:[#allocation2 + $0x21] sm:$0xff] %vm609_vm3, %v516_v13 }
  0x8b   : > { %v10552_v15 = vld [vmem:[#allocation2 + $0x18] sm:$0xff]  ;;  %v524_v17 = vpop.permute.xlu1 %523  ;;  %v522_v18 = vpop.permute.xlu0 %521  ;;  %v10562_v19 = vld [vmem:[#allocation2 + $0x30] sm:$0xff] }
  0x8c   : > { %v10554_v16 = vld [vmem:[#allocation2 + $0x19] sm:$0xff]  ;;  %9185 = vmatprep.mubr.msk.f32.mxu0 %vm272_vm0, %v10552_v15  ;;  %615 = vst.msk [vmem:[#allocation2 + $0x51] sm:$0xff] %vm609_vm3, %v524_v17  ;;  %614 = vst.msk [vmem:[#allocation2 + $0x49] sm:$0xff] %vm609_vm3, %v522_v18  ;;  %v10564_v20 = vld [vmem:[#allocation2 + $0x31] sm:$0xff] }
  0x8d   : > { %9235 = vmatprep.mubr.msk.f32.mxu1 %vm272_vm0, %v10554_v16  ;;  %13563 = vst [vmem:[#allocation4_spill] sm:$0xff] %v10562_v19 }
  0x8f   : > { %v10566_v21 = vld [vmem:[#allocation2 + $0x20] sm:$0xff]  ;;  %v528_v23 = vpop.permute.xlu1 %527  ;;  %v526_v24 = vpop.permute.xlu0 %525  ;;  %v10582_v26 = vld [vmem:[#allocation2 + $0x38] sm:$0xff] }
  0x90   : > { %v10568_v22 = vld [vmem:[#allocation2 + $0x21] sm:$0xff]  ;;  %9186 = vmatmul.mubr.msk.f32.gmra.mxu0 %vm272_vm0, %v10566_v21  ;;  %617 = vst.msk [vmem:[#allocation2 + $0x69] sm:$0xff] %vm609_vm3, %v528_v23  ;;  %616 = vst.msk [vmem:[#allocation2 + $0x61] sm:$0xff] %vm609_vm3, %v526_v24  ;;  %v10580_v25 = vld [vmem:[#allocation2 + $0x39] sm:$0xff] }
  0x91   : > { %9236 = vmatmul.mubr.msk.f32.gmra.mxu1 %vm272_vm0, %v10568_v22  ;;  %9188 = vmatprep.mubr.msk.f32.mxu0 %vm272_vm0, %v10562_v19  ;;  %13564 = vst [vmem:[#allocation5_spill] sm:$0xff] %v10582_v26 }
  0x92   : > { %9238 = vmatprep.mubr.msk.f32.mxu1 %vm272_vm0, %v10564_v20 }
  0x93   : > { %v532_v27 = vpop.permute.xlu1 %531  ;;  %v530_v28 = vpop.permute.xlu0 %529  ;;  %v10584_v29 = vld [vmem:[#allocation2 + $0x48] sm:$0xff]  ;;  %v10598_v31 = vld [vmem:[#allocation2 + $0x50] sm:$0xff] }
  0x94   : > { %13565 = vst [vmem:[#allocation6_spill] sm:$0xff] %v10584_v29  ;;  %v10586_v30 = vld [vmem:[#allocation2 + $0x49] sm:$0xff]  ;;  %9189 = vmatmul.mubr.msk.f32.gmra.mxu0 %vm272_vm0, %v10582_v26  ;;  %619 = vst.msk [vmem:[#allocation2 + $0x81] sm:$0xff] %vm609_vm3, %v532_v27  ;;  %v10600_v32 = vld [vmem:[#allocation2 + $0x51] sm:$0xff] }
  0x95   : > { %9239 = vmatmul.mubr.msk.f32.gmra.mxu1 %vm272_vm0, %v10580_v25  ;;  %618 = vst.msk [vmem:[#allocation2 + $0x79] sm:$0xff] %vm609_vm3, %v530_v28  ;;  %9191 = vmatprep.mubr.msk.f32.mxu0 %vm272_vm0, %v10584_v29  ;;  %13566 = vst [vmem:[#allocation7_spill] sm:$0xff] %v10598_v31 }
  0x96   : > { %9241 = vmatprep.mubr.msk.f32.mxu1 %vm272_vm0, %v10586_v30 }
  0x97   : > { %v536_v33 = vpop.permute.xlu1 %535  ;;  %v534_v34 = vpop.permute.xlu0 %533  ;;  %v10602_v35 = vld [vmem:[#allocation2 + $0x60] sm:$0xff]  ;;  %v10616_v37 = vld [vmem:[#allocation2 + $0x68] sm:$0xff] }
  0x98   : > { %13567 = vst [vmem:[#allocation8_spill] sm:$0xff] %v10602_v35  ;;  %v10604_v36 = vld [vmem:[#allocation2 + $0x61] sm:$0xff]  ;;  %9192 = vmatmul.mubr.msk.f32.gmra.mxu0 %vm272_vm0, %v10598_v31  ;;  %621 = vst.msk [vmem:[#allocation2 + $0x99] sm:$0xff] %vm609_vm3, %v536_v33  ;;  %v10618_v38 = vld [vmem:[#allocation2 + $0x69] sm:$0xff] }
  0x99   : > { %9242 = vmatmul.mubr.msk.f32.gmra.mxu1 %vm272_vm0, %v10600_v32  ;;  %620 = vst.msk [vmem:[#allocation2 + $0x91] sm:$0xff] %vm609_vm3, %v534_v34  ;;  %9194 = vmatprep.mubr.msk.f32.mxu0 %vm272_vm0, %v10602_v35  ;;  %13568 = vst [vmem:[#allocation9_spill] sm:$0xff] %v10616_v37 }
  0x9a   : > { %9244 = vmatprep.mubr.msk.f32.mxu1 %vm272_vm0, %v10604_v36 }
  0x9b   : > { %v540_v39 = vpop.permute.xlu1 %539  ;;  %v538_v40 = vpop.permute.xlu0 %537  ;;  %v10636_v44 = vld [vmem:[#allocation2 + $0x81] sm:$0xff] }
  0x9c   : > { %v10620_v41 = vld [vmem:[#allocation2 + $0x78] sm:$0xff]  ;;  %9195 = vmatmul.mubr.msk.f32.gmra.mxu0 %vm272_vm0, %v10616_v37  ;;  %623 = vst.msk [vmem:[#allocation2 + $0xb1] sm:$0xff] %vm609_vm3, %v540_v39  ;;  %622 = vst.msk [vmem:[#allocation2 + $0xa9] sm:$0xff] %vm609_vm3, %v538_v40  ;;  %v10634_v43 = vld [vmem:[#allocation2 + $0x80] sm:$0xff] }
  0x9d   : > { %13569 = vst [vmem:[#allocation10_spill] sm:$0xff] %v10620_v41  ;;  %v10622_v42 = vld [vmem:[#allocation2 + $0x79] sm:$0xff]  ;;  %9245 = vmatmul.mubr.msk.f32.gmra.mxu1 %vm272_vm0, %v10618_v38  ;;  %9197 = vmatprep.mubr.msk.f32.mxu0 %vm272_vm0, %v10620_v41  ;;  %13570 = vst [vmem:[#allocation11_spill] sm:$0xff] %v10634_v43 }
  0x9e   : > { %9247 = vmatprep.mubr.msk.f32.mxu1 %vm272_vm0, %v10622_v42 }
  0x9f   : > { %v544_v45 = vpop.permute.xlu1 %543  ;;  %v542_v46 = vpop.permute.xlu0 %541  ;;  %v10654_v50 = vld [vmem:[#allocation2 + $0x99] sm:$0xff] }
  0xa0   : > { %v10638_v47 = vld [vmem:[#allocation2 + $0x90] sm:$0xff]  ;;  %9198 = vmatmul.mubr.msk.f32.gmra.mxu0 %vm272_vm0, %v10634_v43  ;;  %625 = vst.msk [vmem:[#allocation2 + $0xc9] sm:$0xff] %vm609_vm3, %v544_v45  ;;  %624 = vst.msk [vmem:[#allocation2 + $0xc1] sm:$0xff] %vm609_vm3, %v542_v46  ;;  %v10652_v49 = vld [vmem:[#allocation2 + $0x98] sm:$0xff] }
  0xa1   : > { %13571 = vst [vmem:[#allocation12_spill] sm:$0xff] %v10638_v47  ;;  %v10640_v48 = vld [vmem:[#allocation2 + $0x91] sm:$0xff]  ;;  %9248 = vmatmul.mubr.msk.f32.gmra.mxu1 %vm272_vm0, %v10636_v44  ;;  %9200 = vmatprep.mubr.msk.f32.mxu0 %vm272_vm0, %v10638_v47 }
  0xa2   : > { %9250 = vmatprep.mubr.msk.f32.mxu1 %vm272_vm0, %v10640_v48 }
  0xa3   : > { %v548_v51 = vpop.permute.xlu1 %547  ;;  %v546_v52 = vpop.permute.xlu0 %545  ;;  %v10656_v53 = vld [vmem:[#allocation2 + $0xa8] sm:$0xff]  ;;  %v10670_v55 = vld [vmem:[#allocation2 + $0xb0] sm:$0xff] }
  0xa4   : > { %v10658_v54 = vld [vmem:[#allocation2 + $0xa9] sm:$0xff]  ;;  %9201 = vmatmul.mubr.msk.f32.gmra.mxu0 %vm272_vm0, %v10652_v49  ;;  %627 = vst.msk [vmem:[#allocation2 + $0xe1] sm:$0xff] %vm609_vm3, %v548_v51  ;;  %626 = vst.msk [vmem:[#allocation2 + $0xd9] sm:$0xff] %vm609_vm3, %v546_v52  ;;  %v10672_v56 = vld [vmem:[#allocation2 + $0xb1] sm:$0xff] }
  0xa5   : > { %9251 = vmatmul.mubr.msk.f32.gmra.mxu1 %vm272_vm0, %v10654_v50  ;;  %9203 = vmatprep.mubr.msk.f32.mxu0 %vm272_vm0, %v10656_v53  ;;  %13572 = vst [vmem:[#allocation13_spill] sm:$0xff] %v10670_v55 }
  0xa6   : > { %9253 = vmatprep.mubr.msk.f32.mxu1 %vm272_vm0, %v10658_v54 }
  0xa7   : > { %v552_v57 = vpop.permute.xlu1 %551  ;;  %v550_v58 = vpop.permute.xlu0 %549  ;;  %v10674_v59 = vld [vmem:[#allocation2 + $0xc0] sm:$0xff]  ;;  %v10688_v61 = vld [vmem:[#allocation2 + $0xc8] sm:$0xff] }
  0xa8   : > { %13573 = vst [vmem:[#allocation14_spill] sm:$0xff] %v10674_v59  ;;  %v10676_v60 = vld [vmem:[#allocation2 + $0xc1] sm:$0xff]  ;;  %9204 = vmatmul.mubr.msk.f32.gmra.mxu0 %vm272_vm0, %v10670_v55  ;;  %629 = vst.msk [vmem:[#allocation2 + $0xf9] sm:$0xff] %vm609_vm3, %v552_v57  ;;  %v10690_v62 = vld [vmem:[#allocation2 + $0xc9] sm:$0xff] }
  0xa9   : > { %9254 = vmatmul.mubr.msk.f32.gmra.mxu1 %vm272_vm0, %v10672_v56  ;;  %628 = vst.msk [vmem:[#allocation2 + $0xf1] sm:$0xff] %vm609_vm3, %v550_v58  ;;  %9206 = vmatprep.mubr.msk.f32.mxu0 %vm272_vm0, %v10674_v59  ;;  %13574 = vst [vmem:[#allocation15_spill] sm:$0xff] %v10688_v61 }
  0xaa   : > { %9256 = vmatprep.mubr.msk.f32.mxu1 %vm272_vm0, %v10676_v60 }
  0xab   : > { %v556_v63 = vpop.permute.xlu1 %555  ;;  %v554_v0 = vpop.permute.xlu0 %553  ;;  %v10692_v1 = vld [vmem:[#allocation2 + $0xd8] sm:$0xff]  ;;  %v10706_v3 = vld [vmem:[#allocation2 + $0xe0] sm:$0xff] }
  0xac   : > { %13575 = vst [vmem:[#allocation16_spill] sm:$0xff] %v10692_v1  ;;  %v10694_v2 = vld [vmem:[#allocation2 + $0xd9] sm:$0xff]  ;;  %9207 = vmatmul.mubr.msk.f32.gmra.mxu0 %vm272_vm0, %v10688_v61  ;;  %631 = vst.msk [vmem:[#allocation2 + $0x111] sm:$0xff] %vm609_vm3, %v556_v63  ;;  %v10708_v4 = vld [vmem:[#allocation2 + $0xe1] sm:$0xff] }
  0xad   : > { %9257 = vmatmul.mubr.msk.f32.gmra.mxu1 %vm272_vm0, %v10690_v62  ;;  %630 = vst.msk [vmem:[#allocation2 + $0x109] sm:$0xff] %vm609_vm3, %v554_v0  ;;  %9209 = vmatprep.mubr.msk.f32.mxu0 %vm272_vm0, %v10692_v1  ;;  %13576 = vst [vmem:[#allocation17_spill] sm:$0xff] %v10706_v3 }
  0xae   : > { %9259 = vmatprep.mubr.msk.f32.mxu1 %vm272_vm0, %v10694_v2 }
  0xaf   : > { %v560_v6 = vpop.permute.xlu1 %559  ;;  %v558_v7 = vpop.permute.xlu0 %557  ;;  %v10726_v11 = vld [vmem:[#allocation2 + $0xf9] sm:$0xff] }
  0xb0   : > { %v10710_v8 = vld [vmem:[#allocation2 + $0xf0] sm:$0xff]  ;;  %9210 = vmatmul.mubr.msk.f32.gmra.mxu0 %vm272_vm0, %v10706_v3  ;;  %633 = vst.msk [vmem:[#allocation2 + $0x129] sm:$0xff] %vm609_vm3, %v560_v6  ;;  %632 = vst.msk [vmem:[#allocation2 + $0x121] sm:$0xff] %vm609_vm3, %v558_v7  ;;  %v10724_v10 = vld [vmem:[#allocation2 + $0xf8] sm:$0xff] }
  0xb1   : > { %13577 = vst [vmem:[#allocation18_spill] sm:$0xff] %v10710_v8  ;;  %v10712_v9 = vld [vmem:[#allocation2 + $0xf1] sm:$0xff]  ;;  %9260 = vmatmul.mubr.msk.f32.gmra.mxu1 %vm272_vm0, %v10708_v4  ;;  %9212 = vmatprep.mubr.msk.f32.mxu0 %vm272_vm0, %v10710_v8  ;;  %13578 = vst [vmem:[#allocation19_spill] sm:$0xff] %v10724_v10 }
  0xb2   : > { %9262 = vmatprep.mubr.msk.f32.mxu1 %vm272_vm0, %v10712_v9 }
  0xb3   : > { %v564_v12 = vpop.permute.xlu1 %563  ;;  %v562_v13 = vpop.permute.xlu0 %561  ;;  %v10744_v24 = vld [vmem:[#allocation2 + $0x111] sm:$0xff] }
  0xb4   : > { %v10728_v17 = vld [vmem:[#allocation2 + $0x108] sm:$0xff]  ;;  %9213 = vmatmul.mubr.msk.f32.gmra.mxu0 %vm272_vm0, %v10724_v10  ;;  %635 = vst.msk [vmem:[#allocation2 + $0x141] sm:$0xff] %vm609_vm3, %v564_v12  ;;  %634 = vst.msk [vmem:[#allocation2 + $0x139] sm:$0xff] %vm609_vm3, %v562_v13  ;;  %v10742_v23 = vld [vmem:[#allocation2 + $0x110] sm:$0xff] }
  0xb5   : > { %13579 = vst [vmem:[#allocation20_spill] sm:$0xff] %v10728_v17  ;;  %v10730_v18 = vld [vmem:[#allocation2 + $0x109] sm:$0xff]  ;;  %9263 = vmatmul.mubr.msk.f32.gmra.mxu1 %vm272_vm0, %v10726_v11  ;;  %9215 = vmatprep.mubr.msk.f32.mxu0 %vm272_vm0, %v10728_v17  ;;  %13580 = vst [vmem:[#allocation21_spill] sm:$0xff] %v10742_v23 }
  0xb6   : > { %9265 = vmatprep.mubr.msk.f32.mxu1 %vm272_vm0, %v10730_v18 }
  0xb7   : > { %v568_v27 = vpop.permute.xlu1 %567  ;;  %v566_v28 = vpop.permute.xlu0 %565  ;;  %v10746_v33 = vld [vmem:[#allocation2 + $0x120] sm:$0xff]  ;;  %v10760_v39 = vld [vmem:[#allocation2 + $0x128] sm:$0xff] }
  0xb8   : > { %13581 = vst [vmem:[#allocation22_spill] sm:$0xff] %v10746_v33  ;;  %v10748_v34 = vld [vmem:[#allocation2 + $0x121] sm:$0xff]  ;;  %9216 = vmatmul.mubr.msk.f32.gmra.mxu0 %vm272_vm0, %v10742_v23  ;;  %637 = vst.msk [vmem:[#allocation2 + $0x159] sm:$0xff] %vm609_vm3, %v568_v27  ;;  %v10762_v40 = vld [vmem:[#allocation2 + $0x129] sm:$0xff] }
  0xb9   : > { %9266 = vmatmul.mubr.msk.f32.gmra.mxu1 %vm272_vm0, %v10744_v24  ;;  %636 = vst.msk [vmem:[#allocation2 + $0x151] sm:$0xff] %vm609_vm3, %v566_v28  ;;  %9218 = vmatprep.mubr.msk.f32.mxu0 %vm272_vm0, %v10746_v33  ;;  %13582 = vst [vmem:[#allocation23_spill] sm:$0xff] %v10760_v39 }
  0xba   : > { %9268 = vmatprep.mubr.msk.f32.mxu1 %vm272_vm0, %v10748_v34 }
  0xbb   : > { %v572_v45 = vpop.permute.xlu1 %571  ;;  %v570_v46 = vpop.permute.xlu0 %569  ;;  %v10764_v51 = vld [vmem:[#allocation2 + $0x138] sm:$0xff]  ;;  %v10778_v57 = vld [vmem:[#allocation2 + $0x140] sm:$0xff] }
  0xbc   : > { %13583 = vst [vmem:[#allocation24_spill] sm:$0xff] %v10764_v51  ;;  %v10766_v52 = vld [vmem:[#allocation2 + $0x139] sm:$0xff]  ;;  %9219 = vmatmul.mubr.msk.f32.gmra.mxu0 %vm272_vm0, %v10760_v39  ;;  %639 = vst.msk [vmem:[#allocation2 + $0x171] sm:$0xff] %vm609_vm3, %v572_v45  ;;  %v10780_v58 = vld [vmem:[#allocation2 + $0x141] sm:$0xff] }
  0xbd   : > { %9269 = vmatmul.mubr.msk.f32.gmra.mxu1 %vm272_vm0, %v10762_v40  ;;  %638 = vst.msk [vmem:[#allocation2 + $0x169] sm:$0xff] %vm609_vm3, %v570_v46  ;;  %9221 = vmatprep.mubr.msk.f32.mxu0 %vm272_vm0, %v10764_v51  ;;  %13584 = vst [vmem:[#allocation25_spill] sm:$0xff] %v10778_v57 }
  0xbe   : > { %9271 = vmatprep.mubr.msk.f32.mxu1 %vm272_vm0, %v10766_v52 }
  0xbf   : > { %v574_v6 = vpop.permute.xlu0 %573  ;;  %v576_v7 = vpop.permute.xlu1 %575  ;;  %v10798_v13 = vld [vmem:[#allocation2 + $0x159] sm:$0xff] }
  0xc0   : > { %v10782_v63 = vld [vmem:[#allocation2 + $0x150] sm:$0xff]  ;;  %9222 = vmatmul.mubr.msk.f32.gmra.mxu0 %vm272_vm0, %v10778_v57  ;;  %640 = vst.msk [vmem:[#allocation2 + $0x181] sm:$0xff] %vm609_vm3, %v574_v6  ;;  %641 = vst.msk [vmem:[#allocation2 + $0x189] sm:$0xff] %vm609_vm3, %v576_v7  ;;  %v10796_v12 = vld [vmem:[#allocation2 + $0x158] sm:$0xff] }
  0xc1   : > { %13585 = vst [vmem:[#allocation26_spill] sm:$0xff] %v10782_v63  ;;  %v10784_v0 = vld [vmem:[#allocation2 + $0x151] sm:$0xff]  ;;  %9272 = vmatmul.mubr.msk.f32.gmra.mxu1 %vm272_vm0, %v10780_v58  ;;  %9224 = vmatprep.mubr.msk.f32.mxu0 %vm272_vm0, %v10782_v63  ;;  %13587 = vst [vmem:[#allocation28_spill] sm:$0xff] %v10796_v12  ;;  %v1422_v6 = vld [vmem:[#allocation2 + $0x2] sm:$0xff] }
  0xc2   : > { %13586 = vst [vmem:[#allocation27_spill] sm:$0xff] %v10784_v0  ;;  %9274 = vmatprep.mubr.msk.f32.mxu1 %vm272_vm0, %v10784_v0  ;;  %13588 = vst [vmem:[#allocation29_spill] sm:$0xff] %v10798_v13  ;;  %v1423_v7 = vld [vmem:[#allocation2 + $0xa] sm:$0xff] }
  0xc3   : > { %v10814_v46 = vld [vmem:[#allocation2 + $0x171] sm:$0xff] }
  0xc4   : > { %v10800_v27 = vld [vmem:[#allocation2 + $0x168] sm:$0xff]  ;;  %9225 = vmatmul.mubr.msk.f32.gmra.mxu0 %vm272_vm0, %v10796_v12  ;;  %v10812_v45 = vld [vmem:[#allocation2 + $0x170] sm:$0xff]  ;;  %13591 = vst [vmem:[#allocation32_spill] sm:$0xff] %v10814_v46 }
  0xc5   : > { %13589 = vst [vmem:[#allocation30_spill] sm:$0xff] %v10800_v27  ;;  %v10802_v28 = vld [vmem:[#allocation2 + $0x169] sm:$0xff]  ;;  %9275 = vmatmul.mubr.msk.f32.gmra.mxu1 %vm272_vm0, %v10798_v13  ;;  %9227 = vmatprep.mubr.msk.f32.mxu0 %vm272_vm0, %v10800_v27 }
  0xc6   : > { %13590 = vst [vmem:[#allocation31_spill] sm:$0xff] %v10802_v28  ;;  %9277 = vmatprep.mubr.msk.f32.mxu1 %vm272_vm0, %v10802_v28  ;;  %v10826_v28 = vld [vmem:[#allocation2 + $0x1a] sm:$0xff]  ;;  %v10831_v13 = vld [vmem:[%s13490_s2 + $0x30] sm:$0xff] }
  0xc8   : > { %9228 = vmatmul.mubr.msk.f32.gmra.mxu0 %vm272_vm0, %v10812_v45 }
  0xc9   : > { %9278 = vmatmul.mubr.msk.f32.gmra.mxu1 %vm272_vm0, %v10814_v46  ;;  %9282 = vmatprep.mubr.msk.f32.mxu0 %vm272_vm0, %v1422_v6  ;;  %v10836_v46 = vld [vmem:[%s13490_s2 + $0x38] sm:$0xff] }
  0xca   : > { %9332 = vmatprep.mubr.msk.f32.mxu1 %vm272_vm0, %v10552_v15  ;;  %v10844_v15 = vld [vmem:[#allocation2 + $0x22] sm:$0xff]  ;;  %v10870_v6 = vld [vmem:[#allocation2 + $0x52] sm:$0xff] }
  0xcc   : > { %9283 = vmatmul.mubr.msk.f32.vlgmr.msra.gmra.mxu0 %vm272_vm0, %v1423_v7  ;;  %v10876_v7 = vld [vmem:[#allocation2 + $0x62] sm:$0xff] }
  0xcd   : > { %9333 = vmatmul.mubr.msk.f32.vlgmr.msra.gmra.mxu1 %vm272_vm0, %v10566_v21  ;;  %9381 = vmatpush3.msra.mxu0 %v10531_v5  ;;  %v10852_v5 = vld [vmem:[#allocation2 + $0x32] sm:$0xff]  ;;  %v10864_v21 = vld [vmem:[#allocation2 + $0x4a] sm:$0xff] }
  0xce   : > { %9285 = vmatprep.mubr.msk.f32.mxu0 %vm272_vm0, %v10826_v28  ;;  %9335 = vmatprep.mubr.msk.f32.mxu1 %vm272_vm0, %v10562_v19 }
  0xcf   : > { %9431 = vmatpush3.msra.mxu1 %v10549_v14  ;;  %9480 = vmatprep.subr.mxu0 %v10831_v13  ;;  %v10858_v14 = vld [vmem:[#allocation2 + $0x3a] sm:$0xff] }
  0xd0   : > { %9530 = vmatprep.subr.mxu1 %v10836_v46  ;;  %9286 = vmatmul.mubr.msk.f32.gmra.mxu0 %vm272_vm0, %v10844_v15 }
  0xd1   : > { %9336 = vmatmul.mubr.msk.f32.gmra.mxu1 %vm272_vm0, %v10582_v26  ;;  %9288 = vmatprep.mubr.msk.f32.mxu0 %vm272_vm0, %v10852_v5 }
  0xd2   : > { %9338 = vmatprep.mubr.msk.f32.mxu1 %vm272_vm0, %v10584_v29 }
  0xd4   : > { %9289 = vmatmul.mubr.msk.f32.gmra.mxu0 %vm272_vm0, %v10858_v14 }
  0xd5   : > { %9339 = vmatmul.mubr.msk.f32.gmra.mxu1 %vm272_vm0, %v10598_v31  ;;  %9291 = vmatprep.mubr.msk.f32.mxu0 %vm272_vm0, %v10864_v21  ;;  %v10887_v31 = vld [vmem:[#allocation2 + $0x6a] sm:$0xff] }
  0xd6   : > { %9341 = vmatprep.mubr.msk.f32.mxu1 %vm272_vm0, %v10602_v35  ;;  %v10885_v35 = vld [vmem:[%s13491_s3] ss:$0 sm:$0xff] }
  0xd7   : > { %v9184_v29 = vpop.f32.mrf.mxu0 }
  0xd8   : > { %9292 = vmatmul.mubr.msk.f32.gmra.mxu0 %vm272_vm0, %v10870_v6  ;;  %v1004_v26 = vadd.f32 %v9184_v29, %v10885_v35  ;;  %v10914_v29 = vld [vmem:[#allocation2 + $0x9a] sm:$0xff] }
  0xd9   : > { %9342 = vmatmul.mubr.msk.f32.gmra.mxu1 %vm272_vm0, %v10616_v37  ;;  %9294 = vmatprep.mubr.msk.f32.mxu0 %vm272_vm0, %v10876_v7  ;;  %v10893_v37 = vld [vmem:[#allocation2 + $0x7a] sm:$0xff] }
  0xda   : > { %9344 = vmatprep.mubr.msk.f32.mxu1 %vm272_vm0, %v10620_v41  ;;  %v10900_v41 = vld [vmem:[#allocation2 + $0x82] sm:$0xff] }
  0xdc   : > { %9295 = vmatmul.mubr.msk.f32.gmra.mxu0 %vm272_vm0, %v10887_v31 }
  0xdd   : > { %9345 = vmatmul.mubr.msk.f32.gmra.mxu1 %vm272_vm0, %v10634_v43  ;;  %9297 = vmatprep.mubr.msk.f32.mxu0 %vm272_vm0, %v10893_v37  ;;  %v10906_v43 = vld [vmem:[#allocation2 + $0x92] sm:$0xff] }
  0xde   : > { %9347 = vmatprep.mubr.msk.f32.mxu1 %vm272_vm0, %v10638_v47  ;;  %v10920_v47 = vld [vmem:[#allocation2 + $0xaa] sm:$0xff] }
  0xe0   : > { %9298 = vmatmul.mubr.msk.f32.gmra.mxu0 %vm272_vm0, %v10900_v41 }
  0xe1   : > { %9348 = vmatmul.mubr.msk.f32.gmra.mxu1 %vm272_vm0, %v10652_v49  ;;  %9300 = vmatprep.mubr.msk.f32.mxu0 %vm272_vm0, %v10906_v43 }
  0xe2   : > { %9350 = vmatprep.mubr.msk.f32.mxu1 %vm272_vm0, %v10656_v53 }
  0xe4   : > { %9301 = vmatmul.mubr.msk.f32.gmra.mxu0 %vm272_vm0, %v10914_v29 }
  0xe5   : > { %9351 = vmatmul.mubr.msk.f32.gmra.mxu1 %vm272_vm0, %v10670_v55  ;;  %9303 = vmatprep.mubr.msk.f32.mxu0 %vm272_vm0, %v10920_v47  ;;  %v11012_v55 = vld [vmem:[#allocation2 + $0x15a] sm:$0xff] }
  0xe6   : > { %9353 = vmatprep.mubr.msk.f32.mxu1 %vm272_vm0, %v10674_v59  ;;  %v10944_v59 = vld [vmem:[#allocation2 + $0xda] sm:$0xff] }
  0xe9   : > { %9354 = vmatmul.mubr.msk.f32.gmra.mxu1 %vm272_vm0, %v10688_v61  ;;  %v10950_v61 = vld [vmem:[#allocation2 + $0xe2] sm:$0xff] }
  0xea   : > { %9356 = vmatprep.mubr.msk.f32.mxu1 %vm272_vm0, %v10692_v1  ;;  %v10956_v1 = vld [vmem:[#allocation2 + $0xf2] sm:$0xff] }
  0xed   : > { %9357 = vmatmul.mubr.msk.f32.gmra.mxu1 %vm272_vm0, %v10706_v3  ;;  %v10962_v3 = vld [vmem:[#allocation2 + $0xfa] sm:$0xff] }
  0xee   : > { %9359 = vmatprep.mubr.msk.f32.mxu1 %vm272_vm0, %v10710_v8  ;;  %v10968_v8 = vld [vmem:[#allocation2 + $0x10a] sm:$0xff] }
  0xf1   : > { %9360 = vmatmul.mubr.msk.f32.gmra.mxu1 %vm272_vm0, %v10724_v10  ;;  %v10974_v10 = vld [vmem:[#allocation2 + $0x112] sm:$0xff] }
  0xf2   : > { %9362 = vmatprep.mubr.msk.f32.mxu1 %vm272_vm0, %v10728_v17  ;;  %v10980_v17 = vld [vmem:[#allocation2 + $0x122] sm:$0xff] }
  0xf5   : > { %9363 = vmatmul.mubr.msk.f32.gmra.mxu1 %vm272_vm0, %v10742_v23  ;;  %v10986_v23 = vld [vmem:[#allocation2 + $0x12a] sm:$0xff] }
  0xf6   : > { %9365 = vmatprep.mubr.msk.f32.mxu1 %vm272_vm0, %v10746_v33  ;;  %v10992_v33 = vld [vmem:[#allocation2 + $0x13a] sm:$0xff] }
  0xf8   : > { %v9234_v19 = vpop.f32.mrf.mxu1 }
  0xf9   : > { %v10908_v0 = vadd.f32 %v9234_v19, %v1004_v26  ;;  %v10926_v19 = vld [vmem:[#allocation2 + $0xb2] sm:$0xff]  ;;  %v10932_v26 = vld [vmem:[#allocation2 + $0xc2] sm:$0xff]  ;;  %9366 = vmatmul.mubr.msk.f32.gmra.mxu1 %vm272_vm0, %v10760_v39 }
  0xfa   : > { %9304 = vmatmul.mubr.msk.f32.gmra.mxu0 %vm272_vm0, %v10926_v19  ;;  %9368 = vmatprep.mubr.msk.f32.mxu1 %vm272_vm0, %v10764_v51  ;;  %v10998_v39 = vld [vmem:[#allocation2 + $0x142] sm:$0xff]  ;;  %v11004_v51 = vld [vmem:[#allocation2 + $0x152] sm:$0xff] }
  0xfb   : > { %13592 = vst [vmem:[#allocation33_spill] sm:$0xff] %v10908_v0  ;;  %9306 = vmatprep.mubr.msk.f32.mxu0 %vm272_vm0, %v10932_v26  ;;  %v10938_v0 = vld [vmem:[#allocation2 + $0xca] sm:$0xff] }
  0xfd   : > { %9369 = vmatmul.mubr.msk.f32.gmra.mxu1 %vm272_vm0, %v10778_v57  ;;  %v11010_v57 = vld [vmem:[#allocation2 + $0x180] sm:$0xff] }
  0xfe   : > { %9307 = vmatmul.mubr.msk.f32.gmra.mxu0 %vm272_vm0, %v10938_v0  ;;  %9371 = vmatprep.mubr.msk.f32.mxu1 %vm272_vm0, %v10782_v63  ;;  %13593 = vst [vmem:[#allocation34_spill] sm:$0xff] %v11010_v57  ;;  %v11018_v63 = vld [vmem:[#allocation2 + $0x16a] sm:$0xff] }
  0xff   : > { %9309 = vmatprep.mubr.msk.f32.mxu0 %vm272_vm0, %v10944_v59 }
 0x101   : > { %9372 = vmatmul.mubr.msk.f32.gmra.mxu1 %vm272_vm0, %v10796_v12  ;;  %v11024_v12 = vld [vmem:[#allocation2 + $0x188] sm:$0xff] }
 0x102   : > { %9310 = vmatmul.mubr.msk.f32.gmra.mxu0 %vm272_vm0, %v10950_v61  ;;  %9374 = vmatprep.mubr.msk.f32.mxu1 %vm272_vm0, %v10800_v27  ;;  %v11026_v27 = vld [vmem:[#allocation2 + $0x172] sm:$0xff] }
 0x103   : > { %9312 = vmatprep.mubr.msk.f32.mxu0 %vm272_vm0, %v10956_v1 }
 0x105   : > { %9375 = vmatmul.mubr.msk.f32.gmra.mxu1 %vm272_vm0, %v10812_v45 }
 0x106   : > { %9313 = vmatmul.mubr.msk.f32.gmra.mxu0 %vm272_vm0, %v10962_v3  ;;  %9377 = vmatprep.mubr.msk.f32.mxu1 %vm272_vm0, %v11010_v57  ;;  %v11043_v57 = vld [vmem:[%s13490_s2 + $0x40] sm:$0xff] }
 0x107   : > { %9315 = vmatprep.mubr.msk.f32.mxu0 %vm272_vm0, %v10968_v8 }
 0x109   : > { %9378 = vmatmul.mubr.msk.f32.gmra.mxu1 %vm272_vm0, %v11024_v12 }
 0x10a   : > { %9316 = vmatmul.mubr.msk.f32.gmra.mxu0 %vm272_vm0, %v10974_v10  ;;  %9432 = vmatprep.mubr.msk.f32.mxu1 %vm272_vm0, %v10826_v28 }
 0x10b   : > { %9318 = vmatprep.mubr.msk.f32.mxu0 %vm272_vm0, %v10980_v17 }
 0x10d   : > { %9433 = vmatmul.mubr.msk.f32.vlgmr.msra.gmra.mxu1 %vm272_vm0, %v10844_v15 }
 0x10e   : > { %9319 = vmatmul.mubr.msk.f32.gmra.mxu0 %vm272_vm0, %v10986_v23  ;;  %9435 = vmatprep.mubr.msk.f32.mxu1 %vm272_vm0, %v10852_v5 }
 0x10f   : > { %9321 = vmatprep.mubr.msk.f32.mxu0 %vm272_vm0, %v10992_v33  ;;  %9531 = vmatpush3.msra.mxu1 %v10836_v46 }
 0x111   : > { %9436 = vmatmul.mubr.msk.f32.gmra.mxu1 %vm272_vm0, %v10858_v14 }
 0x112   : > { %9322 = vmatmul.mubr.msk.f32.gmra.mxu0 %vm272_vm0, %v10998_v39  ;;  %9438 = vmatprep.mubr.msk.f32.mxu1 %vm272_vm0, %v10864_v21 }
 0x113   : > { %9324 = vmatprep.mubr.msk.f32.mxu0 %vm272_vm0, %v11004_v51 }
 0x115   : > { %9439 = vmatmul.mubr.msk.f32.gmra.mxu1 %vm272_vm0, %v10870_v6  ;;  %v13605_v6 = vld [vmem:[#allocation11_spill] sm:$0xff] }
 0x116   : > { %9325 = vmatmul.mubr.msk.f32.gmra.mxu0 %vm272_vm0, %v11012_v55  ;;  %9441 = vmatprep.mubr.msk.f32.mxu1 %vm272_vm0, %v10876_v7 }
 0x117   : > { %9327 = vmatprep.mubr.msk.f32.mxu0 %vm272_vm0, %v11018_v63 }
 0x119   : > { %9442 = vmatmul.mubr.msk.f32.gmra.mxu1 %vm272_vm0, %v10887_v31  ;;  %v13596_v31 = vld [vmem:[#allocation31_spill] sm:$0xff] }
 0x11a   : > { %9328 = vmatmul.mubr.msk.f32.gmra.mxu0 %vm272_vm0, %v11026_v27  ;;  %9444 = vmatprep.mubr.msk.f32.mxu1 %vm272_vm0, %v10893_v37  ;;  %v11156_v37 = vld [vmem:[#allocation2 + $0x181] sm:$0xff] }
 0x11b   : > { %9382 = vmatprep.mubr.msk.f32.mxu0 %vm272_vm0, %v10554_v16  ;;  %v13594_v16 = vld [vmem:[#allocation27_spill] sm:$0xff] }
 0x11d   : > { %9445 = vmatmul.mubr.msk.f32.gmra.mxu1 %vm272_vm0, %v10900_v41  ;;  %v11158_v41 = vld [vmem:[#allocation2 + $0x182] sm:$0xff] }
 0x11e   : > { %9383 = vmatmul.mubr.msk.f32.vlgmr.msra.gmra.mxu0 %vm272_vm0, %v10568_v22  ;;  %9447 = vmatprep.mubr.msk.f32.mxu1 %vm272_vm0, %v10906_v43  ;;  %v13595_v22 = vld [vmem:[#allocation29_spill] sm:$0xff]  ;;  %v13597_v43 = vld [vmem:[#allocation32_spill] sm:$0xff] }
 0x11f   : > { %9481 = vmatpush3.msra.mxu0 %v10831_v13  ;;  %9385 = vmatprep.mubr.msk.f32.mxu0 %vm272_vm0, %v10564_v20 }
 0x120   : > { %9580 = vmatprep.subr.mxu0 %v11043_v57 }
 0x121   : > { %9448 = vmatmul.mubr.msk.f32.gmra.mxu1 %vm272_vm0, %v10914_v29  ;;  %v13606_v29 = vld [vmem:[#allocation12_spill] sm:$0xff] }
 0x122   : > { %9386 = vmatmul.mubr.msk.f32.gmra.mxu0 %vm272_vm0, %v10580_v25  ;;  %9450 = vmatprep.mubr.msk.f32.mxu1 %vm272_vm0, %v10920_v47  ;;  %v11168_v47 = vld [vmem:[#allocation2 + $0x189] sm:$0xff] }
 0x123   : > { %9388 = vmatprep.mubr.msk.f32.mxu0 %vm272_vm0, %v10586_v30 }
 0x125   : > { %9451 = vmatmul.mubr.msk.f32.gmra.mxu1 %vm272_vm0, %v10926_v19 }
 0x126   : > { %9389 = vmatmul.mubr.msk.f32.gmra.mxu0 %vm272_vm0, %v10600_v32  ;;  %9453 = vmatprep.mubr.msk.f32.mxu1 %vm272_vm0, %v10932_v26 }
 0x127   : > { %9391 = vmatprep.mubr.msk.f32.mxu0 %vm272_vm0, %v10604_v36 }
 0x129   : > { %9454 = vmatmul.mubr.msk.f32.gmra.mxu1 %vm272_vm0, %v10938_v0  ;;  %v13603_v0 = vld [vmem:[#allocation9_spill] sm:$0xff] }
 0x12a   : > { %9392 = vmatmul.mubr.msk.f32.gmra.mxu0 %vm272_vm0, %v10618_v38  ;;  %9456 = vmatprep.mubr.msk.f32.mxu1 %vm272_vm0, %v10944_v59  ;;  %v13598_v59 = vld [vmem:[#allocation4_spill] sm:$0xff] }
 0x12b   : > { %9394 = vmatprep.mubr.msk.f32.mxu0 %vm272_vm0, %v10622_v42 }
 0x12d   : > { %9457 = vmatmul.mubr.msk.f32.gmra.mxu1 %vm272_vm0, %v10950_v61  ;;  %v13599_v61 = vld [vmem:[#allocation5_spill] sm:$0xff] }
 0x12e   : > { %9395 = vmatmul.mubr.msk.f32.gmra.mxu0 %vm272_vm0, %v10636_v44  ;;  %9459 = vmatprep.mubr.msk.f32.mxu1 %vm272_vm0, %v10956_v1  ;;  %v11184_v1 = vpop.f32.mrf.mxu1 }
 0x12f   : > { %9397 = vmatprep.mubr.msk.f32.mxu0 %vm272_vm0, %v10640_v48 }
 0x131   : > { %9460 = vmatmul.mubr.msk.f32.gmra.mxu1 %vm272_vm0, %v10962_v3  ;;  %v13600_v3 = vld [vmem:[#allocation6_spill] sm:$0xff] }
 0x132   : > { %9398 = vmatmul.mubr.msk.f32.gmra.mxu0 %vm272_vm0, %v10654_v50  ;;  %9462 = vmatprep.mubr.msk.f32.mxu1 %vm272_vm0, %v10968_v8  ;;  %v11189_v8 = vpop.f32.mrf.mxu0 }
 0x133   : > { %9400 = vmatprep.mubr.msk.f32.mxu0 %vm272_vm0, %v10658_v54 }
 0x135   : > { %9463 = vmatmul.mubr.msk.f32.gmra.mxu1 %vm272_vm0, %v10974_v10 }
 0x136   : > { %9401 = vmatmul.mubr.msk.f32.gmra.mxu0 %vm272_vm0, %v10672_v56  ;;  %9465 = vmatprep.mubr.msk.f32.mxu1 %vm272_vm0, %v10980_v17  ;;  %v13601_v17 = vld [vmem:[#allocation7_spill] sm:$0xff] }
 0x137   : > { %9403 = vmatprep.mubr.msk.f32.mxu0 %vm272_vm0, %v10676_v60 }
 0x139   : > { %9466 = vmatmul.mubr.msk.f32.gmra.mxu1 %vm272_vm0, %v10986_v23  ;;  %v13602_v23 = vld [vmem:[#allocation8_spill] sm:$0xff] }
 0x13a   : > { %9404 = vmatmul.mubr.msk.f32.gmra.mxu0 %vm272_vm0, %v10690_v62  ;;  %9468 = vmatprep.mubr.msk.f32.mxu1 %vm272_vm0, %v10992_v33 }
 0x13b   : > { %9406 = vmatprep.mubr.msk.f32.mxu0 %vm272_vm0, %v10694_v2 }
 0x13d   : > { %9469 = vmatmul.mubr.msk.f32.gmra.mxu1 %vm272_vm0, %v10998_v39 }
 0x13e   : > { %9407 = vmatmul.mubr.msk.f32.gmra.mxu0 %vm272_vm0, %v10708_v4  ;;  %9471 = vmatprep.mubr.msk.f32.mxu1 %vm272_vm0, %v11004_v51 }
 0x13f   : > { %9409 = vmatprep.mubr.msk.f32.mxu0 %vm272_vm0, %v10712_v9 }
 0x141   : > { %9472 = vmatmul.mubr.msk.f32.gmra.mxu1 %vm272_vm0, %v11012_v55  ;;  %v11170_v55 = vld [vmem:[#allocation2 + $0x18a] sm:$0xff] }
 0x142   : > { %9410 = vmatmul.mubr.msk.f32.gmra.mxu0 %vm272_vm0, %v10726_v11  ;;  %9474 = vmatprep.mubr.msk.f32.mxu1 %vm272_vm0, %v11018_v63 }
 0x143   : > { %9412 = vmatprep.mubr.msk.f32.mxu0 %vm272_vm0, %v10730_v18 }
 0x145   : > { %9475 = vmatmul.mubr.msk.f32.gmra.mxu1 %vm272_vm0, %v11026_v27  ;;  %v13604_v27 = vld [vmem:[#allocation10_spill] sm:$0xff] }
 0x146   : > { %9413 = vmatmul.mubr.msk.f32.gmra.mxu0 %vm272_vm0, %v10744_v24  ;;  %9477 = vmatprep.mubr.msk.f32.mxu1 %vm272_vm0, %v11158_v41 }
 0x147   : > { %9415 = vmatprep.mubr.msk.f32.mxu0 %vm272_vm0, %v10748_v34 }
 0x149   : > { %9478 = vmatmul.mubr.msk.f32.gmra.mxu1 %vm272_vm0, %v11170_v55 }
 0x14a   : > { %9416 = vmatmul.mubr.msk.f32.gmra.mxu0 %vm272_vm0, %v10762_v40  ;;  %9532 = vmatprep.mubr.msk.f32.mxu1 %vm272_vm0, %v10564_v20 }
 0x14b   : > { %9418 = vmatprep.mubr.msk.f32.mxu0 %vm272_vm0, %v10766_v52 }
 0x14d   : > { %9533 = vmatmul.mubr.msk.f32.vlgmr.msra.gmra.mxu1 %vm272_vm0, %v10580_v25 }
 0x14e   : > { %9419 = vmatmul.mubr.msk.f32.gmra.mxu0 %vm272_vm0, %v10780_v58  ;;  %9535 = vmatprep.mubr.msk.f32.mxu1 %vm272_vm0, %v10586_v30 }
 0x14f   : > { %9421 = vmatprep.mubr.msk.f32.mxu0 %vm272_vm0, %v13594_v16 }
 0x150   : > { %v9187_v10 = vpop.f32.mrf.mxu0 }
 0x151   : > { %v9237_v20 = vpop.f32.mrf.mxu1  ;;  %9536 = vmatmul.mubr.msk.f32.gmra.mxu1 %vm272_vm0, %v10600_v32  ;;  %v1006_v25 = vadd.f32 %v9187_v10, %v10885_v35 }
 0x152   : > { %9422 = vmatmul.mubr.msk.f32.gmra.mxu0 %vm272_vm0, %v13595_v22  ;;  %9538 = vmatprep.mubr.msk.f32.mxu1 %vm272_vm0, %v10604_v36  ;;  %v854_v33 = vpop.f32.mrf.mxu0 }
 0x153   : > { %9424 = vmatprep.mubr.msk.f32.mxu0 %vm272_vm0, %v13596_v31  ;;  %v1241_v39 = vpop.f32.mrf.mxu1  ;;  %v11202_v51 = vadd.f32 %v9237_v20, %v1006_v25  ;;  %v1005_v30 = vadd.f32 %v10885_v35, %v854_v33  ;;  %v13607_v33 = vld [vmem:[#allocation13_spill] sm:$0xff] }
 0x155   : > { %v9240_v63 = vpop.f32.mrf.mxu1  ;;  %9539 = vmatmul.mubr.msk.f32.gmra.mxu1 %vm272_vm0, %v10618_v38  ;;  %v11209_v32 = vadd.f32 %v1241_v39, %v1005_v30  ;;  %v13608_v39 = vld [vmem:[#allocation14_spill] sm:$0xff] }
 0x156   : > { %9425 = vmatmul.mubr.msk.f32.gmra.mxu0 %vm272_vm0, %v13597_v43  ;;  %9541 = vmatprep.mubr.msk.f32.mxu1 %vm272_vm0, %v10622_v42 }
 0x157   : > { %9427 = vmatprep.mubr.msk.f32.mxu0 %vm272_vm0, %v11156_v37  ;;  %v1251_v28 = vpop.f32.mrf.mxu1 }
 0x159   : > { %v9243_v21 = vpop.f32.mrf.mxu1  ;;  %9542 = vmatmul.mubr.msk.f32.gmra.mxu1 %vm272_vm0, %v10636_v44 }
 0x15a   : > { %9428 = vmatmul.mubr.msk.f32.gmra.mxu0 %vm272_vm0, %v11168_v47  ;;  %9544 = vmatprep.mubr.msk.f32.mxu1 %vm272_vm0, %v10640_v48 }
 0x15b   : > { %9482 = vmatprep.mubr.msk.f32.mxu0 %vm272_vm0, %v13598_v59  ;;  %v1261_v19 = vpop.f32.mrf.mxu1 }
 0x15d   : > { %9545 = vmatmul.mubr.msk.f32.gmra.mxu1 %vm272_vm0, %v10654_v50 }
 0x15e   : > { %9483 = vmatmul.mubr.msk.f32.vlgmr.msra.gmra.mxu0 %vm272_vm0, %v13599_v61  ;;  %9547 = vmatprep.mubr.msk.f32.mxu1 %vm272_vm0, %v10658_v54 }
 0x15f   : > { %9581 = vmatpush3.msra.mxu0 %v11043_v57  ;;  %9485 = vmatprep.mubr.msk.f32.mxu0 %vm272_vm0, %v13600_v3  ;;  %v9190_v57 = vpop.f32.mrf.mxu0  ;;  %v9246_v3 = vpop.f32.mrf.mxu1 }
 0x160   : > { %v1008_v13 = vadd.f32 %v9190_v57, %v10885_v35 }
 0x161   : > { %v864_v36 = vpop.f32.mrf.mxu0  ;;  %v1271_v20 = vpop.f32.mrf.mxu1  ;;  %9548 = vmatmul.mubr.msk.f32.gmra.mxu1 %vm272_vm0, %v10672_v56 }
 0x162   : > { %9486 = vmatmul.mubr.msk.f32.gmra.mxu0 %vm272_vm0, %v13601_v17  ;;  %v11216_v46 = vadd.f32 %v9240_v63, %v1008_v13  ;;  %v1007_v15 = vadd.f32 %v10885_v35, %v864_v36  ;;  %9550 = vmatprep.mubr.msk.f32.mxu1 %vm272_vm0, %v10676_v60 }
 0x163   : > { %9488 = vmatprep.mubr.msk.f32.mxu0 %vm272_vm0, %v13602_v23  ;;  %v9193_v14 = vpop.f32.mrf.mxu0  ;;  %v9249_v23 = vpop.f32.mrf.mxu1 }
 0x164   : > { %v11223_v38 = vadd.f32 %v1251_v28, %v1007_v15  ;;  %v1010_v7 = vadd.f32 %v9193_v14, %v10885_v35  ;;  %v13610_v28 = vld [vmem:[#allocation16_spill] sm:$0xff] }
 0x165   : > { %v874_v42 = vpop.f32.mrf.mxu0  ;;  %v1281_v30 = vpop.f32.mrf.mxu1  ;;  %9551 = vmatmul.mubr.msk.f32.gmra.mxu1 %vm272_vm0, %v10690_v62 }
 0x166   : > { %9489 = vmatmul.mubr.msk.f32.gmra.mxu0 %vm272_vm0, %v13603_v0  ;;  %v11230_v26 = vadd.f32 %v9243_v21, %v1010_v7  ;;  %v1009_v59 = vadd.f32 %v10885_v35, %v874_v42  ;;  %9553 = vmatprep.mubr.msk.f32.mxu1 %vm272_vm0, %v10694_v2 }
 0x167   : > { %9491 = vmatprep.mubr.msk.f32.mxu0 %vm272_vm0, %v13604_v27  ;;  %v9196_v61 = vpop.f32.mrf.mxu0  ;;  %v9252_v13 = vpop.f32.mrf.mxu1  ;;  %v13609_v27 = vld [vmem:[#allocation15_spill] sm:$0xff] }
 0x168   : > { %v11237_v44 = vadd.f32 %v1261_v19, %v1009_v59  ;;  %v1012_v10 = vadd.f32 %v9196_v61, %v10885_v35  ;;  %v13612_v19 = vld [vmem:[#allocation18_spill] sm:$0xff] }
 0x169   : > { %v884_v48 = vpop.f32.mrf.mxu0  ;;  %v1291_v15 = vpop.f32.mrf.mxu1  ;;  %9554 = vmatmul.mubr.msk.f32.gmra.mxu1 %vm272_vm0, %v10708_v4 }
 0x16a   : > { %9492 = vmatmul.mubr.msk.f32.gmra.mxu0 %vm272_vm0, %v13605_v6  ;;  %v11244_v17 = vadd.f32 %v9246_v3, %v1012_v10  ;;  %v1011_v25 = vadd.f32 %v10885_v35, %v884_v48  ;;  %9556 = vmatprep.mubr.msk.f32.mxu1 %vm272_vm0, %v10712_v9 }
 0x16b   : > { %9494 = vmatprep.mubr.msk.f32.mxu0 %vm272_vm0, %v13606_v29  ;;  %v9255_v7 = vpop.f32.mrf.mxu1  ;;  %v13611_v29 = vld [vmem:[#allocation17_spill] sm:$0xff] }
 0x16c   : > { %v11251_v50 = vadd.f32 %v1271_v20, %v1011_v25  ;;  %v13613_v20 = vld [vmem:[#allocation19_spill] sm:$0xff] }
 0x16d   : > { %v1301_v59 = vpop.f32.mrf.mxu1  ;;  %9557 = vmatmul.mubr.msk.f32.gmra.mxu1 %vm272_vm0, %v10726_v11 }
 0x16e   : > { %9495 = vmatmul.mubr.msk.f32.gmra.mxu0 %vm272_vm0, %v10652_v49  ;;  %v9199_v49 = vpop.f32.mrf.mxu0  ;;  %9559 = vmatprep.mubr.msk.f32.mxu1 %vm272_vm0, %v10730_v18 }
 0x16f   : > { %9497 = vmatprep.mubr.msk.f32.mxu0 %vm272_vm0, %v10656_v53  ;;  %v1014_v53 = vadd.f32 %v9199_v49, %v10885_v35  ;;  %v9258_v48 = vpop.f32.mrf.mxu1  ;;  %v13614_v49 = vld [vmem:[#allocation20_spill] sm:$0xff] }
 0x170   : > { %v894_v54 = vpop.f32.mrf.mxu0 }
 0x171   : > { %v11258_v57 = vadd.f32 %v9249_v23, %v1014_v53  ;;  %v1013_v63 = vadd.f32 %v10885_v35, %v894_v54  ;;  %v11302_v23 = vpop.f32.mrf.mxu1  ;;  %v13615_v54 = vld [vmem:[#allocation21_spill] sm:$0xff]  ;;  %9560 = vmatmul.mubr.msk.f32.gmra.mxu1 %vm272_vm0, %v10744_v24 }
 0x172   : > { %9498 = vmatmul.mubr.msk.f32.gmra.mxu0 %vm272_vm0, %v13607_v33  ;;  %v9202_v0 = vpop.f32.mrf.mxu0  ;;  %9562 = vmatprep.mubr.msk.f32.mxu1 %vm272_vm0, %v10748_v34 }
 0x173   : > { %9500 = vmatprep.mubr.msk.f32.mxu0 %vm272_vm0, %v13608_v39  ;;  %v11265_v56 = vadd.f32 %v1281_v30, %v1013_v63  ;;  %v1016_v36 = vadd.f32 %v9202_v0, %v10885_v35  ;;  %v9261_v39 = vpop.f32.mrf.mxu1  ;;  %v13616_v30 = vld [vmem:[#allocation22_spill] sm:$0xff] }
 0x174   : > { %v904_v60 = vpop.f32.mrf.mxu0 }
 0x175   : > { %v11272_v14 = vadd.f32 %v9252_v13, %v1016_v36  ;;  %v1015_v21 = vadd.f32 %v10885_v35, %v904_v60  ;;  %v11317_v63 = vpop.f32.mrf.mxu1  ;;  %v13617_v36 = vld [vmem:[#allocation23_spill] sm:$0xff]  ;;  %9563 = vmatmul.mubr.msk.f32.gmra.mxu1 %vm272_vm0, %v10762_v40 }
 0x176   : > { %9501 = vmatmul.mubr.msk.f32.gmra.mxu0 %vm272_vm0, %v13609_v27  ;;  %v9205_v6 = vpop.f32.mrf.mxu0  ;;  %9565 = vmatprep.mubr.msk.f32.mxu1 %vm272_vm0, %v10766_v52 }
 0x177   : > { %9503 = vmatprep.mubr.msk.f32.mxu0 %vm272_vm0, %v13610_v28  ;;  %v11279_v62 = vadd.f32 %v1291_v15, %v1015_v21  ;;  %v1018_v42 = vadd.f32 %v9205_v6, %v10885_v35  ;;  %v9264_v27 = vpop.f32.mrf.mxu1  ;;  %v13618_v28 = vld [vmem:[#allocation24_spill] sm:$0xff] }
 0x178   : > { %v914_v2 = vpop.f32.mrf.mxu0 }
 0x179   : > { %v11286_v61 = vadd.f32 %v9255_v7, %v1018_v42  ;;  %v1017_v3 = vadd.f32 %v10885_v35, %v914_v2  ;;  %v11332_v60 = vpop.f32.mrf.mxu1  ;;  %v13619_v7 = vld [vmem:[#allocation25_spill] sm:$0xff]  ;;  %9566 = vmatmul.mubr.msk.f32.gmra.mxu1 %vm272_vm0, %v10780_v58 }
 0x17a   : > { %9504 = vmatmul.mubr.msk.f32.gmra.mxu0 %vm272_vm0, %v13611_v29  ;;  %v9208_v10 = vpop.f32.mrf.mxu0  ;;  %v13620_v29 = vld [vmem:[#allocation26_spill] sm:$0xff]  ;;  %9568 = vmatprep.mubr.msk.f32.mxu1 %vm272_vm0, %v13594_v16 }
 0x17b   : > { %9506 = vmatprep.mubr.msk.f32.mxu0 %vm272_vm0, %v13612_v19  ;;  %v11293_v4 = vadd.f32 %v1301_v59, %v1017_v3  ;;  %v1020_v25 = vadd.f32 %v9208_v10, %v10885_v35  ;;  %v9267_v6 = vpop.f32.mrf.mxu1  ;;  %v13621_v3 = vld [vmem:[#allocation28_spill] sm:$0xff]  ;;  %v13622_v10 = vld [vmem:[#allocation30_spill] sm:$0xff] }
 0x17c   : > { %v11300_v9 = vpop.f32.mrf.mxu0 }
 0x17d   : > { %v11304_v33 = vadd.f32 %v9258_v48, %v1020_v25  ;;  %v11347_v42 = vpop.f32.mrf.mxu1  ;;  %9569 = vmatmul.mubr.msk.f32.gmra.mxu1 %vm272_vm0, %v13595_v22 }
 0x17e   : > { %9507 = vmatmul.mubr.msk.f32.gmra.mxu0 %vm272_vm0, %v13613_v20  ;;  %v9211_v53 = vpop.f32.mrf.mxu0  ;;  %9571 = vmatprep.mubr.msk.f32.mxu1 %vm272_vm0, %v13596_v31 }
 0x17f   : > { %9509 = vmatprep.mubr.msk.f32.mxu0 %vm272_vm0, %v13614_v49  ;;  %v1022_v11 = vadd.f32 %v9211_v53, %v10885_v35  ;;  %v9270_v59 = vpop.f32.mrf.mxu1  ;;  %v13623_v53 = vld [vmem:[#allocation34_spill] sm:$0xff] }
 0x180   : > { %v11315_v18 = vpop.f32.mrf.mxu0 }
 0x181   : > { %v11319_v0 = vadd.f32 %v9261_v39, %v1022_v11  ;;  %v11362_v48 = vpop.f32.mrf.mxu1  ;;  %9572 = vmatmul.mubr.msk.f32.gmra.mxu1 %vm272_vm0, %v13597_v43  ;;  %v3388_v11 = vld [vmem:[#allocation2 + $0x199] sm:$0xff] }
 0x182   : > { %9510 = vmatmul.mubr.msk.f32.gmra.mxu0 %vm272_vm0, %v13615_v54  ;;  %v9214_v13 = vpop.f32.mrf.mxu0  ;;  %9574 = vmatprep.mubr.msk.f32.mxu1 %vm272_vm0, %v11156_v37  ;;  %v3001_v54 = vld [vmem:[#allocation2 + $0x198] sm:$0xff]  ;;  %v3002_v37 = vld [vmem:[#allocation2 + $0x1a0] sm:$0xff] }
 0x183   : > { %9512 = vmatprep.mubr.msk.f32.mxu0 %vm272_vm0, %v13616_v30  ;;  %v1024_v24 = vadd.f32 %v9214_v13, %v10885_v35  ;;  %v9273_v49 = vpop.f32.mrf.mxu1 }
 0x184   : > { %v11330_v34 = vpop.f32.mrf.mxu0 }
 0x185   : > { %v11334_v15 = vadd.f32 %v9264_v27, %v1024_v24  ;;  %v11377_v39 = vpop.f32.mrf.mxu1  ;;  %9575 = vmatmul.mubr.msk.f32.gmra.mxu1 %vm272_vm0, %v11168_v47  ;;  %v3389_v27 = vld [vmem:[#allocation2 + $0x1a1] sm:$0xff] }
 0x186   : > { %9513 = vmatmul.mubr.msk.f32.gmra.mxu0 %vm272_vm0, %v13617_v36  ;;  %v9217_v21 = vpop.f32.mrf.mxu0  ;;  %9577 = vmatprep.mubr.msk.f32.mxu1 %vm272_vm0, %v3388_v11  ;;  %v3749_v11 = vld [vmem:[#allocation2 + $0x62] sm:$0xff] }
 0x187   : > { %9515 = vmatprep.mubr.msk.f32.mxu0 %vm272_vm0, %v13618_v28  ;;  %v1026_v40 = vadd.f32 %v9217_v21, %v10885_v35  ;;  %v9276_v13 = vpop.f32.mrf.mxu1 }
 0x188   : > { %v11345_v52 = vpop.f32.mrf.mxu0 }
 0x189   : > { %v11349_v19 = vadd.f32 %v9267_v6, %v1026_v40  ;;  %v11390_v24 = vpop.f32.mrf.mxu1  ;;  %9578 = vmatmul.mubr.msk.f32.gmra.mxu1 %vm272_vm0, %v3389_v27 }
 0x18a   : > { %9516 = vmatmul.mubr.msk.f32.gmra.mxu0 %vm272_vm0, %v13619_v7  ;;  %v9220_v2 = vpop.f32.mrf.mxu0 }
 0x18b   : > { %9518 = vmatprep.mubr.msk.f32.mxu0 %vm272_vm0, %v13620_v29  ;;  %v1028_v58 = vadd.f32 %v9220_v2, %v10885_v35  ;;  %v9279_v6 = vpop.f32.mrf.mxu1  ;;  %v3746_v29 = vld [vmem:[#allocation2 + $0x3a] sm:$0xff] }
 0x18c   : > { %v11360_v16 = vpop.f32.mrf.mxu0 }
 0x18d   : > { %v11364_v20 = vadd.f32 %v9270_v59, %v1028_v58  ;;  %v11401_v7 = vpop.f32.mrf.mxu1  ;;  %v13624_v58 = vld [vmem:[#allocation33_spill] sm:$0xff] }
 0x18e   : > { %9519 = vmatmul.mubr.msk.f32.gmra.mxu0 %vm272_vm0, %v13621_v3  ;;  %v9223_v25 = vpop.f32.mrf.mxu0  ;;  %v3747_v3 = vld [vmem:[#allocation2 + $0x4a] sm:$0xff] }
 0x18f   : > { %9521 = vmatprep.mubr.msk.f32.mxu0 %vm272_vm0, %v13622_v10  ;;  %v1030_v22 = vadd.f32 %v9223_v25, %v10885_v35  ;;  %v9334_v59 = vpop.f32.mrf.mxu1 }
 0x190   : > { %v11375_v31 = vpop.f32.mrf.mxu0 }
 0x191   : > { %v11379_v30 = vadd.f32 %v9273_v49, %v1030_v22  ;;  %v11410_v49 = vpop.f32.mrf.mxu1  ;;  %v3748_v22 = vld [vmem:[#allocation2 + $0x52] sm:$0xff] }
 0x192   : > { %9522 = vmatmul.mubr.msk.f32.gmra.mxu0 %vm272_vm0, %v10812_v45  ;;  %v9226_v45 = vpop.f32.mrf.mxu0 }
 0x193   : > { %9524 = vmatprep.mubr.msk.f32.mxu0 %vm272_vm0, %v13623_v53  ;;  %v1032_v43 = vadd.f32 %v9226_v45, %v10885_v35 }
 0x194   : > { %v11388_v36 = vpop.f32.mrf.mxu0 }
 0x195   : > { %v11392_v28 = vadd.f32 %v9276_v13, %v1032_v43 }
 0x196   : > { %9525 = vmatmul.mubr.msk.f32.gmra.mxu0 %vm272_vm0, %v11024_v12  ;;  %v9229_v21 = vpop.f32.mrf.mxu0 }
 0x197   : > { %9527 = vmatprep.mubr.msk.f32.mxu0 %vm272_vm0, %v3001_v54  ;;  %v1034_v12 = vadd.f32 %v9229_v21, %v10885_v35  ;;  %v9337_v54 = vpop.f32.mrf.mxu1  ;;  %v3750_v21 = vld [vmem:[#allocation2 + $0x6a] sm:$0xff] }
 0x198   : > { %v11399_v47 = vpop.f32.mrf.mxu0 }
 0x199   : > { %v11403_v40 = vadd.f32 %v9279_v6, %v1034_v12  ;;  %v11417_v43 = vpop.f32.mrf.mxu1 }
 0x19a   : > { %9528 = vmatmul.mubr.msk.f32.gmra.mxu0 %vm272_vm0, %v3002_v37  ;;  %v9284_v2 = vpop.f32.mrf.mxu0 }
 0x19b   : > { %9582 = vmatprep.mubr.msk.f32.mxu0 %vm272_vm0, %v10852_v5  ;;  %v1778_v10 = vadd.f32 %v9284_v2, %v13624_v58  ;;  %v9340_v12 = vpop.f32.mrf.mxu1 }
 0x19c   : > { %v11408_v25 = vpop.f32.mrf.mxu0 }
 0x19d   : > { %v11412_v5 = vadd.f32 %v9334_v59, %v1778_v10  ;;  %v11427_v59 = vpop.f32.mrf.mxu1 }
 0x19e   : > { %9583 = vmatmul.mubr.msk.f32.vlgmr.msra.gmra.mxu0 %vm272_vm0, %v3746_v29  ;;  %v9287_v53 = vpop.f32.mrf.mxu0  ;;  %v3751_v29 = vld [vmem:[#allocation2 + $0x7a] sm:$0xff] }
 0x19f   : > { %9585 = vmatprep.mubr.msk.f32.mxu0 %vm272_vm0, %v3747_v3  ;;  %v1780_v45 = vadd.f32 %v9287_v53, %v11202_v51  ;;  %v3753_v53 = vld [vmem:[#allocation2 + $0x92] sm:$0xff] }
 0x1a0   : > { %v1628_v13 = vpop.f32.mrf.mxu0 }
 0x1a1   : > { %v11419_v37 = vadd.f32 %v9337_v54, %v1780_v45  ;;  %v11422_v27 = vadd.f32 %v1628_v13, %v11209_v32  ;;  %v3752_v32 = vld [vmem:[#allocation2 + $0x82] sm:$0xff] }
 0x1a2   : > { %9586 = vmatmul.mubr.msk.f32.gmra.mxu0 %vm272_vm0, %v3748_v22  ;;  %v9290_v6 = vpop.f32.mrf.mxu0  ;;  %v9343_v22 = vpop.f32.mrf.mxu1 }
 0x1a3   : > { %9588 = vmatprep.mubr.msk.f32.mxu0 %vm272_vm0, %v3749_v11  ;;  %v1782_v2 = vadd.f32 %v9290_v6, %v11216_v46 }
 0x1a4   : > { %v1638_v51 = vpop.f32.mrf.mxu0  ;;  %v11437_v11 = vpop.f32.mrf.mxu1 }
 0x1a5   : > { %v11429_v3 = vadd.f32 %v9340_v12, %v1782_v2  ;;  %v11432_v58 = vadd.f32 %v1638_v51, %v11223_v38  ;;  %v3754_v38 = vld [vmem:[#allocation2 + $0x9a] sm:$0xff] }
 0x1a6   : > { %9589 = vmatmul.mubr.msk.f32.gmra.mxu0 %vm272_vm0, %v3750_v21  ;;  %v9293_v10 = vpop.f32.mrf.mxu0  ;;  %v4300_v21 = vld [vmem:[%s13492_s4] sm:$0xff]  ;;  %v9346_v12 = vpop.f32.mrf.mxu1 }
 0x1a7   : > { %9591 = vmatprep.mubr.msk.f32.mxu0 %vm272_vm0, %v3751_v29  ;;  %v1784_v54 = vadd.f32 %v9293_v10, %v11230_v26  ;;  %v3755_v26 = vld [vmem:[#allocation2 + $0xaa] sm:$0xff]  ;;  %9630 = vmatprep.subr.mxu1 %v4300_v21  ;;  %v3756_v10 = vld [vmem:[#allocation2 + $0xb2] sm:$0xff] }
 0x1a8   : > { %v1648_v46 = vpop.f32.mrf.mxu0  ;;  %9631 = vmatpush3.msra.mxu1 %v4300_v21  ;;  %v11450_v51 = vpop.f32.mrf.mxu1 }
 0x1a9   : > { %v11439_v45 = vadd.f32 %v9343_v22, %v1784_v54  ;;  %v11442_v13 = vadd.f32 %v1648_v46, %v11237_v44  ;;  %v3757_v54 = vld [vmem:[#allocation2 + $0xc2] sm:$0xff] }
 0x1aa   : > { %9592 = vmatmul.mubr.msk.f32.gmra.mxu0 %vm272_vm0, %v3752_v32  ;;  %v9296_v6 = vpop.f32.mrf.mxu0 }
 0x1ab   : > { %9594 = vmatprep.mubr.msk.f32.mxu0 %vm272_vm0, %v3753_v53  ;;  %v1786_v29 = vadd.f32 %v9296_v6, %v11244_v17  ;;  %v9349_v53 = vpop.f32.mrf.mxu1 }
 0x1ac   : > { %v1658_v2 = vpop.f32.mrf.mxu0 }
 0x1ad   : > { %v11452_v44 = vadd.f32 %v9346_v12, %v1786_v29  ;;  %v11455_v32 = vadd.f32 %v1658_v2, %v11251_v50  ;;  %v3758_v50 = vld [vmem:[#allocation2 + $0xca] sm:$0xff]  ;;  %v3759_v29 = vld [vmem:[#allocation2 + $0xda] sm:$0xff] }
 0x1ae   : > { %9595 = vmatmul.mubr.msk.f32.gmra.mxu0 %vm272_vm0, %v3754_v38  ;;  %v9299_v22 = vpop.f32.mrf.mxu0  ;;  %v11460_v38 = vpop.f32.mrf.mxu1 }
 0x1af   : > { %9597 = vmatprep.mubr.msk.f32.mxu0 %vm272_vm0, %v3755_v26  ;;  %v1788_v46 = vadd.f32 %v9299_v22, %v11258_v57 }
 0x1b0   : > { %v1668_v17 = vpop.f32.mrf.mxu0  ;;  %v9352_v26 = vpop.f32.mrf.mxu1 }
 0x1b1   : > { %v11462_v21 = vadd.f32 %v9349_v53, %v1788_v46  ;;  %v11465_v6 = vadd.f32 %v1668_v17, %v11265_v56  ;;  %v3760_v56 = vld [vmem:[#allocation2 + $0xe2] sm:$0xff]  ;;  %v3761_v17 = vld [vmem:[#allocation2 + $0xf2] sm:$0xff] }
 0x1b2   : > { %9598 = vmatmul.mubr.msk.f32.gmra.mxu0 %vm272_vm0, %v3756_v10  ;;  %v9302_v12 = vpop.f32.mrf.mxu0  ;;  %v11470_v10 = vpop.f32.mrf.mxu1 }
 0x1b3   : > { %9600 = vmatprep.mubr.msk.f32.mxu0 %vm272_vm0, %v3757_v54  ;;  %v1790_v2 = vadd.f32 %v9302_v12, %v11272_v14  ;;  %13625 = vst [vmem:[#allocation27_spill] sm:$0xff] %v11470_v10 }
 0x1b4   : > { %v1678_v57 = vpop.f32.mrf.mxu0  ;;  %v9355_v46 = vpop.f32.mrf.mxu1 }
 0x1b5   : > { %v11472_v22 = vadd.f32 %v9352_v26, %v1790_v2  ;;  %v11475_v53 = vadd.f32 %v1678_v57, %v11279_v62  ;;  %v3762_v2 = vld [vmem:[#allocation2 + $0xfa] sm:$0xff] }
 0x1b6   : > { %9601 = vmatmul.mubr.msk.f32.gmra.mxu0 %vm272_vm0, %v3758_v50  ;;  %v1019_v50 = vadd.f32 %v10885_v35, %v11300_v9 }
 0x1b7   : > { %9603 = vmatprep.mubr.msk.f32.mxu0 %vm272_vm0, %v3759_v29  ;;  %v11482_v29 = vpop.f32.mrf.mxu1 }
 0x1b8   : > { %13626 = vst [vmem:[#allocation29_spill] sm:$0xff] %v11482_v29  ;;  %v1406_v35 = vadd.f32 %v11302_v23, %v1019_v50 }
 0x1b9   : > { %v9358_v10 = vpop.f32.mrf.mxu1 }
 0x1ba   : > { %v9305_v54 = vpop.f32.mrf.mxu0  ;;  %9604 = vmatmul.mubr.msk.f32.gmra.mxu0 %vm272_vm0, %v3760_v56  ;;  %v3763_v56 = vld [vmem:[#allocation2 + $0x10a] sm:$0xff] }
 0x1bb   : > { %v1792_v14 = vadd.f32 %v9305_v54, %v11286_v61  ;;  %9606 = vmatprep.mubr.msk.f32.mxu0 %vm272_vm0, %v3761_v17  ;;  %v11493_v54 = vpop.f32.mrf.mxu1 }
 0x1bc   : > { %v1688_v12 = vpop.f32.mrf.mxu0  ;;  %13628 = vst [vmem:[#allocation32_spill] sm:$0xff] %v11493_v54 }
 0x1bd   : > { %v11484_v26 = vadd.f32 %v9355_v46, %v1792_v14  ;;  %v11487_v62 = vadd.f32 %v1688_v12, %v11293_v4  ;;  %v3764_v4 = vld [vmem:[#allocation2 + $0x112] sm:$0xff]  ;;  %v9361_v12 = vpop.f32.mrf.mxu1 }
 0x1be   : > { %v9308_v57 = vpop.f32.mrf.mxu0  ;;  %9607 = vmatmul.mubr.msk.f32.gmra.mxu0 %vm272_vm0, %v3762_v2  ;;  %v3765_v2 = vld [vmem:[#allocation2 + $0x122] sm:$0xff] }
 0x1bf   : > { %13627 = vst [vmem:[#allocation31_spill] sm:$0xff] %v11487_v62  ;;  %v1794_v61 = vadd.f32 %v9308_v57, %v11304_v33  ;;  %9609 = vmatprep.mubr.msk.f32.mxu0 %vm272_vm0, %v3763_v56  ;;  %v11504_v33 = vpop.f32.mrf.mxu1 }
 0x1c0   : > { %v1698_v9 = vpop.f32.mrf.mxu0  ;;  %13630 = vst [vmem:[#allocation5_spill] sm:$0xff] %v11504_v33 }
 0x1c1   : > { %v11495_v46 = vadd.f32 %v9358_v10, %v1794_v61  ;;  %v11497_v17 = vadd.f32 %v1698_v9, %v1406_v35  ;;  %v3766_v10 = vld [vmem:[#allocation2 + $0x12a] sm:$0xff]  ;;  %v9364_v56 = vpop.f32.mrf.mxu1  ;;  %v3767_v35 = vld [vmem:[#allocation2 + $0x13a] sm:$0xff] }
 0x1c2   : > { %v9311_v14 = vpop.f32.mrf.mxu0  ;;  %9610 = vmatmul.mubr.msk.f32.gmra.mxu0 %vm272_vm0, %v3764_v4 }
 0x1c3   : > { %13629 = vst [vmem:[#allocation4_spill] sm:$0xff] %v11497_v17  ;;  %v1796_v29 = vadd.f32 %v9311_v14, %v11319_v0  ;;  %9612 = vmatprep.mubr.msk.f32.mxu0 %vm272_vm0, %v3765_v2  ;;  %v11513_v0 = vpop.f32.mrf.mxu1  ;;  %v3768_v14 = vld [vmem:[#allocation2 + $0x142] sm:$0xff] }
 0x1c4   : > { %v11502_v23 = vpop.f32.mrf.mxu0  ;;  %13631 = vst [vmem:[#allocation6_spill] sm:$0xff] %v11513_v0 }
 0x1c5   : > { %v11506_v50 = vadd.f32 %v9361_v12, %v1796_v29  ;;  %v9367_v29 = vpop.f32.mrf.mxu1  ;;  %v3769_v12 = vld [vmem:[#allocation2 + $0x152] sm:$0xff] }
 0x1c6   : > { %v9314_v57 = vpop.f32.mrf.mxu0  ;;  %9613 = vmatmul.mubr.msk.f32.gmra.mxu0 %vm272_vm0, %v3766_v10 }
 0x1c7   : > { %v1798_v61 = vadd.f32 %v9314_v57, %v11334_v15  ;;  %9615 = vmatprep.mubr.msk.f32.mxu0 %vm272_vm0, %v3767_v35  ;;  %v11522_v15 = vpop.f32.mrf.mxu1  ;;  %v3770_v35 = vld [vmem:[#allocation2 + $0x15a] sm:$0xff] }
 0x1c8   : > { %v11511_v9 = vpop.f32.mrf.mxu0  ;;  %13632 = vst [vmem:[#allocation7_spill] sm:$0xff] %v11522_v15 }
 0x1c9   : > { %v11515_v4 = vadd.f32 %v9364_v56, %v1798_v61  ;;  %v9370_v56 = vpop.f32.mrf.mxu1  ;;  %v3771_v61 = vld [vmem:[#allocation2 + $0x16a] sm:$0xff] }
 0x1ca   : > { %v9317_v2 = vpop.f32.mrf.mxu0  ;;  %9616 = vmatmul.mubr.msk.f32.gmra.mxu0 %vm272_vm0, %v3768_v14 }
 0x1cb   : > { %v1800_v33 = vadd.f32 %v9317_v2, %v11349_v19  ;;  %9618 = vmatprep.mubr.msk.f32.mxu0 %vm272_vm0, %v3769_v12  ;;  %v11531_v19 = vpop.f32.mrf.mxu1  ;;  %v3772_v12 = vld [vmem:[#allocation2 + $0x172] sm:$0xff] }
 0x1cc   : > { %v11520_v10 = vpop.f32.mrf.mxu0  ;;  %13633 = vst [vmem:[#allocation8_spill] sm:$0xff] %v11531_v19 }
 0x1cd   : > { %v11524_v57 = vadd.f32 %v9367_v29, %v1800_v33  ;;  %v9373_v33 = vpop.f32.mrf.mxu1 }
 0x1ce   : > { %v9320_v0 = vpop.f32.mrf.mxu0  ;;  %9619 = vmatmul.mubr.msk.f32.gmra.mxu0 %vm272_vm0, %v3770_v35 }
 0x1cf   : > { %v1802_v54 = vadd.f32 %v9320_v0, %v11364_v20  ;;  %9621 = vmatprep.mubr.msk.f32.mxu0 %vm272_vm0, %v3771_v61  ;;  %v11541_v20 = vpop.f32.mrf.mxu1  ;;  %v3775_v0 = vld [vmem:[#allocation2 + $0x19a] sm:$0xff] }
 0x1d0   : > { %v11529_v14 = vpop.f32.mrf.mxu0  ;;  %13635 = vst [vmem:[#allocation10_spill] sm:$0xff] %v11541_v20 }
 0x1d1   : > { %v11533_v2 = vadd.f32 %v9370_v56, %v1802_v54  ;;  %v9376_v54 = vpop.f32.mrf.mxu1 }
 0x1d2   : > { %v9323_v15 = vpop.f32.mrf.mxu0  ;;  %9622 = vmatmul.mubr.msk.f32.gmra.mxu0 %vm272_vm0, %v3772_v12 }
 0x1d3   : > { %v1804_v29 = vadd.f32 %v9323_v15, %v11379_v30  ;;  %9624 = vmatprep.mubr.msk.f32.mxu0 %vm272_vm0, %v11158_v41  ;;  %v3776_v30 = vld [vmem:[#allocation2 + $0x1a2] sm:$0xff]  ;;  %v11551_v41 = vpop.f32.mrf.mxu1 }
 0x1d4   : > { %v11539_v35 = vpop.f32.mrf.mxu0  ;;  %13637 = vst [vmem:[#allocation12_spill] sm:$0xff] %v11551_v41 }
 0x1d5   : > { %13634 = vst [vmem:[#allocation9_spill] sm:$0xff] %v11539_v35  ;;  %v11543_v61 = vadd.f32 %v9373_v33, %v1804_v29  ;;  %v9379_v17 = vpop.f32.mrf.mxu1  ;;  %v4268_v35 = vld [vmem:[#allocation3] sm:$0xff] }
 0x1d6   : > { %v9326_v19 = vpop.f32.mrf.mxu0  ;;  %9625 = vmatmul.mubr.msk.f32.gmra.mxu0 %vm272_vm0, %v11170_v55  ;;  %9632 = vmatprep.mubr.msk.f32.mxu1 %vm272_vm0, %v4268_v35  ;;  %v4655_v35 = vld [vmem:[#allocation3 + $0x9] sm:$0xff] }
 0x1d7   : > { %v1806_v56 = vadd.f32 %v9326_v19, %v11392_v28  ;;  %9627 = vmatprep.mubr.msk.f32.mxu0 %vm272_vm0, %v3775_v0  ;;  %v11559_v55 = vpop.f32.mrf.mxu1 }
 0x1d8   : > { %v11549_v15 = vpop.f32.mrf.mxu0  ;;  %13639 = vst [vmem:[#allocation14_spill] sm:$0xff] %v11559_v55 }
 0x1d9   : > { %13636 = vst [vmem:[#allocation11_spill] sm:$0xff] %v11549_v15  ;;  %v11553_v12 = vadd.f32 %v9376_v54, %v1806_v56  ;;  %v11563_v0 = vpop.f32.mrf.mxu1 }
 0x1da   : > { %v9329_v20 = vpop.f32.mrf.mxu0  ;;  %9628 = vmatmul.mubr.msk.f32.gmra.mxu0 %vm272_vm0, %v3776_v30 }
 0x1db   : > { %v1808_v33 = vadd.f32 %v9329_v20, %v11403_v40  ;;  %v11570_v56 = vpop.f32.mrf.mxu1 }
 0x1dc   : > { %v11557_v29 = vpop.f32.mrf.mxu0 }
 0x1dd   : > { %13638 = vst [vmem:[#allocation13_spill] sm:$0xff] %v11557_v29  ;;  %v11561_v28 = vadd.f32 %v9379_v17, %v1808_v33  ;;  %v11572_v30 = vpop.f32.mrf.mxu1 }
 0x1de   : > { %v9384_v19 = vpop.f32.mrf.mxu0  ;;  %13640 = vst [vmem:[#allocation15_spill] sm:$0xff] %v11572_v30 }
 0x1df   : > { %v11566_v15 = vadd.f32 %v9384_v19, %v11412_v5  ;;  %v11579_v17 = vpop.f32.mrf.mxu1 }
 0x1e0   : > { %v11568_v54 = vpop.f32.mrf.mxu0 }
 0x1e1   : > { %v11581_v55 = vpop.f32.mrf.mxu1 }
 0x1e2   : > { %v9387_v41 = vpop.f32.mrf.mxu0  ;;  %13641 = vst [vmem:[#allocation16_spill] sm:$0xff] %v11581_v55 }
 0x1e3   : > { %v11575_v40 = vadd.f32 %v9387_v41, %v11419_v37  ;;  %v11588_v29 = vpop.f32.mrf.mxu1  ;;  %v8318_v37 = vld [vmem:[%s13492_s4 + $0x8] sm:$0xff]  ;;  %v4269_v41 = vld [vmem:[#allocation3 + $0x8] sm:$0xff] }
 0x1e4   : > { %v11577_v20 = vpop.f32.mrf.mxu0  ;;  %13643 = vst [vmem:[#allocation18_spill] sm:$0xff] %v11588_v29  ;;  %9680 = vmatprep.subr.mxu0 %v8318_v37  ;;  %9633 = vmatmul.mubr.msk.f32.vlgmr.msra.gmra.mxu1 %vm272_vm0, %v4269_v41 }
 0x1e5   : > { %v11590_v30 = vpop.f32.mrf.mxu1  ;;  %9681 = vmatpush3.msra.mxu0 %v8318_v37 }
 0x1e6   : > { %v9390_v33 = vpop.f32.mrf.mxu0  ;;  %13644 = vst [vmem:[#allocation19_spill] sm:$0xff] %v11590_v30 }
 0x1e7   : > { %v11584_v5 = vadd.f32 %v9390_v33, %v11429_v3  ;;  %v4654_v3 = vld [vmem:[#allocation3 + $0x1] sm:$0xff]  ;;  %v11602_v29 = vpop.f32.mrf.mxu1 }
 0x1e8   : > { %v11586_v19 = vpop.f32.mrf.mxu0  ;;  %13647 = vst [vmem:[#allocation22_spill] sm:$0xff] %v11602_v29  ;;  %9682 = vmatprep.mubr.msk.f32.mxu0 %vm272_vm0, %v4654_v3  ;;  %v8351_v29 = vld [vmem:[%s13492_s4 + $0x10] sm:$0xff] }
 0x1e9   : > { %13642 = vst [vmem:[#allocation17_spill] sm:$0xff] %v11584_v5  ;;  %9683 = vmatmul.mubr.msk.f32.vlgmr.msra.gmra.mxu0 %vm272_vm0, %v4655_v35  ;;  %v11606_v5 = vpop.f32.mrf.mxu1  ;;  %9730 = vmatprep.subr.mxu1 %v8351_v29 }
 0x1ea   : > { %v9393_v62 = vpop.f32.mrf.mxu0  ;;  %13648 = vst [vmem:[#allocation23_spill] sm:$0xff] %v11606_v5  ;;  %9731 = vmatpush3.msra.mxu1 %v8351_v29 }
 0x1eb   : > { %v11597_v55 = vadd.f32 %v9393_v62, %v11439_v45  ;;  %v11613_v41 = vpop.f32.mrf.mxu1 }
 0x1ec   : > { %v11600_v33 = vpop.f32.mrf.mxu0  ;;  %13651 = vst [vmem:[#allocation26_spill] sm:$0xff] %v11613_v41 }
 0x1ed   : > { %13645 = vst [vmem:[#allocation20_spill] sm:$0xff] %v11597_v55  ;;  %13646 = vst [vmem:[#allocation21_spill] sm:$0xff] %v11600_v33  ;;  %v11618_v3 = vpop.f32.mrf.mxu1 }
 0x1ee   : > { %v9396_v30 = vpop.f32.mrf.mxu0  ;;  %13652 = vst [vmem:[#allocation28_spill] sm:$0xff] %v11618_v3 }
 0x1ef   : > { %v11609_v45 = vadd.f32 %v9396_v30, %v11452_v44  ;;  %v11625_v44 = vpop.f32.mrf.mxu1 }
 0x1f0   : > { %v11611_v62 = vpop.f32.mrf.mxu0  ;;  %13655 = vst [vmem:[#allocation33_spill] sm:$0xff] %v11625_v44 }
 0x1f1   : > { %13649 = vst [vmem:[#allocation24_spill] sm:$0xff] %v11609_v45  ;;  %13650 = vst [vmem:[#allocation25_spill] sm:$0xff] %v11611_v62  ;;  %v11627_v45 = vpop.f32.mrf.mxu1 }
 0x1f2   : > { %v9399_v37 = vpop.f32.mrf.mxu0  ;;  %13656 = vst [vmem:[#allocation35_spill] sm:$0xff] %v11627_v45 }
 0x1f3   : > { %v11621_v35 = vadd.f32 %v9399_v37, %v11462_v21  ;;  %v11634_v55 = vpop.f32.mrf.mxu1 }
 0x1f4   : > { %v11623_v5 = vpop.f32.mrf.mxu0  ;;  %13659 = vst [vmem:[#allocation38_spill] sm:$0xff] %v11634_v55 }
 0x1f5   : > { %13653 = vst [vmem:[#allocation30_spill] sm:$0xff] %v11621_v35  ;;  %13654 = vst [vmem:[#allocation34_spill] sm:$0xff] %v11623_v5  ;;  %v11636_v3 = vpop.f32.mrf.mxu1 }
 0x1f6   : > { %v9402_v30 = vpop.f32.mrf.mxu0  ;;  %13660 = vst [vmem:[#allocation39_spill] sm:$0xff] %v11636_v3 }
 0x1f7   : > { %v11630_v41 = vadd.f32 %v9402_v30, %v11472_v22  ;;  %v11643_v37 = vpop.f32.mrf.mxu1 }
 0x1f8   : > { %v11632_v62 = vpop.f32.mrf.mxu0  ;;  %13663 = vst [vmem:[#allocation42_spill] sm:$0xff] %v11643_v37 }
 0x1f9   : > { %13657 = vst [vmem:[#allocation36_spill] sm:$0xff] %v11630_v41  ;;  %13658 = vst [vmem:[#allocation37_spill] sm:$0xff] %v11632_v62  ;;  %v11645_v35 = vpop.f32.mrf.mxu1 }
 0x1fa   : > { %v9405_v33 = vpop.f32.mrf.mxu0  ;;  %13664 = vst [vmem:[#allocation43_spill] sm:$0xff] %v11645_v35 }
 0x1fb   : > { %v11639_v21 = vadd.f32 %v9405_v33, %v11484_v26  ;;  %v11652_v45 = vpop.f32.mrf.mxu1 }
 0x1fc   : > { %v11641_v29 = vpop.f32.mrf.mxu0  ;;  %13667 = vst [vmem:[#allocation46_spill] sm:$0xff] %v11652_v45 }
 0x1fd   : > { %13661 = vst [vmem:[#allocation40_spill] sm:$0xff] %v11639_v21  ;;  %13662 = vst [vmem:[#allocation41_spill] sm:$0xff] %v11641_v29  ;;  %v11654_v41 = vpop.f32.mrf.mxu1 }
 0x1fe   : > { %v9408_v44 = vpop.f32.mrf.mxu0  ;;  %13668 = vst [vmem:[#allocation47_spill] sm:$0xff] %v11654_v41 }
 0x1ff   : > { %v11648_v22 = vadd.f32 %v9408_v44, %v11495_v46  ;;  %v11661_v3 = vpop.f32.mrf.mxu1 }
 0x200   : > { %v11650_v30 = vpop.f32.mrf.mxu0  ;;  %13671 = vst [vmem:[#allocation50_spill] sm:$0xff] %v11661_v3 }
 0x201   : > { %13665 = vst [vmem:[#allocation44_spill] sm:$0xff] %v11648_v22  ;;  %13666 = vst [vmem:[#allocation45_spill] sm:$0xff] %v11650_v30  ;;  %v11663_v21 = vpop.f32.mrf.mxu1 }
 0x202   : > { %v9411_v55 = vpop.f32.mrf.mxu0  ;;  %13672 = vst [vmem:[#allocation51_spill] sm:$0xff] %v11663_v21 }
 0x203   : > { %v11657_v26 = vadd.f32 %v9411_v55, %v11506_v50  ;;  %v11670_v35 = vpop.f32.mrf.mxu1 }
 0x204   : > { %v11659_v33 = vpop.f32.mrf.mxu0  ;;  %13675 = vst [vmem:[#allocation54_spill] sm:$0xff] %v11670_v35 }
 0x205   : > { %13669 = vst [vmem:[#allocation48_spill] sm:$0xff] %v11657_v26  ;;  %13670 = vst [vmem:[#allocation49_spill] sm:$0xff] %v11659_v33  ;;  %v11672_v22 = vpop.f32.mrf.mxu1 }
 0x206   : > { %v9414_v37 = vpop.f32.mrf.mxu0  ;;  %13676 = vst [vmem:[#allocation55_spill] sm:$0xff] %v11672_v22 }
 0x207   : > { %v11666_v46 = vadd.f32 %v9414_v37, %v11515_v4  ;;  %v11679_v41 = vpop.f32.mrf.mxu1 }
 0x208   : > { %v11668_v44 = vpop.f32.mrf.mxu0  ;;  %13679 = vst [vmem:[#allocation58_spill] sm:$0xff] %v11679_v41 }
 0x209   : > { %13673 = vst [vmem:[#allocation52_spill] sm:$0xff] %v11666_v46  ;;  %13674 = vst [vmem:[#allocation53_spill] sm:$0xff] %v11668_v44  ;;  %v11681_v26 = vpop.f32.mrf.mxu1 }
 0x20a   : > { %v9417_v45 = vpop.f32.mrf.mxu0  ;;  %13680 = vst [vmem:[#allocation59_spill] sm:$0xff] %v11681_v26 }
 0x20b   : > { %v11675_v50 = vadd.f32 %v9417_v45, %v11524_v57  ;;  %v11688_v21 = vpop.f32.mrf.mxu1 }
 0x20c   : > { %v11677_v55 = vpop.f32.mrf.mxu0  ;;  %13683 = vst [vmem:[#allocation62_spill] sm:$0xff] %v11688_v21 }
 0x20d   : > { %13677 = vst [vmem:[#allocation56_spill] sm:$0xff] %v11675_v50  ;;  %13678 = vst [vmem:[#allocation57_spill] sm:$0xff] %v11677_v55  ;;  %v11690_v46 = vpop.f32.mrf.mxu1 }
 0x20e   : > { %v9420_v3 = vpop.f32.mrf.mxu0  ;;  %13684 = vst [vmem:[#allocation63_spill] sm:$0xff] %v11690_v46 }
 0x20f   : > { %v11684_v4 = vadd.f32 %v9420_v3, %v11533_v2  ;;  %v11697_v22 = vpop.f32.mrf.mxu1 }
 0x210   : > { %v11686_v37 = vpop.f32.mrf.mxu0  ;;  %13687 = vst [vmem:[#allocation66_spill] sm:$0xff] %v11697_v22 }
 0x211   : > { %13681 = vst [vmem:[#allocation60_spill] sm:$0xff] %v11684_v4  ;;  %13682 = vst [vmem:[#allocation61_spill] sm:$0xff] %v11686_v37  ;;  %v11699_v50 = vpop.f32.mrf.mxu1 }
 0x212   : > { %v9423_v35 = vpop.f32.mrf.mxu0  ;;  %13688 = vst [vmem:[#allocation67_spill] sm:$0xff] %v11699_v50 }
 0x213   : > { %v11693_v57 = vadd.f32 %v9423_v35, %v11543_v61  ;;  %v11706_v26 = vpop.f32.mrf.mxu1 }
 0x214   : > { %v11695_v45 = vpop.f32.mrf.mxu0  ;;  %13691 = vst [vmem:[#allocation70_spill] sm:$0xff] %v11706_v26 }
 0x215   : > { %13685 = vst [vmem:[#allocation64_spill] sm:$0xff] %v11693_v57  ;;  %13686 = vst [vmem:[#allocation65_spill] sm:$0xff] %v11695_v45  ;;  %v11708_v4 = vpop.f32.mrf.mxu1 }
 0x216   : > { %v9426_v41 = vpop.f32.mrf.mxu0  ;;  %13692 = vst [vmem:[#allocation71_spill] sm:$0xff] %v11708_v4 }
 0x217   : > { %v11702_v2 = vadd.f32 %v9426_v41, %v11553_v12  ;;  %v11715_v46 = vpop.f32.mrf.mxu1 }
 0x218   : > { %v11704_v3 = vpop.f32.mrf.mxu0  ;;  %13695 = vst [vmem:[#allocation74_spill] sm:$0xff] %v11715_v46 }
 0x219   : > { %13689 = vst [vmem:[#allocation68_spill] sm:$0xff] %v11702_v2  ;;  %13690 = vst [vmem:[#allocation69_spill] sm:$0xff] %v11704_v3  ;;  %v11719_v50 = vpop.f32.mrf.mxu1 }
 0x21a   : > { %v9429_v21 = vpop.f32.mrf.mxu0 }
 0x21b   : > { %v11711_v61 = vadd.f32 %v9429_v21, %v11561_v28  ;;  %v11723_v41 = vpop.f32.mrf.mxu1  ;;  %v8384_v21 = vld [vmem:[%s13492_s4 + $0x18] sm:$0xff] }
 0x21c   : > { %v11713_v35 = vpop.f32.mrf.mxu0  ;;  %9780 = vmatprep.subr.mxu0 %v8384_v21 }
 0x21d   : > { %13693 = vst [vmem:[#allocation72_spill] sm:$0xff] %v11711_v61  ;;  %13694 = vst [vmem:[#allocation73_spill] sm:$0xff] %v11713_v35  ;;  %v11729_v4 = vpop.f32.mrf.mxu1  ;;  %v8417_v61 = vld [vmem:[%s13492_s4 + $0x20] sm:$0xff]  ;;  %9781 = vmatpush3.msra.mxu0 %v8384_v21 }
 0x21e   : > { %v11717_v22 = vpop.f32.mrf.mxu0  ;;  %9830 = vmatprep.subr.mxu1 %v8417_v61 }
 0x21f   : > { %v11741_v35 = vpop.f32.mrf.mxu1 }
 0x220   : > { %v11721_v12 = vpop.f32.mrf.mxu0 }
 0x221   : > { %v11747_v45 = vpop.f32.mrf.mxu1 }
 0x222   : > { %v11725_v2 = vpop.f32.mrf.mxu0 }
 0x223   : > { %v11753_v44 = vpop.f32.mrf.mxu1 }
 0x224   : > { %v11727_v26 = vpop.f32.mrf.mxu0  ;;  %13700 = vst [vmem:[#allocation79_spill] sm:$0xff] %v11753_v44 }
 0x225   : > { %v11759_v29 = vpop.f32.mrf.mxu1 }
 0x226   : > { %v11731_v28 = vpop.f32.mrf.mxu0  ;;  %13703 = vst [vmem:[#allocation82_spill] sm:$0xff] %v11759_v29 }
 0x227   : > { %v11765_v62 = vpop.f32.mrf.mxu1 }
 0x228   : > { %v11736_v46 = vpop.f32.mrf.mxu0  ;;  %13706 = vst [vmem:[#allocation85_spill] sm:$0xff] %v11765_v62 }
 0x22a   : > { %v11743_v3 = vpop.f32.mrf.mxu0 }
 0x22b   : > { %13696 = vst [vmem:[#allocation75_spill] sm:$0xff] %v11743_v3 }
 0x22c   : > { %v11745_v57 = vpop.f32.mrf.mxu0 }
 0x22d   : > { %13697 = vst [vmem:[#allocation76_spill] sm:$0xff] %v11745_v57 }
 0x22e   : > { %v11749_v37 = vpop.f32.mrf.mxu0 }
 0x22f   : > { %13698 = vst [vmem:[#allocation77_spill] sm:$0xff] %v11749_v37  ;;  %v11771_v37 = vpop.f32.mrf.mxu1 }
 0x230   : > { %v11751_v55 = vpop.f32.mrf.mxu0  ;;  %13709 = vst [vmem:[#allocation88_spill] sm:$0xff] %v11771_v37 }
 0x231   : > { %13699 = vst [vmem:[#allocation78_spill] sm:$0xff] %v11751_v55 }
 0x232   : > { %v11755_v33 = vpop.f32.mrf.mxu0 }
 0x233   : > { %13701 = vst [vmem:[#allocation80_spill] sm:$0xff] %v11755_v33  ;;  %v11777_v33 = vpop.f32.mrf.mxu1 }
 0x234   : > { %v11757_v30 = vpop.f32.mrf.mxu0  ;;  %13712 = vst [vmem:[#allocation91_spill] sm:$0xff] %v11777_v33 }
 0x235   : > { %13702 = vst [vmem:[#allocation81_spill] sm:$0xff] %v11757_v30 }
 0x236   : > { %v11761_v21 = vpop.f32.mrf.mxu0 }
 0x237   : > { %13704 = vst [vmem:[#allocation83_spill] sm:$0xff] %v11761_v21  ;;  %v11783_v21 = vpop.f32.mrf.mxu1 }
 0x238   : > { %v11763_v61 = vpop.f32.mrf.mxu0  ;;  %13715 = vst [vmem:[#allocation94_spill] sm:$0xff] %v11783_v21 }
 0x239   : > { %13705 = vst [vmem:[#allocation84_spill] sm:$0xff] %v11763_v61 }
 0x23a   : > { %v11767_v5 = vpop.f32.mrf.mxu0 }
 0x23b   : > { %13707 = vst [vmem:[#allocation86_spill] sm:$0xff] %v11767_v5  ;;  %v11793_v5 = vpop.f32.mrf.mxu1 }
 0x23c   : > { %v11769_v57 = vpop.f32.mrf.mxu0  ;;  %13718 = vst [vmem:[#allocation97_spill] sm:$0xff] %v11793_v5 }
 0x23d   : > { %13708 = vst [vmem:[#allocation87_spill] sm:$0xff] %v11769_v57  ;;  %v10091_v57 = vld [vmem:[%s13491_s3] ss:$0 sm:$0xff] }
 0x23e   : > { %v11773_v55 = vpop.f32.mrf.mxu0  ;;  %v1023_v5 = vadd.f32 %v10091_v57, %v11330_v34 }
 0x23f   : > { %13710 = vst [vmem:[#allocation89_spill] sm:$0xff] %v11773_v55  ;;  %v1003_v55 = vadd.f32 %v10091_v57, %v11189_v8  ;;  %v1021_v8 = vadd.f32 %v10091_v57, %v11315_v18 }
 0x240   : > { %v11775_v44 = vpop.f32.mrf.mxu0 }
 0x241   : > { %13711 = vst [vmem:[#allocation90_spill] sm:$0xff] %v11775_v44  ;;  %v1408_v34 = vadd.f32 %v11317_v63, %v1021_v8  ;;  %v13730_v8 = vld [vmem:[#allocation5_spill] sm:$0xff] }
 0x242   : > { %v11779_v30 = vpop.f32.mrf.mxu0 }
 0x243   : > { %13713 = vst [vmem:[#allocation92_spill] sm:$0xff] %v11779_v30  ;;  %v11800_v30 = vpop.f32.mrf.mxu1 }
 0x244   : > { %v11781_v29 = vpop.f32.mrf.mxu0 }
 0x245   : > { %13714 = vst [vmem:[#allocation93_spill] sm:$0xff] %v11781_v29  ;;  %v1390_v29 = vadd.f32 %v11184_v1, %v1003_v55  ;;  %v11807_v37 = vpop.f32.mrf.mxu1  ;;  %v1027_v1 = vadd.f32 %v10091_v57, %v11360_v16  ;;  %v1029_v55 = vadd.f32 %v10091_v57, %v11375_v31  ;;  %v2166_v16 = vadd.f32 %v11417_v43, %v11422_v27 }
 0x246   : > { %v11785_v61 = vpop.f32.mrf.mxu0 }
 0x247   : > { %13716 = vst [vmem:[#allocation95_spill] sm:$0xff] %v11785_v61  ;;  %v2553_v43 = vadd.f32 %v11577_v20, %v2166_v16  ;;  %v13724_v20 = vld [vmem:[#allocation15_spill] sm:$0xff] }
 0x248   : > { %v11787_v62 = vpop.f32.mrf.mxu0 }
 0x249   : > { %13717 = vst [vmem:[#allocation96_spill] sm:$0xff] %v11787_v62  ;;  %v1777_v62 = vadd.f32 %v11408_v25, %v1390_v29  ;;  %v1031_v25 = vadd.f32 %v10091_v57, %v11388_v36  ;;  %v1033_v29 = vadd.f32 %v10091_v57, %v11399_v47  ;;  %v1414_v36 = vadd.f32 %v11362_v48, %v1027_v1 }
 0x24a   : > { %v11795_v44 = vpop.f32.mrf.mxu0  ;;  %v1416_v47 = vadd.f32 %v11377_v39, %v1029_v55  ;;  %v1795_v48 = vadd.f32 %v11502_v23, %v1408_v34  ;;  %v13734_v34 = vld [vmem:[#allocation16_spill] sm:$0xff] }
 0x24b   : > { %13719 = vst [vmem:[#allocation98_spill] sm:$0xff] %v11795_v44  ;;  %v11822_v44 = vpop.f32.mrf.mxu1  ;;  %v11837_v63 = vadd.f32 %v11401_v7, %v1033_v29  ;;  %v2172_v7 = vadd.f32 %v11450_v51, %v11455_v32  ;;  %v13725_v32 = vld [vmem:[#allocation31_spill] sm:$0xff] }
 0x24c   : > { %v11797_v33 = vpop.f32.mrf.mxu0 }
 0x24d   : > { %13720 = vst [vmem:[#allocation99_spill] sm:$0xff] %v11797_v33  ;;  %v1025_v33 = vadd.f32 %v10091_v57, %v11345_v52  ;;  %v1410_v52 = vadd.f32 %v11332_v60, %v1023_v5  ;;  %v2168_v60 = vadd.f32 %v11427_v59, %v11432_v58  ;;  %v11855_v59 = vadd.f32 %v11460_v38, %v11465_v6  ;;  %v13723_v58 = vld [vmem:[#allocation27_spill] sm:$0xff]  ;;  %v13726_v38 = vld [vmem:[#allocation29_spill] sm:$0xff] }
 0x24e   : > { %v11802_v21 = vpop.f32.mrf.mxu0  ;;  %v2941_v5 = vadd.f32 %v13724_v20, %v11575_v40  ;;  %v11871_v6 = vadd.f32 %v13726_v38, %v13725_v32  ;;  %v11883_v40 = vadd.f32 %v13730_v8, %v1795_v48  ;;  %v13740_v32 = vld [vmem:[#allocation12_spill] sm:$0xff]  ;;  %v13742_v38 = vld [vmem:[#allocation19_spill] sm:$0xff]  ;;  %v13744_v8 = vld [vmem:[#allocation25_spill] sm:$0xff] }
 0x24f   : > { %13721 = vst [vmem:[#allocation100_spill] sm:$0xff] %v11802_v21  ;;  %v2164_v21 = vadd.f32 %v11410_v49, %v1777_v62  ;;  %v1412_v49 = vadd.f32 %v11347_v42, %v1025_v33  ;;  %v1418_v62 = vadd.f32 %v11390_v24, %v1031_v25  ;;  %v2170_v42 = vadd.f32 %v11437_v11, %v11442_v13  ;;  %v11849_v24 = vpop.f32.mrf.mxu1  ;;  %v13731_v25 = vld [vmem:[#allocation6_spill] sm:$0xff] }
 0x250   : > { %v11805_v61 = vpop.f32.mrf.mxu0  ;;  %v1797_v11 = vadd.f32 %v11511_v9, %v1410_v52  ;;  %v2940_v33 = vadd.f32 %v11579_v17, %v2553_v43  ;;  %v2555_v9 = vadd.f32 %v11586_v19, %v2168_v60  ;;  %v3329_v1 = vadd.f32 %v11725_v2, %v2941_v5  ;;  %v13732_v17 = vld [vmem:[#allocation11_spill] sm:$0xff]  ;;  %v13737_v43 = vld [vmem:[#allocation10_spill] sm:$0xff] }
 0x251   : > { %13722 = vst [vmem:[#allocation101_spill] sm:$0xff] %v11805_v61  ;;  %v2551_v18 = vadd.f32 %v11568_v54, %v2164_v21  ;;  %v2939_v54 = vadd.f32 %v11563_v0, %v11566_v15  ;;  %v11859_v0 = vadd.f32 %v13723_v58, %v11475_v53  ;;  %v1799_v23 = vadd.f32 %v11520_v10, %v1412_v49  ;;  %v13728_v10 = vld [vmem:[#allocation4_spill] sm:$0xff]  ;;  %v11887_v55 = vpop.f32.mrf.mxu1 }
 0x252   : > { %v11811_v3 = vpop.f32.mrf.mxu0  ;;  %v13729_v21 = vld [vmem:[#allocation32_spill] sm:$0xff]  ;;  %v11890_v29 = vadd.f32 %v13731_v25, %v1797_v11  ;;  %v1805_v19 = vadd.f32 %v13732_v17, %v1418_v62  ;;  %v3328_v16 = vadd.f32 %v11727_v26, %v2940_v33  ;;  %v3716_v20 = vadd.f32 %v11729_v4, %v3329_v1  ;;  %v13745_v25 = vld [vmem:[#allocation75_spill] sm:$0xff] }
 0x253   : > { %v2938_v39 = vadd.f32 %v11570_v56, %v2551_v18  ;;  %v3327_v15 = vadd.f32 %v11717_v22, %v2939_v54  ;;  %v1801_v56 = vadd.f32 %v11529_v14, %v1414_v36  ;;  %v13727_v22 = vld [vmem:[#allocation9_spill] sm:$0xff]  ;;  %v11880_v14 = vadd.f32 %v13729_v21, %v13728_v10  ;;  %v13735_v36 = vld [vmem:[#allocation7_spill] sm:$0xff]  ;;  %v13736_v54 = vld [vmem:[#allocation8_spill] sm:$0xff] }
 0x254   : > { %v11819_v61 = vpop.f32.mrf.mxu0  ;;  %v1803_v53 = vadd.f32 %v13727_v22, %v1416_v47  ;;  %v13733_v18 = vld [vmem:[#allocation17_spill] sm:$0xff]  ;;  %v11897_v47 = vadd.f32 %v13735_v36, %v1799_v23  ;;  %v11910_v23 = vpop.f32.mrf.mxu1  ;;  %v13743_v10 = vld [vmem:[#allocation22_spill] sm:$0xff]  ;;  %v13748_v36 = vld [vmem:[#allocation23_spill] sm:$0xff] }
 0x255   : > { %v3326_v51 = vadd.f32 %v11721_v12, %v2938_v39  ;;  %v3714_v12 = vadd.f32 %v11719_v50, %v3327_v15  ;;  %v2943_v52 = vadd.f32 %v13734_v34, %v13733_v18  ;;  %v11900_v50 = vadd.f32 %v13736_v54, %v1801_v56  ;;  %v13738_v39 = vld [vmem:[#allocation18_spill] sm:$0xff]  ;;  %v13739_v15 = vld [vmem:[#allocation21_spill] sm:$0xff] }
 0x256   : > { %v11828_v31 = vpop.f32.mrf.mxu0  ;;  %v11904_v48 = vadd.f32 %v13737_v43, %v1803_v53  ;;  %v2942_v62 = vadd.f32 %v13738_v39, %v2555_v9  ;;  %v2557_v58 = vadd.f32 %v13739_v15, %v2170_v42  ;;  %v3715_v53 = vadd.f32 %v11741_v35, %v3328_v16  ;;  %v11924_v18 = vpop.f32.mrf.mxu1 }
 0x257   : > { %v3713_v2 = vadd.f32 %v11723_v41, %v3326_v51  ;;  %v3331_v11 = vadd.f32 %v11731_v28, %v2943_v52  ;;  %v11913_v41 = vadd.f32 %v13740_v32, %v1805_v19  ;;  %v13741_v51 = vld [vmem:[#allocation20_spill] sm:$0xff]  ;;  %v13746_v52 = vld [vmem:[#allocation13_spill] sm:$0xff] }
 0x258   : > { %v11842_v27 = vpop.f32.mrf.mxu0  ;;  %v2945_v22 = vadd.f32 %v13742_v38, %v13741_v51  ;;  %v3330_v42 = vadd.f32 %v11736_v46, %v2942_v62  ;;  %v2944_v21 = vadd.f32 %v13743_v10, %v2557_v58  ;;  %v1807_v16 = vadd.f32 %v13746_v52, %v11837_v63  ;;  %v13751_v58 = vld [vmem:[#allocation26_spill] sm:$0xff]  ;;  %v11942_v38 = vld [vmem:[%s13492_s4 + $0x28] sm:$0xff] }
 0x259   : > { %v3718_v1 = vadd.f32 %v11747_v45, %v3331_v11  ;;  %v13750_v45 = vld [vmem:[#allocation76_spill] sm:$0xff]  ;;  %v13753_v63 = vld [vmem:[#allocation82_spill] sm:$0xff]  ;;  %9880 = vmatprep.subr.mxu0 %v11942_v38  ;;  %v13761_v52 = vld [vmem:[#allocation37_spill] sm:$0xff] }
 0x25a   : > { %v11862_v13 = vpop.f32.mrf.mxu0  ;;  %v3333_v17 = vadd.f32 %v13745_v25, %v2945_v22  ;;  %v11944_v22 = vpop.f32.mrf.mxu1 }
 0x25c   : > { %v11876_v57 = vpop.f32.mrf.mxu0 }
 0x25e   : > { %v9584_v49 = vpop.f32.mrf.mxu0 }
 0x25f   : > { %v4101_v60 = vadd.f32 %v9584_v49, %v3714_v12  ;;  %v2559_v12 = vadd.f32 %v13744_v8, %v2172_v7  ;;  %v13747_v49 = vld [vmem:[#allocation24_spill] sm:$0xff]  ;;  %v13749_v7 = vld [vmem:[#allocation79_spill] sm:$0xff] }
 0x260   : > { %v3941_v26 = vpop.f32.mrf.mxu0  ;;  %v2947_v54 = vadd.f32 %v13748_v36, %v13747_v49  ;;  %v13762_v49 = vld [vmem:[#allocation88_spill] sm:$0xff] }
 0x261   : > { %vm4133_vm4 = vcmp.ge.f32.partialorder %v4101_v60, 0.0  ;;  %v4165_v56 = vmul.f32 0.1, %v4101_v60  ;;  %v4100_v5 = vadd.f32 %v3941_v26, %v3713_v2  ;;  %v3717_v2 = vadd.f32 %v13749_v7, %v3330_v42  ;;  %v13752_v26 = vld [vmem:[#allocation34_spill] sm:$0xff] }
 0x262   : > { %v9587_v33 = vpop.f32.mrf.mxu0  ;;  %v2946_v11 = vadd.f32 %v13751_v58, %v2559_v12  ;;  %v13759_v12 = vld [vmem:[#allocation78_spill] sm:$0xff] }
 0x263   : > { %v4197_v28 = vsel %vm4133_vm4, %v4101_v60, %v4165_v56  ;;  %vm4132_vm5 = vcmp.ge.f32.partialorder %v4100_v5, 0.0  ;;  %v4164_v9 = vmul.f32 0.1, %v4100_v5  ;;  %v4103_v4 = vadd.f32 %v9587_v33, %v3716_v20 }
 0x264   : > { %4230 = vst.msk [vmem:[#allocation3 + $0x21] sm:$0xff] %vm272_vm0, %v4197_v28  ;;  %v3951_v19 = vpop.f32.mrf.mxu0  ;;  %v3332_v60 = vadd.f32 %v13750_v45, %v2944_v21  ;;  %v2561_v20 = vadd.f32 %v13752_v26, %v11855_v59  ;;  %v3720_v56 = vadd.f32 %v13753_v63, %v3333_v17  ;;  %v13755_v59 = vld [vmem:[#allocation14_spill] sm:$0xff]  ;;  %v13758_v21 = vld [vmem:[#allocation85_spill] sm:$0xff]  ;;  %v11961_v45 = vpop.f32.mrf.mxu1 }
 0x265   : > { %v4196_v35 = vsel %vm4132_vm5, %v4100_v5, %v4164_v9  ;;  %vm4135_vm6 = vcmp.ge.f32.partialorder %v4103_v4, 0.0  ;;  %v4167_v46 = vmul.f32 0.1, %v4103_v4  ;;  %v4102_v34 = vadd.f32 %v3951_v19, %v3715_v53  ;;  %v13754_v5 = vld [vmem:[#allocation77_spill] sm:$0xff]  ;;  %v13756_v9 = vld [vmem:[#allocation30_spill] sm:$0xff] }
 0x266   : > { %4229 = vst.msk [vmem:[#allocation3 + $0x19] sm:$0xff] %vm272_vm0, %v4196_v35  ;;  %v9590_v43 = vpop.f32.mrf.mxu0  ;;  %v3335_v32 = vadd.f32 %v13754_v5, %v2947_v54  ;;  %v11948_v28 = vadd.f32 %v13755_v59, %v1807_v16  ;;  %v3719_v8 = vadd.f32 %v13758_v21, %v3332_v60  ;;  %v2563_v16 = vadd.f32 %v13761_v52, %v11859_v0  ;;  %v13763_v54 = vld [vmem:[#allocation80_spill] sm:$0xff]  ;;  %v13768_v59 = vld [vmem:[#allocation38_spill] sm:$0xff] }
 0x267   : > { %v4199_v39 = vsel %vm4135_vm6, %v4103_v4, %v4167_v46  ;;  %vm4134_vm7 = vcmp.ge.f32.partialorder %v4102_v34, 0.0  ;;  %v4166_v62 = vmul.f32 0.1, %v4102_v34  ;;  %v4105_v15 = vadd.f32 %v9590_v43, %v3718_v1  ;;  %v13757_v4 = vld [vmem:[#allocation28_spill] sm:$0xff]  ;;  %v13760_v46 = vld [vmem:[#allocation33_spill] sm:$0xff]  ;;  %v13770_v21 = vld [vmem:[#allocation94_spill] sm:$0xff] }
 0x268   : > { %4232 = vst.msk [vmem:[#allocation3 + $0x39] sm:$0xff] %vm272_vm0, %v4199_v39  ;;  %v3961_v51 = vpop.f32.mrf.mxu0  ;;  %v2949_v10 = vadd.f32 %v13757_v4, %v13756_v9  ;;  %v3334_v1 = vadd.f32 %v13759_v12, %v2946_v11  ;;  %v3722_v36 = vadd.f32 %v13762_v49, %v3335_v32  ;;  %v13764_v0 = vld [vmem:[#allocation36_spill] sm:$0xff]  ;;  %v13765_v11 = vld [vmem:[#allocation35_spill] sm:$0xff]  ;;  %v2950_v9 = vadd.f32 %v13768_v59, %v2563_v16  ;;  %v13769_v4 = vld [vmem:[#allocation41_spill] sm:$0xff] }
 0x269   : > { %v4198_v53 = vsel %vm4134_vm7, %v4102_v34, %v4166_v62  ;;  %vm4137_vm8 = vcmp.ge.f32.partialorder %v4105_v15, 0.0  ;;  %v4169_v42 = vmul.f32 0.1, %v4105_v15  ;;  %v4104_v33 = vadd.f32 %v3961_v51, %v3717_v2  ;;  %v13771_v12 = vld [vmem:[#allocation83_spill] sm:$0xff] }
 0x26a   : > { %4231 = vst.msk [vmem:[#allocation3 + $0x31] sm:$0xff] %vm272_vm0, %v4198_v53  ;;  %v9593_v25 = vpop.f32.mrf.mxu0  ;;  %v2948_v34 = vadd.f32 %v13760_v46, %v2561_v20  ;;  %v3337_v7 = vadd.f32 %v13763_v54, %v2949_v10  ;;  %v2951_v26 = vadd.f32 %v13765_v11, %v13764_v0  ;;  %v13766_v20 = vld [vmem:[#allocation91_spill] sm:$0xff]  ;;  %v2565_v10 = vadd.f32 %v13769_v4, %v11871_v6  ;;  %v13772_v6 = vld [vmem:[#allocation40_spill] sm:$0xff]  ;;  %v13774_v54 = vld [vmem:[#allocation97_spill] sm:$0xff] }
 0x26b   : > { %v4201_v17 = vsel %vm4137_vm8, %v4105_v15, %v4169_v42  ;;  %vm4136_vm9 = vcmp.ge.f32.partialorder %v4104_v33, 0.0  ;;  %v4168_v19 = vmul.f32 0.1, %v4104_v33  ;;  %v4107_v35 = vadd.f32 %v9593_v25, %v3720_v56  ;;  %v13767_v56 = vld [vmem:[#allocation81_spill] sm:$0xff]  ;;  %v11978_v51 = vld [vmem:[#allocation3 + $0x21] sm:$0xff] }
 0x26c   : > { %4234 = vst.msk [vmem:[#allocation3 + $0x51] sm:$0xff] %vm272_vm0, %v4201_v17  ;;  %v3971_v2 = vpop.f32.mrf.mxu0  ;;  %v3721_v63 = vadd.f32 %v13766_v20, %v3334_v1  ;;  %v3336_v5 = vadd.f32 %v13767_v56, %v2948_v34  ;;  %v3339_v1 = vadd.f32 %v13771_v12, %v2951_v26  ;;  %v11990_v17 = vpop.f32.mrf.mxu1  ;;  %v13773_v49 = vld [vmem:[#allocation39_spill] sm:$0xff]  ;;  %v13776_v20 = vld [vmem:[#allocation42_spill] sm:$0xff]  ;;  %v13777_v56 = vld [vmem:[#allocation45_spill] sm:$0xff] }
 0x26d   : > { %v4200_v60 = vsel %vm4136_vm9, %v4104_v33, %v4168_v19  ;;  %vm4139_vm10 = vcmp.ge.f32.partialorder %v4107_v35, 0.0  ;;  %v4171_v43 = vmul.f32 0.1, %v4107_v35  ;;  %v4106_v39 = vadd.f32 %v3971_v2, %v3719_v8  ;;  %v11963_v62 = vld [vmem:[#allocation3 + $0x18] sm:$0xff]  ;;  %v11967_v58 = vld [vmem:[#allocation3 + $0x20] sm:$0xff]  ;;  %v13775_v2 = vld [vmem:[#allocation84_spill] sm:$0xff] }
 0x26e   : > { %v11965_v15 = vld [vmem:[#allocation3 + $0x19] sm:$0xff]  ;;  %4233 = vst.msk [vmem:[#allocation3 + $0x49] sm:$0xff] %vm272_vm0, %v4200_v60  ;;  %v9596_v32 = vpop.f32.mrf.mxu0  ;;  %9635 = vmatprep.mubr.msk.f32.mxu1 %vm272_vm0, %v11963_v62  ;;  %v3724_v8 = vadd.f32 %v13770_v21, %v3337_v7  ;;  %v3723_v7 = vadd.f32 %v13774_v54, %v3336_v5  ;;  %v3338_v60 = vadd.f32 %v13775_v2, %v2950_v9  ;;  %v12019_v59 = vpop.f32.mrf.mxu1 }
 0x26f   : > { %9685 = vmatprep.mubr.msk.f32.mxu0 %vm272_vm0, %v11965_v15  ;;  %v4203_v53 = vsel %vm4139_vm10, %v4107_v35, %v4171_v43  ;;  %vm4138_vm11 = vcmp.ge.f32.partialorder %v4106_v39, 0.0  ;;  %v4170_v42 = vmul.f32 0.1, %v4106_v39  ;;  %v4109_v33 = vadd.f32 %v9596_v32, %v3722_v36  ;;  %9636 = vmatmul.mubr.msk.f32.gmra.mxu1 %vm272_vm0, %v11967_v58  ;;  %v13783_v2 = vld [vmem:[#allocation49_spill] sm:$0xff] }
 0x270   : > { %9686 = vmatmul.mubr.msk.f32.gmra.mxu0 %vm272_vm0, %v11978_v51  ;;  %4236 = vst.msk [vmem:[#allocation3 + $0x69] sm:$0xff] %vm272_vm0, %v4203_v53  ;;  %v3981_v25 = vpop.f32.mrf.mxu0  ;;  %v2953_v36 = vadd.f32 %v13773_v49, %v13772_v6  ;;  %v2567_v5 = vadd.f32 %v13777_v56, %v11880_v14  ;;  %v3726_v32 = vadd.f32 %v11800_v30, %v3339_v1  ;;  %v13778_v53 = vld [vmem:[#allocation86_spill] sm:$0xff]  ;;  %v13779_v14 = vld [vmem:[#allocation44_spill] sm:$0xff] }
 0x271   : > { %v4202_v19 = vsel %vm4138_vm11, %v4106_v39, %v4170_v42  ;;  %vm4141_vm12 = vcmp.ge.f32.partialorder %v4109_v33, 0.0  ;;  %v4173_v35 = vmul.f32 0.1, %v4109_v33  ;;  %v4108_v46 = vadd.f32 %v3981_v25, %v3721_v63  ;;  %v11992_v34 = vld [vmem:[#allocation3 + $0x30] sm:$0xff]  ;;  %v11996_v16 = vld [vmem:[#allocation3 + $0x38] sm:$0xff]  ;;  %v13780_v25 = vld [vmem:[#allocation43_spill] sm:$0xff] }
 0x272   : > { %v11994_v52 = vld [vmem:[#allocation3 + $0x31] sm:$0xff]  ;;  %4235 = vst.msk [vmem:[#allocation3 + $0x61] sm:$0xff] %vm272_vm0, %v4202_v19  ;;  %v9599_v43 = vpop.f32.mrf.mxu0  ;;  %9638 = vmatprep.mubr.msk.f32.mxu1 %vm272_vm0, %v11992_v34  ;;  %v12007_v39 = vld [vmem:[#allocation3 + $0x39] sm:$0xff]  ;;  %v2952_v63 = vadd.f32 %v13776_v20, %v2565_v10  ;;  %v3341_v42 = vadd.f32 %v13778_v53, %v2953_v36  ;;  %v2955_v30 = vadd.f32 %v13780_v25, %v13779_v14  ;;  %v13781_v19 = vld [vmem:[#allocation87_spill] sm:$0xff]  ;;  %v12048_v20 = vpop.f32.mrf.mxu1 }
 0x273   : > { %9688 = vmatprep.mubr.msk.f32.mxu0 %vm272_vm0, %v11994_v52  ;;  %v4205_v0 = vsel %vm4141_vm12, %v4109_v33, %v4173_v35  ;;  %vm4140_vm13 = vcmp.ge.f32.partialorder %v4108_v46, 0.0  ;;  %v4172_v11 = vmul.f32 0.1, %v4108_v46  ;;  %v4111_v26 = vadd.f32 %v9599_v43, %v3724_v8  ;;  %9639 = vmatmul.mubr.msk.f32.gmra.mxu1 %vm272_vm0, %v11996_v16 }
 0x274   : > { %9689 = vmatmul.mubr.msk.f32.gmra.mxu0 %vm272_vm0, %v12007_v39  ;;  %4238 = vst.msk [vmem:[#allocation3 + $0x81] sm:$0xff] %vm272_vm0, %v4205_v0  ;;  %v3991_v33 = vpop.f32.mrf.mxu0  ;;  %v3725_v1 = vadd.f32 %v11807_v37, %v3338_v60  ;;  %v3340_v35 = vadd.f32 %v13781_v19, %v2952_v63  ;;  %v13782_v37 = vld [vmem:[#allocation46_spill] sm:$0xff]  ;;  %v2569_v60 = vadd.f32 %v13783_v2, %v11883_v40  ;;  %v13784_v0 = vld [vmem:[#allocation89_spill] sm:$0xff]  ;;  %v13786_v40 = vld [vmem:[#allocation48_spill] sm:$0xff]  ;;  %v12077_v2 = vpop.f32.mrf.mxu1 }
 0x275   : > { %v4204_v9 = vsel %vm4140_vm13, %v4108_v46, %v4172_v11  ;;  %vm4143_vm14 = vcmp.ge.f32.partialorder %v4111_v26, 0.0  ;;  %v4175_v4 = vmul.f32 0.1, %v4111_v26  ;;  %v4110_v21 = vadd.f32 %v3991_v33, %v3723_v7  ;;  %v12021_v8 = vld [vmem:[#allocation3 + $0x48] sm:$0xff]  ;;  %v12025_v10 = vld [vmem:[#allocation3 + $0x50] sm:$0xff] }
 0x276   : > { %v12023_v12 = vld [vmem:[#allocation3 + $0x49] sm:$0xff]  ;;  %4237 = vst.msk [vmem:[#allocation3 + $0x79] sm:$0xff] %vm272_vm0, %v4204_v9  ;;  %v9602_v6 = vpop.f32.mrf.mxu0  ;;  %9641 = vmatprep.mubr.msk.f32.mxu1 %vm272_vm0, %v12021_v8  ;;  %v12036_v46 = vld [vmem:[#allocation3 + $0x51] sm:$0xff]  ;;  %v2954_v7 = vadd.f32 %v13782_v37, %v2567_v5  ;;  %v3728_v43 = vadd.f32 %v11822_v44, %v3341_v42  ;;  %v3343_v11 = vadd.f32 %v13784_v0, %v2955_v30 }
 0x277   : > { %9691 = vmatprep.mubr.msk.f32.mxu0 %vm272_vm0, %v12023_v12  ;;  %v4207_v49 = vsel %vm4143_vm14, %v4111_v26, %v4175_v4  ;;  %vm4142_vm15 = vcmp.ge.f32.partialorder %v4110_v21, 0.0  ;;  %v4174_v36 = vmul.f32 0.1, %v4110_v21  ;;  %v4113_v54 = vadd.f32 %v9602_v6, %v3726_v32  ;;  %9642 = vmatmul.mubr.msk.f32.gmra.mxu1 %vm272_vm0, %v12025_v10  ;;  %v13787_v9 = vld [vmem:[#allocation47_spill] sm:$0xff]  ;;  %v13788_v4 = vld [vmem:[#allocation90_spill] sm:$0xff]  ;;  %v13790_v6 = vld [vmem:[#allocation53_spill] sm:$0xff] }
 0x278   : > { %9692 = vmatmul.mubr.msk.f32.gmra.mxu0 %vm272_vm0, %v12036_v46  ;;  %4240 = vst.msk [vmem:[#allocation3 + $0x99] sm:$0xff] %vm272_vm0, %v4207_v49  ;;  %v4001_v26 = vpop.f32.mrf.mxu0  ;;  %v2957_v44 = vadd.f32 %v13787_v9, %v13786_v40  ;;  %v3727_v42 = vadd.f32 %v11849_v24, %v3340_v35  ;;  %v3342_v14 = vadd.f32 %v13788_v4, %v2954_v7  ;;  %v13789_v24 = vld [vmem:[#allocation50_spill] sm:$0xff]  ;;  %v13791_v37 = vld [vmem:[#allocation92_spill] sm:$0xff]  ;;  %v13795_v40 = vld [vmem:[#allocation51_spill] sm:$0xff] }
 0x279   : > { %v4206_v63 = vsel %vm4142_vm15, %v4110_v21, %v4174_v36  ;;  %vm4145_vm1 = vcmp.ge.f32.partialorder %v4113_v54, 0.0  ;;  %v4177_v56 = vmul.f32 0.1, %v4113_v54  ;;  %v4112_v32 = vadd.f32 %v4001_v26, %v3725_v1  ;;  %v12050_v53 = vld [vmem:[#allocation3 + $0x60] sm:$0xff]  ;;  %v12054_v5 = vld [vmem:[#allocation3 + $0x68] sm:$0xff]  ;;  %v13796_v9 = vld [vmem:[#allocation93_spill] sm:$0xff] }
 0x27a   : > { %v12052_v33 = vld [vmem:[#allocation3 + $0x61] sm:$0xff]  ;;  %13785 = vst [vmem:[#allocation27_spill] sm:$0xff] %v12054_v5  ;;  %4239 = vst.msk [vmem:[#allocation3 + $0x91] sm:$0xff] %vm272_vm0, %v4206_v63  ;;  %v9605_v25 = vpop.f32.mrf.mxu0  ;;  %9644 = vmatprep.mubr.msk.f32.mxu1 %vm272_vm0, %v12050_v53  ;;  %v12065_v21 = vld [vmem:[#allocation3 + $0x69] sm:$0xff]  ;;  %v2956_v35 = vadd.f32 %v13789_v24, %v2569_v60  ;;  %v2571_v49 = vadd.f32 %v13790_v6, %v11890_v29  ;;  %v3730_v36 = vadd.f32 %v11887_v55, %v3343_v11 }
 0x27b   : > { %9694 = vmatprep.mubr.msk.f32.mxu0 %vm272_vm0, %v12052_v33  ;;  %v4209_v30 = vsel %vm4145_vm1, %v4113_v54, %v4177_v56  ;;  %vm4144_vm3 = vcmp.ge.f32.partialorder %v4112_v32, 0.0  ;;  %v4176_v1 = vmul.f32 0.1, %v4112_v32  ;;  %v4115_v19 = vadd.f32 %v9605_v25, %v3728_v43  ;;  %9645 = vmatmul.mubr.msk.f32.gmra.mxu1 %vm272_vm0, %v12054_v5  ;;  %v13794_v29 = vld [vmem:[#allocation52_spill] sm:$0xff]  ;;  %v13799_v6 = vld [vmem:[#allocation95_spill] sm:$0xff] }
 0x27c   : > { %9695 = vmatmul.mubr.msk.f32.gmra.mxu0 %vm272_vm0, %v12065_v21  ;;  %v3345_v7 = vadd.f32 %v13791_v37, %v2957_v44  ;;  %4242 = vst.msk [vmem:[#allocation3 + $0xb1] sm:$0xff] %vm272_vm0, %v4209_v30  ;;  %v4011_v54 = vpop.f32.mrf.mxu0  ;;  %v2959_v55 = vadd.f32 %v13795_v40, %v13794_v29  ;;  %v3729_v11 = vadd.f32 %v11910_v23, %v3342_v14  ;;  %v13797_v23 = vld [vmem:[#allocation54_spill] sm:$0xff] }
 0x27d   : > { %v4208_v43 = vsel %vm4144_vm3, %v4112_v32, %v4176_v1  ;;  %vm4147_vm4 = vcmp.ge.f32.partialorder %v4115_v19, 0.0  ;;  %v4179_v0 = vmul.f32 0.1, %v4115_v19  ;;  %v4114_v26 = vadd.f32 %v4011_v54, %v3727_v42  ;;  %v12079_v63 = vld [vmem:[#allocation3 + $0x78] sm:$0xff]  ;;  %v12083_v60 = vld [vmem:[#allocation3 + $0x80] sm:$0xff]  ;;  %v12106_v54 = vpop.f32.mrf.mxu1 }
 0x27e   : > { %13792 = vst [vmem:[#allocation15_spill] sm:$0xff] %v12079_v63  ;;  %v12081_v56 = vld [vmem:[#allocation3 + $0x79] sm:$0xff]  ;;  %13793 = vst [vmem:[#allocation31_spill] sm:$0xff] %v12083_v60  ;;  %v3344_v44 = vadd.f32 %v13796_v9, %v2956_v35  ;;  %v9608_v4 = vpop.f32.mrf.mxu0  ;;  %9647 = vmatprep.mubr.msk.f32.mxu1 %vm272_vm0, %v12079_v63  ;;  %v12094_v32 = vld [vmem:[#allocation3 + $0x81] sm:$0xff]  ;;  %v2958_v14 = vadd.f32 %v13797_v23, %v2571_v49  ;;  %v3732_v35 = vadd.f32 %v11924_v18, %v3345_v7 }
 0x27f   : > { %4241 = vst.msk [vmem:[#allocation3 + $0xa9] sm:$0xff] %vm272_vm0, %v4208_v43  ;;  %9697 = vmatprep.mubr.msk.f32.mxu0 %vm272_vm0, %v12081_v56  ;;  %v4211_v42 = vsel %vm4147_vm4, %v4115_v19, %v4179_v0  ;;  %vm4146_vm5 = vcmp.ge.f32.partialorder %v4114_v26, 0.0  ;;  %v4178_v25 = vmul.f32 0.1, %v4114_v26  ;;  %v4117_v30 = vadd.f32 %v9608_v4, %v3730_v36  ;;  %9648 = vmatmul.mubr.msk.f32.gmra.mxu1 %vm272_vm0, %v12083_v60  ;;  %v13798_v1 = vld [vmem:[#allocation57_spill] sm:$0xff]  ;;  %v13803_v9 = vld [vmem:[#allocation55_spill] sm:$0xff] }
 0x280   : > { %9698 = vmatmul.mubr.msk.f32.gmra.mxu0 %vm272_vm0, %v12094_v32  ;;  %v2573_v24 = vadd.f32 %v13798_v1, %v11897_v47  ;;  %v3347_v37 = vadd.f32 %v13799_v6, %v2959_v55  ;;  %4244 = vst.msk [vmem:[#allocation3 + $0xc9] sm:$0xff] %vm272_vm0, %v4211_v42  ;;  %v4021_v19 = vpop.f32.mrf.mxu0  ;;  %v13802_v47 = vld [vmem:[#allocation56_spill] sm:$0xff]  ;;  %v3731_v7 = vadd.f32 %v11944_v22, %v3344_v44  ;;  %v13805_v22 = vld [vmem:[#allocation58_spill] sm:$0xff] }
 0x281   : > { %v4210_v36 = vsel %vm4146_vm5, %v4114_v26, %v4178_v25  ;;  %vm4149_vm6 = vcmp.ge.f32.partialorder %v4117_v30, 0.0  ;;  %v4181_v43 = vmul.f32 0.1, %v4117_v30  ;;  %v4116_v0 = vadd.f32 %v4021_v19, %v3729_v11  ;;  %v12108_v29 = vld [vmem:[#allocation3 + $0x90] sm:$0xff]  ;;  %v12112_v49 = vld [vmem:[#allocation3 + $0x98] sm:$0xff]  ;;  %v13807_v19 = vld [vmem:[#allocation98_spill] sm:$0xff] }
 0x282   : > { %13800 = vst [vmem:[#allocation29_spill] sm:$0xff] %v12108_v29  ;;  %v12110_v40 = vld [vmem:[#allocation3 + $0x91] sm:$0xff]  ;;  %13801 = vst [vmem:[#allocation9_spill] sm:$0xff] %v12112_v49  ;;  %v2961_v18 = vadd.f32 %v13803_v9, %v13802_v47  ;;  %v9611_v42 = vpop.f32.mrf.mxu0  ;;  %9650 = vmatprep.mubr.msk.f32.mxu1 %vm272_vm0, %v12108_v29  ;;  %v12123_v26 = vld [vmem:[#allocation3 + $0x99] sm:$0xff]  ;;  %v2960_v44 = vadd.f32 %v13805_v22, %v2573_v24  ;;  %v3734_v6 = vadd.f32 %v11961_v45, %v3347_v37 }
 0x283   : > { %v13804_v55 = vld [vmem:[#allocation96_spill] sm:$0xff]  ;;  %4243 = vst.msk [vmem:[#allocation3 + $0xc1] sm:$0xff] %vm272_vm0, %v4210_v36  ;;  %9700 = vmatprep.mubr.msk.f32.mxu0 %vm272_vm0, %v12110_v40  ;;  %v4213_v11 = vsel %vm4149_vm6, %v4117_v30, %v4181_v43  ;;  %vm4148_vm7 = vcmp.ge.f32.partialorder %v4116_v0, 0.0  ;;  %v4180_v25 = vmul.f32 0.1, %v4116_v0  ;;  %v4119_v23 = vadd.f32 %v9611_v42, %v3732_v35  ;;  %9651 = vmatmul.mubr.msk.f32.gmra.mxu1 %vm272_vm0, %v12112_v49  ;;  %v12135_v43 = vpop.f32.mrf.mxu1  ;;  %v13812_v22 = vld [vmem:[#allocation59_spill] sm:$0xff] }
 0x284   : > { %v3346_v4 = vadd.f32 %v13804_v55, %v2958_v14  ;;  %9701 = vmatmul.mubr.msk.f32.gmra.mxu0 %vm272_vm0, %v12123_v26  ;;  %v13806_v14 = vld [vmem:[#allocation61_spill] sm:$0xff]  ;;  %v3349_v36 = vadd.f32 %v13807_v19, %v2961_v18  ;;  %4246 = vst.msk [vmem:[#allocation3 + $0xe1] sm:$0xff] %vm272_vm0, %v4213_v11  ;;  %v4031_v30 = vpop.f32.mrf.mxu0  ;;  %v13813_v18 = vld [vmem:[#allocation99_spill] sm:$0xff] }
 0x285   : > { %v2575_v1 = vadd.f32 %v13806_v14, %v11900_v50  ;;  %v4212_v35 = vsel %vm4148_vm7, %v4116_v0, %v4180_v25  ;;  %vm4151_vm8 = vcmp.ge.f32.partialorder %v4119_v23, 0.0  ;;  %v4183_v47 = vmul.f32 0.1, %v4119_v23  ;;  %v13811_v50 = vld [vmem:[#allocation60_spill] sm:$0xff] }
 0x286   : > { %v4118_v9 = vadd.f32 %v4031_v30, %v3731_v7  ;;  %v12137_v55 = vld [vmem:[#allocation3 + $0xa8] sm:$0xff]  ;;  %v12141_v24 = vld [vmem:[#allocation3 + $0xb0] sm:$0xff]  ;;  %v2963_v45 = vadd.f32 %v13812_v22, %v13811_v50  ;;  %v3733_v37 = vadd.f32 %v11990_v17, %v3346_v4  ;;  %v3348_v11 = vadd.f32 %v13813_v18, %v2960_v44  ;;  %4245 = vst.msk [vmem:[#allocation3 + $0xd9] sm:$0xff] %vm272_vm0, %v4212_v35  ;;  %v9614_v14 = vpop.f32.mrf.mxu0  ;;  %v13815_v17 = vld [vmem:[#allocation62_spill] sm:$0xff] }
 0x287   : > { %13808 = vst [vmem:[#allocation4_spill] sm:$0xff] %v12137_v55  ;;  %v12139_v42 = vld [vmem:[#allocation3 + $0xa9] sm:$0xff]  ;;  %13810 = vst [vmem:[#allocation5_spill] sm:$0xff] %v12141_v24  ;;  %9653 = vmatprep.mubr.msk.f32.mxu1 %vm272_vm0, %v12137_v55  ;;  %v12152_v0 = vld [vmem:[#allocation3 + $0xb1] sm:$0xff]  ;;  %v4215_v7 = vsel %vm4151_vm8, %v4119_v23, %v4183_v47  ;;  %v4121_v19 = vadd.f32 %v9614_v14, %v3734_v6  ;;  %v2962_v4 = vadd.f32 %v13815_v17, %v2575_v1  ;;  %v12164_v47 = vpop.f32.mrf.mxu1 }
 0x288   : > { %13809 = vst [vmem:[#allocation32_spill] sm:$0xff] %v12139_v42  ;;  %9703 = vmatprep.mubr.msk.f32.mxu0 %vm272_vm0, %v12139_v42  ;;  %13814 = vst [vmem:[#allocation6_spill] sm:$0xff] %v12152_v0  ;;  %vm4150_vm9 = vcmp.ge.f32.partialorder %v4118_v9, 0.0  ;;  %v4182_v25 = vmul.f32 0.1, %v4118_v9  ;;  %9654 = vmatmul.mubr.msk.f32.gmra.mxu1 %vm272_vm0, %v12141_v24  ;;  %v13816_v44 = vld [vmem:[#allocation65_spill] sm:$0xff]  ;;  %v3736_v35 = vadd.f32 %v12019_v59, %v3349_v36  ;;  %v4041_v23 = vpop.f32.mrf.mxu0 }
 0x289   : > { %9704 = vmatmul.mubr.msk.f32.gmra.mxu0 %vm272_vm0, %v12152_v0  ;;  %v2577_v30 = vadd.f32 %v13816_v44, %v11904_v48  ;;  %v13817_v50 = vld [vmem:[#allocation100_spill] sm:$0xff]  ;;  %4248 = vst.msk [vmem:[#allocation3 + $0xf9] sm:$0xff] %vm272_vm0, %v4215_v7  ;;  %vm4153_vm10 = vcmp.ge.f32.partialorder %v4121_v19, 0.0  ;;  %v4185_v18 = vmul.f32 0.1, %v4121_v19  ;;  %v4120_v14 = vadd.f32 %v4041_v23, %v3733_v37  ;;  %v13821_v17 = vld [vmem:[#allocation63_spill] sm:$0xff] }
 0x28a   : > { %v3351_v22 = vadd.f32 %v13817_v50, %v2963_v45  ;;  %v4214_v6 = vsel %vm4150_vm9, %v4118_v9, %v4182_v25  ;;  %v12166_v42 = vld [vmem:[#allocation3 + $0xc0] sm:$0xff]  ;;  %v12170_v1 = vld [vmem:[#allocation3 + $0xc8] sm:$0xff]  ;;  %v13820_v48 = vld [vmem:[#allocation64_spill] sm:$0xff]  ;;  %v3735_v36 = vadd.f32 %v12048_v20, %v3348_v11  ;;  %v9617_v44 = vpop.f32.mrf.mxu0 }
 0x28b   : > { %13818 = vst [vmem:[#allocation11_spill] sm:$0xff] %v12166_v42  ;;  %v12168_v0 = vld [vmem:[#allocation3 + $0xc1] sm:$0xff]  ;;  %13819 = vst [vmem:[#allocation17_spill] sm:$0xff] %v12170_v1  ;;  %v2965_v59 = vadd.f32 %v13821_v17, %v13820_v48  ;;  %v13822_v45 = vld [vmem:[#allocation101_spill] sm:$0xff]  ;;  %9656 = vmatprep.mubr.msk.f32.mxu1 %vm272_vm0, %v12166_v42  ;;  %v4217_v37 = vsel %vm4153_vm10, %v4121_v19, %v4185_v18  ;;  %vm4152_vm11 = vcmp.ge.f32.partialorder %v4120_v14, 0.0  ;;  %v9576_v18 = vpop.f32.mrf.mxu1 }
 0x28c   : > { %v3350_v7 = vadd.f32 %v13822_v45, %v2962_v4  ;;  %4247 = vst.msk [vmem:[#allocation3 + $0xf1] sm:$0xff] %vm272_vm0, %v4214_v6  ;;  %9706 = vmatprep.mubr.msk.f32.mxu0 %vm272_vm0, %v12168_v0  ;;  %v12181_v9 = vld [vmem:[#allocation3 + $0xc9] sm:$0xff]  ;;  %v4184_v25 = vmul.f32 0.1, %v4120_v14  ;;  %v4123_v50 = vadd.f32 %v9617_v44, %v3736_v35  ;;  %9657 = vmatmul.mubr.msk.f32.gmra.mxu1 %vm272_vm0, %v12170_v1  ;;  %v13824_v20 = vld [vmem:[#allocation66_spill] sm:$0xff]  ;;  %v13825_v4 = vld [vmem:[#allocation69_spill] sm:$0xff]  ;;  %v4051_v19 = vpop.f32.mrf.mxu0 }
 0x28d   : > { %13823 = vst [vmem:[#allocation16_spill] sm:$0xff] %v12181_v9  ;;  %9707 = vmatmul.mubr.msk.f32.gmra.mxu0 %vm272_vm0, %v12181_v9  ;;  %v2964_v11 = vadd.f32 %v13824_v20, %v2577_v30  ;;  %v2579_v23 = vadd.f32 %v13825_v4, %v11913_v41  ;;  %v3738_v6 = vadd.f32 %v12077_v2, %v3351_v22  ;;  %4250 = vst.msk [vmem:[#allocation3 + $0x111] sm:$0xff] %vm272_vm0, %v4217_v37  ;;  %v12193_v44 = vld [vmem:[#allocation3 + $0xd8] sm:$0xff]  ;;  %v12197_v30 = vld [vmem:[#allocation3 + $0xe0] sm:$0xff] }
 0x28e   : > { %v3353_v48 = vadd.f32 %v11811_v3, %v2965_v59  ;;  %v4216_v35 = vsel %vm4152_vm11, %v4120_v14, %v4184_v25  ;;  %vm4155_vm12 = vcmp.ge.f32.partialorder %v4123_v50, 0.0  ;;  %v4187_v17 = vmul.f32 0.1, %v4123_v50  ;;  %13826 = vst [vmem:[#allocation7_spill] sm:$0xff] %v12193_v44  ;;  %v12195_v9 = vld [vmem:[#allocation3 + $0xd9] sm:$0xff]  ;;  %13827 = vst [vmem:[#allocation8_spill] sm:$0xff] %v12197_v30  ;;  %v9620_v22 = vpop.f32.mrf.mxu0  ;;  %9659 = vmatprep.mubr.msk.f32.mxu1 %vm272_vm0, %v12193_v44 }
 0x28f   : > { %v4122_v45 = vadd.f32 %v4051_v19, %v3735_v36  ;;  %v13828_v20 = vld [vmem:[#allocation68_spill] sm:$0xff]  ;;  %v13829_v41 = vld [vmem:[#allocation67_spill] sm:$0xff]  ;;  %v3737_v2 = vadd.f32 %v12106_v54, %v3350_v7  ;;  %v3352_v3 = vadd.f32 %v11819_v61, %v2964_v11  ;;  %4249 = vst.msk [vmem:[#allocation3 + $0x109] sm:$0xff] %vm272_vm0, %v4216_v35  ;;  %9709 = vmatprep.mubr.msk.f32.mxu0 %vm272_vm0, %v12195_v9  ;;  %v13830_v61 = vld [vmem:[#allocation70_spill] sm:$0xff]  ;;  %v3694_v35 = vpop.f32.mrf.mxu1 }
 0x290   : > { %v2967_v4 = vadd.f32 %v13829_v41, %v13828_v20  ;;  %v12208_v14 = vld [vmem:[#allocation3 + $0xe1] sm:$0xff]  ;;  %v4219_v59 = vsel %vm4155_vm12, %v4123_v50, %v4187_v17  ;;  %v4125_v37 = vadd.f32 %v9620_v22, %v3738_v6  ;;  %9660 = vmatmul.mubr.msk.f32.gmra.mxu1 %vm272_vm0, %v12197_v30  ;;  %v2966_v54 = vadd.f32 %v13830_v61, %v2579_v23  ;;  %v13831_v7 = vld [vmem:[#allocation73_spill] sm:$0xff]  ;;  %v4061_v50 = vpop.f32.mrf.mxu0  ;;  %v13834_v61 = vld [vmem:[#allocation72_spill] sm:$0xff] }
 0x291   : > { %vm4154_vm13 = vcmp.ge.f32.partialorder %v4122_v45, 0.0  ;;  %v4186_v36 = vmul.f32 0.1, %v4122_v45  ;;  %9710 = vmatmul.mubr.msk.f32.gmra.mxu0 %vm272_vm0, %v12208_v14  ;;  %v2581_v25 = vadd.f32 %v13831_v7, %v11948_v28  ;;  %v3740_v11 = vadd.f32 %v12135_v43, %v3353_v48  ;;  %4252 = vst.msk [vmem:[#allocation3 + $0x129] sm:$0xff] %vm272_vm0, %v4219_v59  ;;  %v13835_v28 = vld [vmem:[#allocation71_spill] sm:$0xff] }
 0x292   : > { %v3355_v19 = vadd.f32 %v11828_v31, %v2967_v4  ;;  %vm4157_vm14 = vcmp.ge.f32.partialorder %v4125_v37, 0.0  ;;  %v4189_v17 = vmul.f32 0.1, %v4125_v37  ;;  %v4124_v20 = vadd.f32 %v4061_v50, %v3737_v2  ;;  %v9623_v48 = vpop.f32.mrf.mxu0  ;;  %v9579_v4 = vpop.f32.mrf.mxu1 }
 0x293   : > { %v4218_v6 = vsel %vm4154_vm13, %v4122_v45, %v4186_v36  ;;  %v12220_v41 = vld [vmem:[#allocation3 + $0xf0] sm:$0xff]  ;;  %v12224_v23 = vld [vmem:[#allocation3 + $0xf8] sm:$0xff]  ;;  %v2969_v7 = vadd.f32 %v13835_v28, %v13834_v61  ;;  %v3739_v43 = vadd.f32 %v12164_v47, %v3352_v3  ;;  %v3354_v31 = vadd.f32 %v11842_v27, %v2966_v54  ;;  %v13837_v27 = vld [vmem:[#allocation74_spill] sm:$0xff] }
 0x294   : > { %13832 = vst [vmem:[#allocation10_spill] sm:$0xff] %v12220_v41  ;;  %v12222_v22 = vld [vmem:[#allocation3 + $0xf1] sm:$0xff]  ;;  %13833 = vst [vmem:[#allocation18_spill] sm:$0xff] %v12224_v23  ;;  %9662 = vmatprep.mubr.msk.f32.mxu1 %vm272_vm0, %v12220_v41  ;;  %v12235_v45 = vld [vmem:[#allocation3 + $0xf9] sm:$0xff]  ;;  %v4221_v2 = vsel %vm4157_vm14, %v4125_v37, %v4189_v17  ;;  %vm4156_vm15 = vcmp.ge.f32.partialorder %v4124_v20, 0.0  ;;  %v4127_v36 = vadd.f32 %v9623_v48, %v3740_v11  ;;  %v4071_v50 = vpop.f32.mrf.mxu0 }
 0x295   : > { %4251 = vst.msk [vmem:[#allocation3 + $0x121] sm:$0xff] %vm272_vm0, %v4218_v6  ;;  %9712 = vmatprep.mubr.msk.f32.mxu0 %vm272_vm0, %v12222_v22  ;;  %13836 = vst [vmem:[#allocation21_spill] sm:$0xff] %v12235_v45  ;;  %v4188_v59 = vmul.f32 0.1, %v4124_v20  ;;  %9663 = vmatmul.mubr.msk.f32.gmra.mxu1 %vm272_vm0, %v12224_v23  ;;  %v2968_v47 = vadd.f32 %v13837_v27, %v2581_v25  ;;  %v3742_v3 = vadd.f32 %v9576_v18, %v3355_v19  ;;  %v3704_v25 = vpop.f32.mrf.mxu1 }
 0x296   : > { %9713 = vmatmul.mubr.msk.f32.gmra.mxu0 %vm272_vm0, %v12235_v45  ;;  %v3357_v54 = vadd.f32 %v11862_v13, %v2969_v7  ;;  %4254 = vst.msk [vmem:[#allocation3 + $0x141] sm:$0xff] %vm272_vm0, %v4221_v2  ;;  %vm4159_vm1 = vcmp.ge.f32.partialorder %v4127_v36, 0.0  ;;  %v4191_v37 = vmul.f32 0.1, %v4127_v36  ;;  %v4126_v17 = vadd.f32 %v4071_v50, %v3739_v43  ;;  %v12244_v61 = vld [vmem:[#allocation3 + $0x108] sm:$0xff]  ;;  %v12248_v28 = vld [vmem:[#allocation3 + $0x110] sm:$0xff]  ;;  %v9626_v18 = vpop.f32.mrf.mxu0 }
 0x297   : > { %v4220_v6 = vsel %vm4156_vm15, %v4124_v20, %v4188_v59  ;;  %13838 = vst [vmem:[#allocation12_spill] sm:$0xff] %v12244_v61  ;;  %v12246_v11 = vld [vmem:[#allocation3 + $0x109] sm:$0xff]  ;;  %13839 = vst [vmem:[#allocation20_spill] sm:$0xff] %v12248_v28  ;;  %v3741_v48 = vadd.f32 %v3694_v35, %v3354_v31  ;;  %v3356_v45 = vadd.f32 %v11876_v57, %v2968_v47  ;;  %9665 = vmatprep.mubr.msk.f32.mxu1 %vm272_vm0, %v12244_v61  ;;  %v12256_v13 = vld [vmem:[#allocation3 + $0x111] sm:$0xff] }
 0x298   : > { %4253 = vst.msk [vmem:[#allocation3 + $0x139] sm:$0xff] %vm272_vm0, %v4220_v6  ;;  %9715 = vmatprep.mubr.msk.f32.mxu0 %vm272_vm0, %v12246_v11  ;;  %v4223_v19 = vsel %vm4159_vm1, %v4127_v36, %v4191_v37  ;;  %vm4158_vm3 = vcmp.ge.f32.partialorder %v4126_v17, 0.0  ;;  %v4190_v20 = vmul.f32 0.1, %v4126_v17  ;;  %v4129_v7 = vadd.f32 %v9626_v18, %v3742_v3  ;;  %v4081_v35 = vpop.f32.mrf.mxu0 }
 0x299   : > { %9666 = vmatmul.mubr.msk.f32.gmra.mxu1 %vm272_vm0, %v12248_v28  ;;  %v3744_v57 = vadd.f32 %v9579_v4, %v3357_v54  ;;  %4256 = vst.msk [vmem:[#allocation3 + $0x159] sm:$0xff] %vm272_vm0, %v4223_v19  ;;  %v4128_v2 = vadd.f32 %v4081_v35, %v3741_v48  ;;  %v3743_v47 = vadd.f32 %v3704_v25, %v3356_v45  ;;  %v12274_v4 = vld [vmem:[#allocation3 + $0x129] sm:$0xff] }
 0x29a   : > { %9716 = vmatmul.mubr.msk.f32.gmra.mxu0 %vm272_vm0, %v12256_v13  ;;  %v4222_v43 = vsel %vm4158_vm3, %v4126_v17, %v4190_v20  ;;  %vm4161_vm4 = vcmp.ge.f32.partialorder %v4129_v7, 0.0  ;;  %v4193_v31 = vmul.f32 0.1, %v4129_v7  ;;  %v9629_v3 = vpop.f32.mrf.mxu0 }
 0x29b   : > { %4255 = vst.msk [vmem:[#allocation3 + $0x151] sm:$0xff] %vm272_vm0, %v4222_v43  ;;  %vm4160_vm5 = vcmp.ge.f32.partialorder %v4128_v2, 0.0  ;;  %v4192_v50 = vmul.f32 0.1, %v4128_v2  ;;  %v4131_v6 = vadd.f32 %v9629_v3, %v3744_v57  ;;  %v5041_v3 = vld [vmem:[#allocation3 + $0x2] sm:$0xff] }
 0x29c   : > { %v12263_v59 = vld [vmem:[#allocation3 + $0x120] sm:$0xff]  ;;  %v12267_v27 = vld [vmem:[#allocation3 + $0x128] sm:$0xff]  ;;  %v4225_v54 = vsel %vm4161_vm4, %v4129_v7, %v4193_v31  ;;  %v4091_v45 = vpop.f32.mrf.mxu0 }
 0x29d   : > { %13840 = vst [vmem:[#allocation19_spill] sm:$0xff] %v12263_v59  ;;  %v12265_v36 = vld [vmem:[#allocation3 + $0x121] sm:$0xff]  ;;  %13841 = vst [vmem:[#allocation22_spill] sm:$0xff] %v12267_v27  ;;  %9668 = vmatprep.mubr.msk.f32.mxu1 %vm272_vm0, %v12263_v59  ;;  %v4224_v37 = vsel %vm4160_vm5, %v4128_v2, %v4192_v50  ;;  %vm4163_vm6 = vcmp.ge.f32.partialorder %v4131_v6, 0.0  ;;  %v4195_v17 = vmul.f32 0.1, %v4131_v6  ;;  %v4130_v48 = vadd.f32 %v4091_v45, %v3743_v47 }
 0x29e   : > { %9718 = vmatprep.mubr.msk.f32.mxu0 %vm272_vm0, %v12265_v36  ;;  %9669 = vmatmul.mubr.msk.f32.gmra.mxu1 %vm272_vm0, %v12267_v27  ;;  %4258 = vst.msk [vmem:[#allocation3 + $0x171] sm:$0xff] %vm272_vm0, %v4225_v54  ;;  %4257 = vst.msk [vmem:[#allocation3 + $0x169] sm:$0xff] %vm272_vm0, %v4224_v37  ;;  %v12292_v20 = vld [vmem:[#allocation3 + $0x141] sm:$0xff]  ;;  %v5042_v37 = vld [vmem:[#allocation3 + $0xa] sm:$0xff] }
 0x29f   : > { %9719 = vmatmul.mubr.msk.f32.gmra.mxu0 %vm272_vm0, %v12274_v4  ;;  %v12281_v18 = vld [vmem:[#allocation3 + $0x138] sm:$0xff]  ;;  %v12285_v19 = vld [vmem:[#allocation3 + $0x140] sm:$0xff]  ;;  %v4227_v7 = vsel %vm4163_vm6, %v4131_v6, %v4195_v17  ;;  %vm4162_vm7 = vcmp.ge.f32.partialorder %v4130_v48, 0.0  ;;  %v4194_v57 = vmul.f32 0.1, %v4130_v48 }
 0x2a0   : > { %13842 = vst [vmem:[#allocation25_spill] sm:$0xff] %v12281_v18  ;;  %v12283_v25 = vld [vmem:[#allocation3 + $0x139] sm:$0xff]  ;;  %13843 = vst [vmem:[#allocation75_spill] sm:$0xff] %v12285_v19  ;;  %9671 = vmatprep.mubr.msk.f32.mxu1 %vm272_vm0, %v12281_v18  ;;  %v12338_v17 = vld [vmem:[%s13493_s5] ss:$0 sm:$0xff] }
 0x2a1   : > { %9721 = vmatprep.mubr.msk.f32.mxu0 %vm272_vm0, %v12283_v25  ;;  %4260 = vst.msk [vmem:[#allocation3 + $0x189] sm:$0xff] %vm272_vm0, %v4227_v7  ;;  %v4226_v35 = vsel %vm4162_vm7, %v4130_v48, %v4194_v57  ;;  %v12310_v47 = vld [vmem:[#allocation3 + $0x159] sm:$0xff] }
 0x2a2   : > { %9672 = vmatmul.mubr.msk.f32.gmra.mxu1 %vm272_vm0, %v12285_v19  ;;  %v12299_v43 = vld [vmem:[#allocation3 + $0x150] sm:$0xff]  ;;  %v12303_v2 = vld [vmem:[#allocation3 + $0x158] sm:$0xff]  ;;  %4259 = vst.msk [vmem:[#allocation3 + $0x181] sm:$0xff] %vm272_vm0, %v4226_v35  ;;  %v12348_v7 = vld [vmem:[%s13492_s4 + $0x30] sm:$0xff] }
 0x2a3   : > { %9722 = vmatmul.mubr.msk.f32.gmra.mxu0 %vm272_vm0, %v12292_v20  ;;  %13844 = vst [vmem:[#allocation13_spill] sm:$0xff] %v12299_v43  ;;  %v12301_v31 = vld [vmem:[#allocation3 + $0x151] sm:$0xff]  ;;  %13845 = vst [vmem:[#allocation24_spill] sm:$0xff] %v12303_v2  ;;  %9674 = vmatprep.mubr.msk.f32.mxu1 %vm272_vm0, %v12299_v43  ;;  %v12343_v48 = vld [vmem:[#allocation3 + $0x1a] sm:$0xff] }
 0x2a4   : > { %9724 = vmatprep.mubr.msk.f32.mxu0 %vm272_vm0, %v12301_v31  ;;  %v9634_v57 = vpop.f32.mrf.mxu1  ;;  %v10092_v35 = vld [vmem:[%s13492_s4 + $0x20] sm:$0xff] }
 0x2a5   : > { %v12316_v54 = vld [vmem:[#allocation3 + $0x168] sm:$0xff]  ;;  %v12320_v6 = vld [vmem:[#allocation3 + $0x170] sm:$0xff] }
 0x2a6   : > { %9675 = vmatmul.mubr.msk.f32.gmra.mxu1 %vm272_vm0, %v12303_v2  ;;  %13846 = vst [vmem:[#allocation23_spill] sm:$0xff] %v12316_v54  ;;  %v12318_v50 = vld [vmem:[#allocation3 + $0x169] sm:$0xff]  ;;  %v12326_v45 = vld [vmem:[#allocation3 + $0x171] sm:$0xff] }
 0x2a7   : > { %9725 = vmatmul.mubr.msk.f32.gmra.mxu0 %vm272_vm0, %v12310_v47  ;;  %9677 = vmatprep.mubr.msk.f32.mxu1 %vm272_vm0, %v12316_v54  ;;  %13847 = vst [vmem:[#allocation79_spill] sm:$0xff] %v12326_v45 }
 0x2a8   : > { %9727 = vmatprep.mubr.msk.f32.mxu0 %vm272_vm0, %v12318_v50 }
 0x2aa   : > { %9678 = vmatmul.mubr.msk.f32.gmra.mxu1 %vm272_vm0, %v12320_v6 }
 0x2ab   : > { %9728 = vmatmul.mubr.msk.f32.gmra.mxu0 %vm272_vm0, %v12326_v45  ;;  %9732 = vmatprep.mubr.msk.f32.mxu1 %vm272_vm0, %v5041_v3  ;;  %v9684_v3 = vpop.f32.mrf.mxu0 }
 0x2ac   : > { %9782 = vmatprep.mubr.msk.f32.mxu0 %vm272_vm0, %v11963_v62  ;;  %v12353_v62 = vld [vmem:[%s13492_s4 + $0x38] sm:$0xff] }
 0x2ae   : > { %9733 = vmatmul.mubr.msk.f32.vlgmr.msra.gmra.mxu1 %vm272_vm0, %v5042_v37  ;;  %v12364_v37 = vld [vmem:[#allocation3 + $0x22] sm:$0xff] }
 0x2af   : > { %9783 = vmatmul.mubr.msk.f32.vlgmr.msra.gmra.mxu0 %vm272_vm0, %v11967_v58  ;;  %9831 = vmatpush3.msra.mxu1 %v10092_v35  ;;  %v4623_v58 = vadd.f32 %v9634_v57, %v12338_v17  ;;  %v12374_v57 = vld [vmem:[#allocation3 + $0x32] sm:$0xff]  ;;  %v12386_v35 = vld [vmem:[#allocation3 + $0x4a] sm:$0xff] }
 0x2b0   : > { %9735 = vmatprep.mubr.msk.f32.mxu1 %vm272_vm0, %v12343_v48  ;;  %9785 = vmatprep.mubr.msk.f32.mxu0 %vm272_vm0, %v11992_v34 }
 0x2b1   : > { %9881 = vmatpush3.msra.mxu0 %v11942_v38  ;;  %9930 = vmatprep.subr.mxu1 %v12348_v7  ;;  %v12368_v45 = vadd.f32 %v9684_v3, %v4623_v58  ;;  %v12380_v38 = vld [vmem:[#allocation3 + $0x3a] sm:$0xff]  ;;  %v12398_v58 = vld [vmem:[#allocation3 + $0x62] sm:$0xff] }
 0x2b2   : > { %9980 = vmatprep.subr.mxu0 %v12353_v62  ;;  %9736 = vmatmul.mubr.msk.f32.gmra.mxu1 %vm272_vm0, %v12364_v37  ;;  %v12410_v3 = vld [vmem:[#allocation3 + $0x7a] sm:$0xff] }
 0x2b3   : > { %13848 = vst [vmem:[#allocation76_spill] sm:$0xff] %v12368_v45  ;;  %9786 = vmatmul.mubr.msk.f32.gmra.mxu0 %vm272_vm0, %v11996_v16  ;;  %9738 = vmatprep.mubr.msk.f32.mxu1 %vm272_vm0, %v12374_v57  ;;  %v12392_v16 = vld [vmem:[#allocation3 + $0x52] sm:$0xff]  ;;  %v12416_v45 = vld [vmem:[#allocation3 + $0x82] sm:$0xff] }
 0x2b4   : > { %9788 = vmatprep.mubr.msk.f32.mxu0 %vm272_vm0, %v12021_v8 }
 0x2b6   : > { %9739 = vmatmul.mubr.msk.f32.gmra.mxu1 %vm272_vm0, %v12380_v38 }
 0x2b7   : > { %9789 = vmatmul.mubr.msk.f32.gmra.mxu0 %vm272_vm0, %v12025_v10  ;;  %9741 = vmatprep.mubr.msk.f32.mxu1 %vm272_vm0, %v12386_v35  ;;  %v12404_v10 = vld [vmem:[#allocation3 + $0x6a] sm:$0xff] }
 0x2b8   : > { %9791 = vmatprep.mubr.msk.f32.mxu0 %vm272_vm0, %v12050_v53 }
 0x2ba   : > { %9742 = vmatmul.mubr.msk.f32.gmra.mxu1 %vm272_vm0, %v12392_v16 }
 0x2bb   : > { %9792 = vmatmul.mubr.msk.f32.gmra.mxu0 %vm272_vm0, %v12054_v5  ;;  %9744 = vmatprep.mubr.msk.f32.mxu1 %vm272_vm0, %v12398_v58  ;;  %v12532_v5 = vld [vmem:[#allocation3 + $0x180] sm:$0xff] }
 0x2bc   : > { %9794 = vmatprep.mubr.msk.f32.mxu0 %vm272_vm0, %v12079_v63  ;;  %v12422_v63 = vld [vmem:[#allocation3 + $0x92] sm:$0xff]  ;;  %13849 = vst [vmem:[#allocation26_spill] sm:$0xff] %v12532_v5 }
 0x2be   : > { %9745 = vmatmul.mubr.msk.f32.gmra.mxu1 %vm272_vm0, %v12404_v10 }
 0x2bf   : > { %9795 = vmatmul.mubr.msk.f32.gmra.mxu0 %vm272_vm0, %v12083_v60  ;;  %9747 = vmatprep.mubr.msk.f32.mxu1 %vm272_vm0, %v12410_v3  ;;  %v12428_v60 = vld [vmem:[#allocation3 + $0x9a] sm:$0xff] }
 0x2c0   : > { %9797 = vmatprep.mubr.msk.f32.mxu0 %vm272_vm0, %v12108_v29  ;;  %v12434_v29 = vld [vmem:[#allocation3 + $0xaa] sm:$0xff] }
 0x2c2   : > { %9748 = vmatmul.mubr.msk.f32.gmra.mxu1 %vm272_vm0, %v12416_v45 }
 0x2c3   : > { %9798 = vmatmul.mubr.msk.f32.gmra.mxu0 %vm272_vm0, %v12112_v49  ;;  %9750 = vmatprep.mubr.msk.f32.mxu1 %vm272_vm0, %v12422_v63  ;;  %v12440_v49 = vld [vmem:[#allocation3 + $0xb2] sm:$0xff] }
 0x2c4   : > { %9800 = vmatprep.mubr.msk.f32.mxu0 %vm272_vm0, %v12137_v55  ;;  %v12446_v55 = vld [vmem:[#allocation3 + $0xc2] sm:$0xff] }
 0x2c6   : > { %9751 = vmatmul.mubr.msk.f32.gmra.mxu1 %vm272_vm0, %v12428_v60 }
 0x2c7   : > { %9801 = vmatmul.mubr.msk.f32.gmra.mxu0 %vm272_vm0, %v12141_v24  ;;  %9753 = vmatprep.mubr.msk.f32.mxu1 %vm272_vm0, %v12434_v29  ;;  %v12452_v24 = vld [vmem:[#allocation3 + $0xca] sm:$0xff] }
 0x2c8   : > { %9803 = vmatprep.mubr.msk.f32.mxu0 %vm272_vm0, %v12166_v42  ;;  %v12458_v42 = vld [vmem:[#allocation3 + $0xda] sm:$0xff] }
 0x2ca   : > { %9754 = vmatmul.mubr.msk.f32.gmra.mxu1 %vm272_vm0, %v12440_v49 }
 0x2cb   : > { %9804 = vmatmul.mubr.msk.f32.gmra.mxu0 %vm272_vm0, %v12170_v1  ;;  %9756 = vmatprep.mubr.msk.f32.mxu1 %vm272_vm0, %v12446_v55  ;;  %v12464_v1 = vld [vmem:[#allocation3 + $0xe2] sm:$0xff] }
 0x2cc   : > { %9806 = vmatprep.mubr.msk.f32.mxu0 %vm272_vm0, %v12193_v44  ;;  %v12470_v44 = vld [vmem:[#allocation3 + $0xf2] sm:$0xff] }
 0x2ce   : > { %9757 = vmatmul.mubr.msk.f32.gmra.mxu1 %vm272_vm0, %v12452_v24 }
 0x2cf   : > { %9807 = vmatmul.mubr.msk.f32.gmra.mxu0 %vm272_vm0, %v12197_v30  ;;  %9759 = vmatprep.mubr.msk.f32.mxu1 %vm272_vm0, %v12458_v42  ;;  %v12476_v30 = vld [vmem:[#allocation3 + $0xfa] sm:$0xff] }
 0x2d0   : > { %9809 = vmatprep.mubr.msk.f32.mxu0 %vm272_vm0, %v12220_v41  ;;  %v12482_v41 = vld [vmem:[#allocation3 + $0x10a] sm:$0xff] }
 0x2d2   : > { %9760 = vmatmul.mubr.msk.f32.gmra.mxu1 %vm272_vm0, %v12464_v1 }
 0x2d3   : > { %9810 = vmatmul.mubr.msk.f32.gmra.mxu0 %vm272_vm0, %v12224_v23  ;;  %9762 = vmatprep.mubr.msk.f32.mxu1 %vm272_vm0, %v12470_v44  ;;  %v12488_v23 = vld [vmem:[#allocation3 + $0x112] sm:$0xff] }
 0x2d4   : > { %9812 = vmatprep.mubr.msk.f32.mxu0 %vm272_vm0, %v12244_v61  ;;  %v12494_v61 = vld [vmem:[#allocation3 + $0x122] sm:$0xff] }
 0x2d6   : > { %9763 = vmatmul.mubr.msk.f32.gmra.mxu1 %vm272_vm0, %v12476_v30 }
 0x2d7   : > { %9813 = vmatmul.mubr.msk.f32.gmra.mxu0 %vm272_vm0, %v12248_v28  ;;  %9765 = vmatprep.mubr.msk.f32.mxu1 %vm272_vm0, %v12482_v41  ;;  %v12500_v28 = vld [vmem:[#allocation3 + $0x12a] sm:$0xff] }
 0x2d8   : > { %9815 = vmatprep.mubr.msk.f32.mxu0 %vm272_vm0, %v12263_v59  ;;  %v12506_v59 = vld [vmem:[#allocation3 + $0x13a] sm:$0xff] }
 0x2da   : > { %9766 = vmatmul.mubr.msk.f32.gmra.mxu1 %vm272_vm0, %v12488_v23 }
 0x2db   : > { %9816 = vmatmul.mubr.msk.f32.gmra.mxu0 %vm272_vm0, %v12267_v27  ;;  %9768 = vmatprep.mubr.msk.f32.mxu1 %vm272_vm0, %v12494_v61  ;;  %v12512_v27 = vld [vmem:[#allocation3 + $0x142] sm:$0xff] }
 0x2dc   : > { %9818 = vmatprep.mubr.msk.f32.mxu0 %vm272_vm0, %v12281_v18  ;;  %v12518_v18 = vld [vmem:[#allocation3 + $0x152] sm:$0xff] }
 0x2de   : > { %9769 = vmatmul.mubr.msk.f32.gmra.mxu1 %vm272_vm0, %v12500_v28 }
 0x2df   : > { %9819 = vmatmul.mubr.msk.f32.gmra.mxu0 %vm272_vm0, %v12285_v19  ;;  %9771 = vmatprep.mubr.msk.f32.mxu1 %vm272_vm0, %v12506_v59  ;;  %v12524_v19 = vld [vmem:[#allocation3 + $0x15a] sm:$0xff] }
 0x2e0   : > { %9821 = vmatprep.mubr.msk.f32.mxu0 %vm272_vm0, %v12299_v43  ;;  %v12530_v43 = vld [vmem:[#allocation3 + $0x16a] sm:$0xff] }
 0x2e2   : > { %9772 = vmatmul.mubr.msk.f32.gmra.mxu1 %vm272_vm0, %v12512_v27 }
 0x2e3   : > { %9822 = vmatmul.mubr.msk.f32.gmra.mxu0 %vm272_vm0, %v12303_v2  ;;  %9774 = vmatprep.mubr.msk.f32.mxu1 %vm272_vm0, %v12518_v18  ;;  %v12538_v2 = vld [vmem:[#allocation3 + $0x172] sm:$0xff] }
 0x2e4   : > { %9824 = vmatprep.mubr.msk.f32.mxu0 %vm272_vm0, %v12316_v54  ;;  %v12540_v54 = vld [vmem:[#allocation3 + $0x188] sm:$0xff] }
 0x2e6   : > { %9775 = vmatmul.mubr.msk.f32.gmra.mxu1 %vm272_vm0, %v12524_v19 }
 0x2e7   : > { %9825 = vmatmul.mubr.msk.f32.gmra.mxu0 %vm272_vm0, %v12320_v6  ;;  %9777 = vmatprep.mubr.msk.f32.mxu1 %vm272_vm0, %v12530_v43 }
 0x2e8   : > { %9827 = vmatprep.mubr.msk.f32.mxu0 %vm272_vm0, %v12532_v5  ;;  %v12557_v5 = vld [vmem:[%s13492_s4 + $0x40] sm:$0xff] }
 0x2ea   : > { %9778 = vmatmul.mubr.msk.f32.gmra.mxu1 %vm272_vm0, %v12538_v2 }
 0x2eb   : > { %9828 = vmatmul.mubr.msk.f32.gmra.mxu0 %vm272_vm0, %v12540_v54  ;;  %9832 = vmatprep.mubr.msk.f32.mxu1 %vm272_vm0, %v11965_v15  ;;  %v13850_v15 = vld [vmem:[#allocation32_spill] sm:$0xff] }
 0x2ec   : > { %9882 = vmatprep.mubr.msk.f32.mxu0 %vm272_vm0, %v12343_v48 }
 0x2ee   : > { %9833 = vmatmul.mubr.msk.f32.vlgmr.msra.gmra.mxu1 %vm272_vm0, %v11978_v51  ;;  %v13851_v51 = vld [vmem:[#allocation6_spill] sm:$0xff] }
 0x2ef   : > { %9883 = vmatmul.mubr.msk.f32.vlgmr.msra.gmra.mxu0 %vm272_vm0, %v12364_v37  ;;  %9931 = vmatpush3.msra.mxu1 %v12348_v7 }
 0x2f0   : > { %9835 = vmatprep.mubr.msk.f32.mxu1 %vm272_vm0, %v11994_v52  ;;  %9885 = vmatprep.mubr.msk.f32.mxu0 %vm272_vm0, %v12374_v57 }
 0x2f1   : > { %9981 = vmatpush3.msra.mxu0 %v12353_v62  ;;  %10030 = vmatprep.subr.mxu1 %v12557_v5  ;;  %v13857_v62 = vld [vmem:[#allocation31_spill] sm:$0xff] }
 0x2f2   : > { %9836 = vmatmul.mubr.msk.f32.gmra.mxu1 %vm272_vm0, %v12007_v39  ;;  %v13852_v39 = vld [vmem:[#allocation16_spill] sm:$0xff] }
 0x2f3   : > { %9886 = vmatmul.mubr.msk.f32.gmra.mxu0 %vm272_vm0, %v12380_v38  ;;  %9838 = vmatprep.mubr.msk.f32.mxu1 %vm272_vm0, %v12023_v12 }
 0x2f4   : > { %9888 = vmatprep.mubr.msk.f32.mxu0 %vm272_vm0, %v12386_v35 }
 0x2f6   : > { %9839 = vmatmul.mubr.msk.f32.gmra.mxu1 %vm272_vm0, %v12036_v46  ;;  %v13853_v46 = vld [vmem:[#allocation21_spill] sm:$0xff] }
 0x2f7   : > { %9889 = vmatmul.mubr.msk.f32.gmra.mxu0 %vm272_vm0, %v12392_v16  ;;  %9841 = vmatprep.mubr.msk.f32.mxu1 %vm272_vm0, %v12052_v33  ;;  %v13858_v16 = vld [vmem:[#allocation29_spill] sm:$0xff] }
 0x2f8   : > { %9891 = vmatprep.mubr.msk.f32.mxu0 %vm272_vm0, %v12398_v58 }
 0x2fa   : > { %9842 = vmatmul.mubr.msk.f32.gmra.mxu1 %vm272_vm0, %v12065_v21 }
 0x2fb   : > { %9892 = vmatmul.mubr.msk.f32.gmra.mxu0 %vm272_vm0, %v12404_v10  ;;  %9844 = vmatprep.mubr.msk.f32.mxu1 %vm272_vm0, %v12081_v56 }
 0x2fc   : > { %9894 = vmatprep.mubr.msk.f32.mxu0 %vm272_vm0, %v12410_v3 }
 0x2fe   : > { %9845 = vmatmul.mubr.msk.f32.gmra.mxu1 %vm272_vm0, %v12094_v32 }
 0x2ff   : > { %9895 = vmatmul.mubr.msk.f32.gmra.mxu0 %vm272_vm0, %v12416_v45  ;;  %9847 = vmatprep.mubr.msk.f32.mxu1 %vm272_vm0, %v12110_v40 }
 0x300   : > { %9897 = vmatprep.mubr.msk.f32.mxu0 %vm272_vm0, %v12422_v63  ;;  %v13854_v63 = vld [vmem:[#allocation79_spill] sm:$0xff] }
 0x302   : > { %9848 = vmatmul.mubr.msk.f32.gmra.mxu1 %vm272_vm0, %v12123_v26 }
 0x303   : > { %9898 = vmatmul.mubr.msk.f32.gmra.mxu0 %vm272_vm0, %v12428_v60  ;;  %9850 = vmatprep.mubr.msk.f32.mxu1 %vm272_vm0, %v13850_v15  ;;  %v12674_v60 = vld [vmem:[#allocation3 + $0x181] sm:$0xff] }
 0x304   : > { %9900 = vmatprep.mubr.msk.f32.mxu0 %vm272_vm0, %v12434_v29  ;;  %v12676_v29 = vld [vmem:[#allocation3 + $0x182] sm:$0xff] }
 0x306   : > { %9851 = vmatmul.mubr.msk.f32.gmra.mxu1 %vm272_vm0, %v13851_v51 }
 0x307   : > { %9901 = vmatmul.mubr.msk.f32.gmra.mxu0 %vm272_vm0, %v12440_v49  ;;  %9853 = vmatprep.mubr.msk.f32.mxu1 %vm272_vm0, %v12168_v0  ;;  %v12682_v49 = vld [vmem:[#allocation3 + $0x189] sm:$0xff] }
 0x308   : > { %9903 = vmatprep.mubr.msk.f32.mxu0 %vm272_vm0, %v12446_v55  ;;  %v12684_v55 = vld [vmem:[#allocation3 + $0x18a] sm:$0xff] }
 0x30a   : > { %9854 = vmatmul.mubr.msk.f32.gmra.mxu1 %vm272_vm0, %v13852_v39 }
 0x30b   : > { %9904 = vmatmul.mubr.msk.f32.gmra.mxu0 %vm272_vm0, %v12452_v24  ;;  %9856 = vmatprep.mubr.msk.f32.mxu1 %vm272_vm0, %v12195_v9  ;;  %v6978_v24 = vld [vmem:[#allocation3 + $0x39] sm:$0xff] }
 0x30c   : > { %9906 = vmatprep.mubr.msk.f32.mxu0 %vm272_vm0, %v12458_v42  ;;  %v6591_v42 = vld [vmem:[#allocation3 + $0x38] sm:$0xff] }
 0x30e   : > { %9857 = vmatmul.mubr.msk.f32.gmra.mxu1 %vm272_vm0, %v12208_v14 }
 0x30f   : > { %9907 = vmatmul.mubr.msk.f32.gmra.mxu0 %vm272_vm0, %v12464_v1  ;;  %9859 = vmatprep.mubr.msk.f32.mxu1 %vm272_vm0, %v12222_v22  ;;  %v12696_v1 = vpop.f32.mrf.mxu0 }
 0x310   : > { %9909 = vmatprep.mubr.msk.f32.mxu0 %vm272_vm0, %v12470_v44  ;;  %v12701_v44 = vpop.f32.mrf.mxu1 }
 0x312   : > { %9860 = vmatmul.mubr.msk.f32.gmra.mxu1 %vm272_vm0, %v13853_v46 }
 0x313   : > { %9910 = vmatmul.mubr.msk.f32.gmra.mxu0 %vm272_vm0, %v12476_v30  ;;  %9862 = vmatprep.mubr.msk.f32.mxu1 %vm272_vm0, %v12246_v11 }
 0x314   : > { %9912 = vmatprep.mubr.msk.f32.mxu0 %vm272_vm0, %v12482_v41 }
 0x316   : > { %9863 = vmatmul.mubr.msk.f32.gmra.mxu1 %vm272_vm0, %v12256_v13 }
 0x317   : > { %9913 = vmatmul.mubr.msk.f32.gmra.mxu0 %vm272_vm0, %v12488_v23  ;;  %9865 = vmatprep.mubr.msk.f32.mxu1 %vm272_vm0, %v12265_v36 }
 0x318   : > { %9915 = vmatprep.mubr.msk.f32.mxu0 %vm272_vm0, %v12494_v61 }
 0x31a   : > { %9866 = vmatmul.mubr.msk.f32.gmra.mxu1 %vm272_vm0, %v12274_v4 }
 0x31b   : > { %9916 = vmatmul.mubr.msk.f32.gmra.mxu0 %vm272_vm0, %v12500_v28  ;;  %9868 = vmatprep.mubr.msk.f32.mxu1 %vm272_vm0, %v12283_v25 }
 0x31c   : > { %9918 = vmatprep.mubr.msk.f32.mxu0 %vm272_vm0, %v12506_v59 }
 0x31e   : > { %9869 = vmatmul.mubr.msk.f32.gmra.mxu1 %vm272_vm0, %v12292_v20 }
 0x31f   : > { %9919 = vmatmul.mubr.msk.f32.gmra.mxu0 %vm272_vm0, %v12512_v27  ;;  %9871 = vmatprep.mubr.msk.f32.mxu1 %vm272_vm0, %v12301_v31  ;;  %v13855_v27 = vld [vmem:[#allocation27_spill] sm:$0xff] }
 0x320   : > { %9921 = vmatprep.mubr.msk.f32.mxu0 %vm272_vm0, %v12518_v18 }
 0x322   : > { %9872 = vmatmul.mubr.msk.f32.gmra.mxu1 %vm272_vm0, %v12310_v47 }
 0x323   : > { %9922 = vmatmul.mubr.msk.f32.gmra.mxu0 %vm272_vm0, %v12524_v19  ;;  %9874 = vmatprep.mubr.msk.f32.mxu1 %vm272_vm0, %v12318_v50  ;;  %v13856_v19 = vld [vmem:[#allocation15_spill] sm:$0xff] }
 0x324   : > { %9924 = vmatprep.mubr.msk.f32.mxu0 %vm272_vm0, %v12530_v43 }
 0x326   : > { %9875 = vmatmul.mubr.msk.f32.gmra.mxu1 %vm272_vm0, %v13854_v63 }
 0x327   : > { %9925 = vmatmul.mubr.msk.f32.gmra.mxu0 %vm272_vm0, %v12538_v2  ;;  %9877 = vmatprep.mubr.msk.f32.mxu1 %vm272_vm0, %v12674_v60 }
 0x328   : > { %9927 = vmatprep.mubr.msk.f32.mxu0 %vm272_vm0, %v12676_v29 }
 0x32a   : > { %9878 = vmatmul.mubr.msk.f32.gmra.mxu1 %vm272_vm0, %v12682_v49 }
 0x32b   : > { %9928 = vmatmul.mubr.msk.f32.gmra.mxu0 %vm272_vm0, %v12684_v55  ;;  %9932 = vmatprep.mubr.msk.f32.mxu1 %vm272_vm0, %v11992_v34  ;;  %v6593_v34 = vld [vmem:[#allocation3 + $0x50] sm:$0xff] }
 0x32c   : > { %9982 = vmatprep.mubr.msk.f32.mxu0 %vm272_vm0, %v11994_v52  ;;  %v6980_v52 = vld [vmem:[#allocation3 + $0x51] sm:$0xff] }
 0x32e   : > { %9933 = vmatmul.mubr.msk.f32.vlgmr.msra.gmra.mxu1 %vm272_vm0, %v6591_v42 }
 0x32f   : > { %9983 = vmatmul.mubr.msk.f32.vlgmr.msra.gmra.mxu0 %vm272_vm0, %v6978_v24  ;;  %10031 = vmatpush3.msra.mxu1 %v12557_v5  ;;  %v9637_v30 = vpop.f32.mrf.mxu1 }
 0x330   : > { %9935 = vmatprep.mubr.msk.f32.mxu1 %vm272_vm0, %v12021_v8  ;;  %9985 = vmatprep.mubr.msk.f32.mxu0 %vm272_vm0, %v12023_v12  ;;  %v9687_v41 = vpop.f32.mrf.mxu0  ;;  %v4625_v23 = vadd.f32 %v9637_v30, %v12338_v17  ;;  %v13860_v30 = vld [vmem:[#allocation4_spill] sm:$0xff] }
 0x331   : > { %v4473_v8 = vpop.f32.mrf.mxu1 }
 0x332   : > { %9936 = vmatmul.mubr.msk.f32.gmra.mxu1 %vm272_vm0, %v6593_v34  ;;  %v4860_v5 = vpop.f32.mrf.mxu0  ;;  %v12712_v61 = vadd.f32 %v9687_v41, %v4625_v23  ;;  %v4624_v12 = vadd.f32 %v12338_v17, %v4473_v8  ;;  %v13859_v34 = vld [vmem:[#allocation9_spill] sm:$0xff] }
 0x333   : > { %9986 = vmatmul.mubr.msk.f32.gmra.mxu0 %vm272_vm0, %v6980_v52  ;;  %9938 = vmatprep.mubr.msk.f32.mxu1 %vm272_vm0, %v12050_v53  ;;  %v9640_v28 = vpop.f32.mrf.mxu1 }
 0x334   : > { %9988 = vmatprep.mubr.msk.f32.mxu0 %vm272_vm0, %v12052_v33  ;;  %v9690_v59 = vpop.f32.mrf.mxu0  ;;  %v12719_v18 = vadd.f32 %v4860_v5, %v4624_v12  ;;  %v4627_v53 = vadd.f32 %v9640_v28, %v12338_v17  ;;  %v13861_v28 = vld [vmem:[#allocation5_spill] sm:$0xff] }
 0x335   : > { %v4483_v33 = vpop.f32.mrf.mxu1 }
 0x336   : > { %9939 = vmatmul.mubr.msk.f32.gmra.mxu1 %vm272_vm0, %v13855_v27  ;;  %v4870_v43 = vpop.f32.mrf.mxu0  ;;  %v12726_v2 = vadd.f32 %v9690_v59, %v4627_v53  ;;  %v4626_v45 = vadd.f32 %v12338_v17, %v4483_v33  ;;  %v13862_v27 = vld [vmem:[#allocation11_spill] sm:$0xff] }
 0x337   : > { %9989 = vmatmul.mubr.msk.f32.gmra.mxu0 %vm272_vm0, %v12065_v21  ;;  %9941 = vmatprep.mubr.msk.f32.mxu1 %vm272_vm0, %v13856_v19  ;;  %v9643_v48 = vpop.f32.mrf.mxu1 }
 0x338   : > { %9991 = vmatprep.mubr.msk.f32.mxu0 %vm272_vm0, %v12081_v56  ;;  %v9693_v7 = vpop.f32.mrf.mxu0  ;;  %v12733_v21 = vadd.f32 %v4870_v43, %v4626_v45  ;;  %v4629_v37 = vadd.f32 %v9643_v48, %v12338_v17  ;;  %v13863_v48 = vld [vmem:[#allocation17_spill] sm:$0xff] }
 0x339   : > { %v4493_v56 = vpop.f32.mrf.mxu1 }
 0x33a   : > { %9942 = vmatmul.mubr.msk.f32.gmra.mxu1 %vm272_vm0, %v13857_v62  ;;  %v4880_v58 = vpop.f32.mrf.mxu0  ;;  %v12740_v10 = vadd.f32 %v9693_v7, %v4629_v37  ;;  %v4628_v3 = vadd.f32 %v12338_v17, %v4493_v56  ;;  %v13864_v62 = vld [vmem:[#allocation7_spill] sm:$0xff] }
 0x33b   : > { %9992 = vmatmul.mubr.msk.f32.gmra.mxu0 %vm272_vm0, %v12094_v32  ;;  %9944 = vmatprep.mubr.msk.f32.mxu1 %vm272_vm0, %v13858_v16  ;;  %v9646_v42 = vpop.f32.mrf.mxu1 }
 0x33c   : > { %9994 = vmatprep.mubr.msk.f32.mxu0 %vm272_vm0, %v12110_v40  ;;  %v9696_v24 = vpop.f32.mrf.mxu0  ;;  %v12747_v32 = vadd.f32 %v4880_v58, %v4628_v3  ;;  %v4631_v52 = vadd.f32 %v9646_v42, %v12338_v17  ;;  %v13865_v42 = vld [vmem:[#allocation8_spill] sm:$0xff] }
 0x33d   : > { %v4503_v40 = vpop.f32.mrf.mxu1 }
 0x33e   : > { %9945 = vmatmul.mubr.msk.f32.gmra.mxu1 %vm272_vm0, %v13859_v34  ;;  %v4890_v41 = vpop.f32.mrf.mxu0  ;;  %v12754_v23 = vadd.f32 %v9696_v24, %v4631_v52  ;;  %v4630_v8 = vadd.f32 %v12338_v17, %v4503_v40  ;;  %v13866_v34 = vld [vmem:[#allocation10_spill] sm:$0xff] }
 0x33f   : > { %9995 = vmatmul.mubr.msk.f32.gmra.mxu0 %vm272_vm0, %v12123_v26  ;;  %9947 = vmatprep.mubr.msk.f32.mxu1 %vm272_vm0, %v13860_v30  ;;  %v9649_v5 = vpop.f32.mrf.mxu1 }
 0x340   : > { %9997 = vmatprep.mubr.msk.f32.mxu0 %vm272_vm0, %v13850_v15  ;;  %v9699_v12 = vpop.f32.mrf.mxu0  ;;  %v12761_v26 = vadd.f32 %v4890_v41, %v4630_v8  ;;  %v4633_v59 = vadd.f32 %v9649_v5, %v12338_v17  ;;  %v13867_v5 = vld [vmem:[#allocation18_spill] sm:$0xff] }
 0x341   : > { %v4513_v15 = vpop.f32.mrf.mxu1 }
 0x342   : > { %9948 = vmatmul.mubr.msk.f32.gmra.mxu1 %vm272_vm0, %v13861_v28  ;;  %v4900_v53 = vpop.f32.mrf.mxu0  ;;  %v12768_v19 = vadd.f32 %v9699_v12, %v4633_v59  ;;  %v4632_v33 = vadd.f32 %v12338_v17, %v4513_v15  ;;  %v13868_v28 = vld [vmem:[#allocation12_spill] sm:$0xff] }
 0x343   : > { %9998 = vmatmul.mubr.msk.f32.gmra.mxu0 %vm272_vm0, %v13851_v51  ;;  %9950 = vmatprep.mubr.msk.f32.mxu1 %vm272_vm0, %v13862_v27  ;;  %v9652_v43 = vpop.f32.mrf.mxu1 }
 0x344   : > { %10000 = vmatprep.mubr.msk.f32.mxu0 %vm272_vm0, %v12168_v0  ;;  %v9702_v45 = vpop.f32.mrf.mxu0  ;;  %v12775_v51 = vadd.f32 %v4900_v53, %v4632_v33  ;;  %v4635_v7 = vadd.f32 %v9652_v43, %v12338_v17  ;;  %v13869_v43 = vld [vmem:[#allocation20_spill] sm:$0xff] }
 0x345   : > { %v4523_v0 = vpop.f32.mrf.mxu1 }
 0x346   : > { %9951 = vmatmul.mubr.msk.f32.gmra.mxu1 %vm272_vm0, %v13863_v48  ;;  %v4910_v37 = vpop.f32.mrf.mxu0  ;;  %v12782_v16 = vadd.f32 %v9702_v45, %v4635_v7  ;;  %v4634_v56 = vadd.f32 %v12338_v17, %v4523_v0  ;;  %v13870_v48 = vld [vmem:[#allocation19_spill] sm:$0xff] }
 0x347   : > { %10001 = vmatmul.mubr.msk.f32.gmra.mxu0 %vm272_vm0, %v13852_v39  ;;  %9953 = vmatprep.mubr.msk.f32.mxu1 %vm272_vm0, %v13864_v62 }
 0x348   : > { %10003 = vmatprep.mubr.msk.f32.mxu0 %vm272_vm0, %v12195_v9  ;;  %v9655_v58 = vpop.f32.mrf.mxu1  ;;  %v12789_v39 = vadd.f32 %v4910_v37, %v4634_v56 }
 0x349   : > { %v9705_v3 = vpop.f32.mrf.mxu0  ;;  %v4637_v24 = vadd.f32 %v9655_v58, %v12338_v17  ;;  %v13871_v58 = vld [vmem:[#allocation22_spill] sm:$0xff] }
 0x34a   : > { %9954 = vmatmul.mubr.msk.f32.gmra.mxu1 %vm272_vm0, %v13865_v42  ;;  %v4533_v9 = vpop.f32.mrf.mxu1  ;;  %v13872_v42 = vld [vmem:[#allocation25_spill] sm:$0xff] }
 0x34b   : > { %10004 = vmatmul.mubr.msk.f32.gmra.mxu0 %vm272_vm0, %v12208_v14  ;;  %9956 = vmatprep.mubr.msk.f32.mxu1 %vm272_vm0, %v13866_v34  ;;  %v4920_v52 = vpop.f32.mrf.mxu0  ;;  %v12796_v30 = vadd.f32 %v9705_v3, %v4637_v24  ;;  %v4636_v40 = vadd.f32 %v12338_v17, %v4533_v9 }
 0x34c   : > { %10006 = vmatprep.mubr.msk.f32.mxu0 %vm272_vm0, %v12222_v22  ;;  %v9658_v41 = vpop.f32.mrf.mxu1 }
 0x34d   : > { %v9708_v8 = vpop.f32.mrf.mxu0  ;;  %v12803_v14 = vadd.f32 %v4920_v52, %v4636_v40  ;;  %v4639_v12 = vadd.f32 %v9658_v41, %v12338_v17  ;;  %v13873_v41 = vld [vmem:[#allocation75_spill] sm:$0xff] }
 0x34e   : > { %9957 = vmatmul.mubr.msk.f32.gmra.mxu1 %vm272_vm0, %v13867_v5  ;;  %v4543_v22 = vpop.f32.mrf.mxu1  ;;  %v13874_v5 = vld [vmem:[#allocation13_spill] sm:$0xff] }
 0x34f   : > { %10007 = vmatmul.mubr.msk.f32.gmra.mxu0 %vm272_vm0, %v13853_v46  ;;  %9959 = vmatprep.mubr.msk.f32.mxu1 %vm272_vm0, %v13868_v28  ;;  %v4930_v59 = vpop.f32.mrf.mxu0  ;;  %v12810_v27 = vadd.f32 %v9708_v8, %v4639_v12  ;;  %v4638_v15 = vadd.f32 %v12338_v17, %v4543_v22 }
 0x350   : > { %10009 = vmatprep.mubr.msk.f32.mxu0 %vm272_vm0, %v12246_v11  ;;  %v9661_v53 = vpop.f32.mrf.mxu1 }
 0x351   : > { %v9711_v33 = vpop.f32.mrf.mxu0  ;;  %v12817_v46 = vadd.f32 %v4930_v59, %v4638_v15  ;;  %v4641_v45 = vadd.f32 %v9661_v53, %v12338_v17  ;;  %v13875_v53 = vld [vmem:[#allocation24_spill] sm:$0xff] }
 0x352   : > { %9960 = vmatmul.mubr.msk.f32.gmra.mxu1 %vm272_vm0, %v13869_v43  ;;  %v4553_v11 = vpop.f32.mrf.mxu1  ;;  %v13876_v43 = vld [vmem:[#allocation23_spill] sm:$0xff] }
 0x353   : > { %10010 = vmatmul.mubr.msk.f32.gmra.mxu0 %vm272_vm0, %v12256_v13  ;;  %9962 = vmatprep.mubr.msk.f32.mxu1 %vm272_vm0, %v13870_v48  ;;  %v4940_v7 = vpop.f32.mrf.mxu0  ;;  %v12824_v62 = vadd.f32 %v9711_v33, %v4641_v45  ;;  %v4640_v0 = vadd.f32 %v12338_v17, %v4553_v11 }
 0x354   : > { %10012 = vmatprep.mubr.msk.f32.mxu0 %vm272_vm0, %v12265_v36 }
 0x355   : > { %v9664_v37 = vpop.f32.mrf.mxu1  ;;  %v12831_v13 = vadd.f32 %v4940_v7, %v4640_v0 }
 0x356   : > { %v9714_v56 = vpop.f32.mrf.mxu0  ;;  %9963 = vmatmul.mubr.msk.f32.gmra.mxu1 %vm272_vm0, %v13871_v58  ;;  %v4643_v3 = vadd.f32 %v9664_v37, %v12338_v17 }
 0x357   : > { %10013 = vmatmul.mubr.msk.f32.gmra.mxu0 %vm272_vm0, %v12274_v4  ;;  %9965 = vmatprep.mubr.msk.f32.mxu1 %vm272_vm0, %v13872_v42  ;;  %v4563_v36 = vpop.f32.mrf.mxu1  ;;  %v7007_v42 = vld [vmem:[#allocation3 + $0x199] sm:$0xff] }
 0x358   : > { %10015 = vmatprep.mubr.msk.f32.mxu0 %vm272_vm0, %v12283_v25  ;;  %v4950_v24 = vpop.f32.mrf.mxu0  ;;  %v12838_v34 = vadd.f32 %v9714_v56, %v4643_v3  ;;  %v4642_v9 = vadd.f32 %v12338_v17, %v4563_v36  ;;  %v13877_v56 = vld [vmem:[#allocation26_spill] sm:$0xff]  ;;  %v6620_v3 = vld [vmem:[#allocation3 + $0x198] sm:$0xff] }
 0x359   : > { %v9667_v52 = vpop.f32.mrf.mxu1 }
 0x35a   : > { %v9717_v40 = vpop.f32.mrf.mxu0  ;;  %9966 = vmatmul.mubr.msk.f32.gmra.mxu1 %vm272_vm0, %v13873_v41  ;;  %v12845_v4 = vadd.f32 %v4950_v24, %v4642_v9  ;;  %v4645_v8 = vadd.f32 %v9667_v52, %v12338_v17  ;;  %v6621_v52 = vld [vmem:[#allocation3 + $0x1a0] sm:$0xff] }
 0x35b   : > { %10016 = vmatmul.mubr.msk.f32.gmra.mxu0 %vm272_vm0, %v12292_v20  ;;  %9968 = vmatprep.mubr.msk.f32.mxu1 %vm272_vm0, %v13874_v5  ;;  %v4573_v25 = vpop.f32.mrf.mxu1 }
 0x35c   : > { %10018 = vmatprep.mubr.msk.f32.mxu0 %vm272_vm0, %v12301_v31  ;;  %v4960_v12 = vpop.f32.mrf.mxu0  ;;  %v12852_v28 = vadd.f32 %v9717_v40, %v4645_v8  ;;  %v4644_v22 = vadd.f32 %v12338_v17, %v4573_v25  ;;  %v7008_v40 = vld [vmem:[#allocation3 + $0x1a1] sm:$0xff] }
 0x35e   : > { %v9670_v59 = vpop.f32.mrf.mxu1  ;;  %9969 = vmatmul.mubr.msk.f32.gmra.mxu1 %vm272_vm0, %v13875_v53  ;;  %v12859_v20 = vadd.f32 %v4960_v12, %v4644_v22 }
 0x35f   : > { %v9720_v15 = vpop.f32.mrf.mxu0  ;;  %10019 = vmatmul.mubr.msk.f32.gmra.mxu0 %vm272_vm0, %v12310_v47  ;;  %v4647_v33 = vadd.f32 %v9670_v59, %v12338_v17  ;;  %9971 = vmatprep.mubr.msk.f32.mxu1 %vm272_vm0, %v13876_v43 }
 0x360   : > { %10021 = vmatprep.mubr.msk.f32.mxu0 %vm272_vm0, %v12318_v50  ;;  %v4583_v31 = vpop.f32.mrf.mxu1 }
 0x361   : > { %v4970_v45 = vpop.f32.mrf.mxu0  ;;  %v12866_v48 = vadd.f32 %v9720_v15, %v4647_v33  ;;  %v4646_v11 = vadd.f32 %v12338_v17, %v4583_v31 }
 0x362   : > { %v9673_v7 = vpop.f32.mrf.mxu1  ;;  %9972 = vmatmul.mubr.msk.f32.gmra.mxu1 %vm272_vm0, %v12320_v6 }
 0x363   : > { %v9723_v0 = vpop.f32.mrf.mxu0  ;;  %10022 = vmatmul.mubr.msk.f32.gmra.mxu0 %vm272_vm0, %v13854_v63  ;;  %v12873_v47 = vadd.f32 %v4970_v45, %v4646_v11  ;;  %v4649_v37 = vadd.f32 %v9673_v7, %v12338_v17  ;;  %9974 = vmatprep.mubr.msk.f32.mxu1 %vm272_vm0, %v13877_v56  ;;  %v13878_v7 = vld [vmem:[#allocation76_spill] sm:$0xff] }
 0x364   : > { %10024 = vmatprep.mubr.msk.f32.mxu0 %vm272_vm0, %v12674_v60  ;;  %v4593_v50 = vpop.f32.mrf.mxu1 }
 0x365   : > { %v4980_v58 = vpop.f32.mrf.mxu0  ;;  %v12880_v36 = vadd.f32 %v9723_v0, %v4649_v37  ;;  %v4648_v6 = vadd.f32 %v12338_v17, %v4593_v50 }
 0x366   : > { %v9676_v24 = vpop.f32.mrf.mxu1  ;;  %9975 = vmatmul.mubr.msk.f32.gmra.mxu1 %vm272_vm0, %v12540_v54 }
 0x367   : > { %v9726_v63 = vpop.f32.mrf.mxu0  ;;  %10025 = vmatmul.mubr.msk.f32.gmra.mxu0 %vm272_vm0, %v12682_v49  ;;  %v12887_v9 = vadd.f32 %v4980_v58, %v4648_v6  ;;  %v4651_v60 = vadd.f32 %v9676_v24, %v12338_v17  ;;  %9977 = vmatprep.mubr.msk.f32.mxu1 %vm272_vm0, %v6620_v3  ;;  %v4622_v49 = vadd.f32 %v12338_v17, %v12701_v44 }
 0x368   : > { %10027 = vmatprep.mubr.msk.f32.mxu0 %vm272_vm0, %v7007_v42  ;;  %v4603_v41 = vpop.f32.mrf.mxu1 }
 0x369   : > { %v4990_v8 = vpop.f32.mrf.mxu0  ;;  %v12892_v5 = vadd.f32 %v9726_v63, %v4651_v60  ;;  %v4650_v25 = vadd.f32 %v12338_v17, %v4603_v41  ;;  %v5009_v44 = vadd.f32 %v12696_v1, %v4622_v49  ;;  %v7369_v60 = vld [vmem:[#allocation3 + $0x6a] sm:$0xff]  ;;  %v7370_v41 = vld [vmem:[#allocation3 + $0x7a] sm:$0xff] }
 0x36a   : > { %v9679_v54 = vpop.f32.mrf.mxu1  ;;  %9978 = vmatmul.mubr.msk.f32.gmra.mxu1 %vm272_vm0, %v6621_v52 }
 0x36b   : > { %v9729_v12 = vpop.f32.mrf.mxu0  ;;  %10028 = vmatmul.mubr.msk.f32.gmra.mxu0 %vm272_vm0, %v7008_v40  ;;  %v12899_v22 = vadd.f32 %v4990_v8, %v4650_v25  ;;  %v4653_v59 = vadd.f32 %v9679_v54, %v12338_v17  ;;  %10032 = vmatprep.mubr.msk.f32.mxu1 %vm272_vm0, %v12374_v57 }
 0x36c   : > { %v4613_v15 = vpop.f32.mrf.mxu1 }
 0x36d   : > { %v5000_v53 = vpop.f32.mrf.mxu0  ;;  %v12904_v33 = vadd.f32 %v9729_v12, %v4653_v59  ;;  %v4652_v43 = vadd.f32 %v12338_v17, %v4613_v15  ;;  %v7367_v17 = vld [vmem:[#allocation3 + $0x52] sm:$0xff]  ;;  %v7371_v59 = vld [vmem:[#allocation3 + $0x82] sm:$0xff] }
 0x36e   : > { %v9734_v31 = vpop.f32.mrf.mxu1  ;;  %10033 = vmatmul.mubr.msk.f32.vlgmr.msra.gmra.mxu1 %vm272_vm0, %v12380_v38  ;;  %v7368_v38 = vld [vmem:[#allocation3 + $0x62] sm:$0xff] }
 0x36f   : > { %v9784_v45 = vpop.f32.mrf.mxu0  ;;  %v12910_v11 = vadd.f32 %v5000_v53, %v4652_v43  ;;  %v5397_v0 = vadd.f32 %v9734_v31, %v13878_v7  ;;  %10035 = vmatprep.mubr.msk.f32.mxu1 %vm272_vm0, %v12386_v35  ;;  %v7372_v53 = vld [vmem:[#allocation3 + $0x92] sm:$0xff] }
 0x370   : > { %v5237_v57 = vpop.f32.mrf.mxu1 }
 0x371   : > { %v5624_v37 = vpop.f32.mrf.mxu0  ;;  %v12915_v56 = vadd.f32 %v9784_v45, %v5397_v0  ;;  %v5396_v50 = vadd.f32 %v5237_v57, %v5009_v44  ;;  %v7373_v0 = vld [vmem:[#allocation3 + $0x9a] sm:$0xff] }
 0x372   : > { %v9737_v58 = vpop.f32.mrf.mxu1  ;;  %10036 = vmatmul.mubr.msk.f32.gmra.mxu1 %vm272_vm0, %v7367_v17 }
 0x373   : > { %v9787_v3 = vpop.f32.mrf.mxu0  ;;  %v12918_v42 = vadd.f32 %v5624_v37, %v5396_v50  ;;  %v5399_v1 = vadd.f32 %v9737_v58, %v12712_v61  ;;  %10038 = vmatprep.mubr.msk.f32.mxu1 %vm272_vm0, %v7368_v38  ;;  %v7374_v37 = vld [vmem:[#allocation3 + $0xaa] sm:$0xff] }
 0x374   : > { %v5247_v6 = vpop.f32.mrf.mxu1 }
 0x375   : > { %v5634_v24 = vpop.f32.mrf.mxu0  ;;  %v12922_v35 = vadd.f32 %v9787_v3, %v5399_v1  ;;  %v5398_v63 = vadd.f32 %v5247_v6, %v12719_v18  ;;  %v7375_v1 = vld [vmem:[#allocation3 + $0xb2] sm:$0xff] }
 0x376   : > { %v9740_v52 = vpop.f32.mrf.mxu1  ;;  %10039 = vmatmul.mubr.msk.f32.gmra.mxu1 %vm272_vm0, %v7369_v60 }
 0x377   : > { %v9790_v40 = vpop.f32.mrf.mxu0  ;;  %v12926_v8 = vadd.f32 %v5634_v24, %v5398_v63  ;;  %v5401_v25 = vadd.f32 %v9740_v52, %v12726_v2  ;;  %10041 = vmatprep.mubr.msk.f32.mxu1 %vm272_vm0, %v7370_v41  ;;  %v7376_v24 = vld [vmem:[#allocation3 + $0xc2] sm:$0xff] }
 0x378   : > { %v5257_v61 = vpop.f32.mrf.mxu1 }
 0x379   : > { %v5644_v54 = vpop.f32.mrf.mxu0  ;;  %v12930_v12 = vadd.f32 %v9790_v40, %v5401_v25  ;;  %v5400_v49 = vadd.f32 %v5257_v61, %v12733_v21  ;;  %v7377_v25 = vld [vmem:[#allocation3 + $0xca] sm:$0xff] }
 0x37a   : > { %v9743_v18 = vpop.f32.mrf.mxu1  ;;  %10042 = vmatmul.mubr.msk.f32.gmra.mxu1 %vm272_vm0, %v7371_v59 }
 0x37b   : > { %v9793_v15 = vpop.f32.mrf.mxu0  ;;  %v12934_v43 = vadd.f32 %v5644_v54, %v5400_v49  ;;  %v5403_v31 = vadd.f32 %v9743_v18, %v12740_v10  ;;  %10044 = vmatprep.mubr.msk.f32.mxu1 %vm272_vm0, %v7372_v53  ;;  %v7378_v54 = vld [vmem:[#allocation3 + $0xda] sm:$0xff] }
 0x37c   : > { %v5267_v2 = vpop.f32.mrf.mxu1 }
 0x37d   : > { %v5654_v45 = vpop.f32.mrf.mxu0  ;;  %v12938_v44 = vadd.f32 %v9793_v15, %v5403_v31  ;;  %v5402_v7 = vadd.f32 %v5267_v2, %v12747_v32  ;;  %v7379_v31 = vld [vmem:[#allocation3 + $0xe2] sm:$0xff] }
 0x37e   : > { %v9746_v21 = vpop.f32.mrf.mxu1  ;;  %10045 = vmatmul.mubr.msk.f32.gmra.mxu1 %vm272_vm0, %v7373_v0 }
 0x37f   : > { %v9796_v57 = vpop.f32.mrf.mxu0  ;;  %v12942_v50 = vadd.f32 %v5654_v45, %v5402_v7  ;;  %v5405_v17 = vadd.f32 %v9746_v21, %v12754_v23  ;;  %10047 = vmatprep.mubr.msk.f32.mxu1 %vm272_vm0, %v7374_v37  ;;  %v7380_v45 = vld [vmem:[#allocation3 + $0xf2] sm:$0xff] }
 0x380   : > { %v5277_v10 = vpop.f32.mrf.mxu1 }
 0x381   : > { %v5664_v58 = vpop.f32.mrf.mxu0  ;;  %v12946_v3 = vadd.f32 %v9796_v57, %v5405_v17  ;;  %v5404_v38 = vadd.f32 %v5277_v10, %v12761_v26  ;;  %v7381_v17 = vld [vmem:[#allocation3 + $0xfa] sm:$0xff] }
 0x382   : > { %v9749_v32 = vpop.f32.mrf.mxu1  ;;  %10048 = vmatmul.mubr.msk.f32.gmra.mxu1 %vm272_vm0, %v7375_v1 }
 0x383   : > { %v9799_v6 = vpop.f32.mrf.mxu0  ;;  %v12950_v63 = vadd.f32 %v5664_v58, %v5404_v38  ;;  %v5407_v60 = vadd.f32 %v9749_v32, %v12768_v19  ;;  %10050 = vmatprep.mubr.msk.f32.mxu1 %vm272_vm0, %v7376_v24  ;;  %v7382_v58 = vld [vmem:[#allocation3 + $0x10a] sm:$0xff] }
 0x384   : > { %v5287_v23 = vpop.f32.mrf.mxu1 }
 0x385   : > { %v5674_v52 = vpop.f32.mrf.mxu0  ;;  %v12954_v40 = vadd.f32 %v9799_v6, %v5407_v60  ;;  %v5406_v41 = vadd.f32 %v5287_v23, %v12775_v51  ;;  %v7383_v60 = vld [vmem:[#allocation3 + $0x112] sm:$0xff] }
 0x386   : > { %v9752_v26 = vpop.f32.mrf.mxu1  ;;  %10051 = vmatmul.mubr.msk.f32.gmra.mxu1 %vm272_vm0, %v7377_v25 }
 0x387   : > { %v9802_v61 = vpop.f32.mrf.mxu0  ;;  %v12958_v49 = vadd.f32 %v5674_v52, %v5406_v41  ;;  %v5409_v59 = vadd.f32 %v9752_v26, %v12782_v16  ;;  %10053 = vmatprep.mubr.msk.f32.mxu1 %vm272_vm0, %v7378_v54  ;;  %v7384_v52 = vld [vmem:[#allocation3 + $0x122] sm:$0xff] }
 0x388   : > { %v5297_v19 = vpop.f32.mrf.mxu1 }
 0x389   : > { %v5684_v18 = vpop.f32.mrf.mxu0  ;;  %v12962_v15 = vadd.f32 %v9802_v61, %v5409_v59  ;;  %v5408_v53 = vadd.f32 %v5297_v19, %v12789_v39  ;;  %v7385_v59 = vld [vmem:[#allocation3 + $0x12a] sm:$0xff] }
 0x38a   : > { %v9755_v51 = vpop.f32.mrf.mxu1  ;;  %10054 = vmatmul.mubr.msk.f32.gmra.mxu1 %vm272_vm0, %v7379_v31 }
 0x38b   : > { %v9805_v2 = vpop.f32.mrf.mxu0  ;;  %v12966_v7 = vadd.f32 %v5684_v18, %v5408_v53  ;;  %v5411_v0 = vadd.f32 %v9755_v51, %v12796_v30  ;;  %10056 = vmatprep.mubr.msk.f32.mxu1 %vm272_vm0, %v7380_v45  ;;  %v7386_v18 = vld [vmem:[#allocation3 + $0x13a] sm:$0xff] }
 0x38c   : > { %v5307_v16 = vpop.f32.mrf.mxu1 }
 0x38d   : > { %v5694_v21 = vpop.f32.mrf.mxu0  ;;  %v12970_v57 = vadd.f32 %v9805_v2, %v5411_v0  ;;  %v5410_v37 = vadd.f32 %v5307_v16, %v12803_v14  ;;  %v7387_v0 = vld [vmem:[#allocation3 + $0x142] sm:$0xff] }
 0x38e   : > { %v9758_v39 = vpop.f32.mrf.mxu1  ;;  %10057 = vmatmul.mubr.msk.f32.gmra.mxu1 %vm272_vm0, %v7381_v17 }
 0x38f   : > { %v9808_v10 = vpop.f32.mrf.mxu0  ;;  %v12974_v38 = vadd.f32 %v5694_v21, %v5410_v37  ;;  %v5413_v1 = vadd.f32 %v9758_v39, %v12810_v27  ;;  %10059 = vmatprep.mubr.msk.f32.mxu1 %vm272_vm0, %v7382_v58  ;;  %v7388_v21 = vld [vmem:[#allocation3 + $0x152] sm:$0xff] }
 0x390   : > { %v5317_v30 = vpop.f32.mrf.mxu1 }
 0x391   : > { %v5704_v32 = vpop.f32.mrf.mxu0  ;;  %v12978_v6 = vadd.f32 %v9808_v10, %v5413_v1  ;;  %v5412_v24 = vadd.f32 %v5317_v30, %v12817_v46  ;;  %v7389_v1 = vld [vmem:[#allocation3 + $0x15a] sm:$0xff] }
 0x392   : > { %v9761_v14 = vpop.f32.mrf.mxu1  ;;  %10060 = vmatmul.mubr.msk.f32.gmra.mxu1 %vm272_vm0, %v7383_v60 }
 0x393   : > { %v9811_v23 = vpop.f32.mrf.mxu0  ;;  %v12982_v41 = vadd.f32 %v5704_v32, %v5412_v24  ;;  %v5415_v25 = vadd.f32 %v9761_v14, %v12824_v62  ;;  %10062 = vmatprep.mubr.msk.f32.mxu1 %vm272_vm0, %v7384_v52  ;;  %v7390_v32 = vld [vmem:[#allocation3 + $0x16a] sm:$0xff] }
 0x394   : > { %v5327_v27 = vpop.f32.mrf.mxu1 }
 0x395   : > { %v5714_v26 = vpop.f32.mrf.mxu0  ;;  %v12986_v61 = vadd.f32 %v9811_v23, %v5415_v25  ;;  %v5414_v54 = vadd.f32 %v5327_v27, %v12831_v13  ;;  %v7391_v25 = vld [vmem:[#allocation3 + $0x172] sm:$0xff] }
 0x396   : > { %v9764_v46 = vpop.f32.mrf.mxu1  ;;  %10063 = vmatmul.mubr.msk.f32.gmra.mxu1 %vm272_vm0, %v7385_v59 }
 0x397   : > { %v9814_v19 = vpop.f32.mrf.mxu0  ;;  %v12990_v53 = vadd.f32 %v5714_v26, %v5414_v54  ;;  %v5417_v31 = vadd.f32 %v9764_v46, %v12838_v34  ;;  %10065 = vmatprep.mubr.msk.f32.mxu1 %vm272_vm0, %v7386_v18  ;;  %v7394_v46 = vld [vmem:[#allocation3 + $0x19a] sm:$0xff] }
 0x398   : > { %v5337_v62 = vpop.f32.mrf.mxu1 }
 0x399   : > { %v5724_v51 = vpop.f32.mrf.mxu0  ;;  %v12994_v2 = vadd.f32 %v9814_v19, %v5417_v31  ;;  %v5416_v45 = vadd.f32 %v5337_v62, %v12845_v4 }
 0x39a   : > { %v9767_v13 = vpop.f32.mrf.mxu1  ;;  %10066 = vmatmul.mubr.msk.f32.gmra.mxu1 %vm272_vm0, %v7387_v0 }
 0x39b   : > { %v9817_v16 = vpop.f32.mrf.mxu0  ;;  %v12998_v37 = vadd.f32 %v5724_v51, %v5416_v45  ;;  %v5419_v17 = vadd.f32 %v9767_v13, %v12852_v28  ;;  %10068 = vmatprep.mubr.msk.f32.mxu1 %vm272_vm0, %v7388_v21 }
 0x39c   : > { %v5347_v34 = vpop.f32.mrf.mxu1 }
 0x39d   : > { %v5734_v39 = vpop.f32.mrf.mxu0  ;;  %v13002_v10 = vadd.f32 %v9817_v16, %v5419_v17  ;;  %v5418_v58 = vadd.f32 %v5347_v34, %v12859_v20 }
 0x39e   : > { %v9770_v4 = vpop.f32.mrf.mxu1  ;;  %10069 = vmatmul.mubr.msk.f32.gmra.mxu1 %vm272_vm0, %v7389_v1 }
 0x39f   : > { %v9820_v30 = vpop.f32.mrf.mxu0  ;;  %v13006_v24 = vadd.f32 %v5734_v39, %v5418_v58  ;;  %v5421_v60 = vadd.f32 %v9770_v4, %v12866_v48  ;;  %10071 = vmatprep.mubr.msk.f32.mxu1 %vm272_vm0, %v7390_v32 }
 0x3a0   : > { %v5357_v28 = vpop.f32.mrf.mxu1 }
 0x3a1   : > { %v5744_v14 = vpop.f32.mrf.mxu0  ;;  %v13010_v23 = vadd.f32 %v9820_v30, %v5421_v60  ;;  %v5420_v52 = vadd.f32 %v5357_v28, %v12873_v47 }
 0x3a2   : > { %v9773_v20 = vpop.f32.mrf.mxu1  ;;  %10072 = vmatmul.mubr.msk.f32.gmra.mxu1 %vm272_vm0, %v7391_v25 }
 0x3a3   : > { %v9823_v27 = vpop.f32.mrf.mxu0  ;;  %v13014_v26 = vadd.f32 %v5744_v14, %v5420_v52  ;;  %v5423_v54 = vadd.f32 %v9773_v20, %v12880_v36  ;;  %10074 = vmatprep.mubr.msk.f32.mxu1 %vm272_vm0, %v12676_v29  ;;  %v7395_v36 = vld [vmem:[#allocation3 + $0x1a2] sm:$0xff] }
 0x3a4   : > { %v5367_v48 = vpop.f32.mrf.mxu1 }
 0x3a5   : > { %v5754_v59 = vpop.f32.mrf.mxu0  ;;  %v13019_v19 = vadd.f32 %v9823_v27, %v5423_v54  ;;  %v5422_v18 = vadd.f32 %v5367_v48, %v12887_v9 }
 0x3a6   : > { %v9776_v47 = vpop.f32.mrf.mxu1  ;;  %10075 = vmatmul.mubr.msk.f32.gmra.mxu1 %vm272_vm0, %v12684_v55 }
 0x3a7   : > { %v9826_v31 = vpop.f32.mrf.mxu0  ;;  %v13024_v62 = vadd.f32 %v5754_v59, %v5422_v18  ;;  %v5425_v51 = vadd.f32 %v9776_v47, %v12892_v5  ;;  %10077 = vmatprep.mubr.msk.f32.mxu1 %vm272_vm0, %v7394_v46 }
 0x3a8   : > { %v5377_v29 = vpop.f32.mrf.mxu1 }
 0x3a9   : > { %v5764_v45 = vpop.f32.mrf.mxu0  ;;  %v13028_v0 = vadd.f32 %v9826_v31, %v5425_v51  ;;  %v5424_v13 = vadd.f32 %v5377_v29, %v12899_v22 }
 0x3aa   : > { %v9779_v16 = vpop.f32.mrf.mxu1  ;;  %10078 = vmatmul.mubr.msk.f32.gmra.mxu1 %vm272_vm0, %v7395_v36 }
 0x3ab   : > { %v9829_v9 = vpop.f32.mrf.mxu0  ;;  %v13032_v21 = vadd.f32 %v5764_v45, %v5424_v13  ;;  %v5427_v55 = vadd.f32 %v9779_v16, %v12904_v33 }
 0x3ac   : > { %v5387_v17 = vpop.f32.mrf.mxu1 }
 0x3ad   : > { %v5774_v34 = vpop.f32.mrf.mxu0  ;;  %v13035_v5 = vadd.f32 %v9829_v9, %v5427_v55  ;;  %v5426_v39 = vadd.f32 %v5387_v17, %v12910_v11 }
 0x3ae   : > { %v9834_v58 = vpop.f32.mrf.mxu1 }
 0x3af   : > { %v13038_v1 = vpop.f32.mrf.mxu0  ;;  %v13040_v4 = vadd.f32 %v5774_v34, %v5426_v39  ;;  %v13043_v22 = vadd.f32 %v9834_v58, %v12915_v56 }
 0x3b0   : > { %v6011_v30 = vpop.f32.mrf.mxu1 }
 0x3b1   : > { %v13045_v32 = vpop.f32.mrf.mxu0  ;;  %v13048_v60 = vadd.f32 %v6011_v30, %v12918_v42 }
 0x3b2   : > { %v9837_v33 = vpop.f32.mrf.mxu1 }
 0x3b3   : > { %v13050_v28 = vpop.f32.mrf.mxu0  ;;  %v13053_v14 = vadd.f32 %v9837_v33, %v12922_v35 }
 0x3b4   : > { %v6021_v11 = vpop.f32.mrf.mxu1 }
 0x3b5   : > { %v13055_v52 = vpop.f32.mrf.mxu0  ;;  %v13058_v25 = vadd.f32 %v6021_v11, %v12926_v8 }
 0x3b6   : > { %v9840_v56 = vpop.f32.mrf.mxu1 }
 0x3b7   : > { %v13060_v20 = vpop.f32.mrf.mxu0  ;;  %v13063_v27 = vadd.f32 %v9840_v56, %v12930_v12 }
 0x3b8   : > { %v6031_v42 = vpop.f32.mrf.mxu1 }
 0x3b9   : > { %v13065_v54 = vpop.f32.mrf.mxu0  ;;  %v13068_v48 = vadd.f32 %v6031_v42, %v12934_v43 }
 0x3ba   : > { %v9843_v35 = vpop.f32.mrf.mxu1 }
 0x3bb   : > { %v13070_v59 = vpop.f32.mrf.mxu0  ;;  %v13073_v46 = vadd.f32 %v9843_v35, %v12938_v44 }
 0x3bc   : > { %v6041_v8 = vpop.f32.mrf.mxu1 }
 0x3bd   : > { %v13075_v18 = vpop.f32.mrf.mxu0  ;;  %v13078_v47 = vadd.f32 %v6041_v8, %v12942_v50 }
 0x3be   : > { %v9846_v12 = vpop.f32.mrf.mxu1 }
 0x3bf   : > { %v13080_v31 = vpop.f32.mrf.mxu0  ;;  %v13083_v51 = vadd.f32 %v9846_v12, %v12946_v3 }
 0x3c0   : > { %v6051_v43 = vpop.f32.mrf.mxu1 }
 0x3c1   : > { %v13085_v36 = vpop.f32.mrf.mxu0  ;;  %v13088_v29 = vadd.f32 %v6051_v43, %v12950_v63 }
 0x3c2   : > { %v9849_v44 = vpop.f32.mrf.mxu1 }
 0x3c3   : > { %v13090_v45 = vpop.f32.mrf.mxu0  ;;  %v13093_v13 = vadd.f32 %v9849_v44, %v12954_v40 }
 0x3c4   : > { %v6061_v50 = vpop.f32.mrf.mxu1 }
 0x3c5   : > { %v13095_v16 = vpop.f32.mrf.mxu0  ;;  %v13098_v9 = vadd.f32 %v6061_v50, %v12958_v49 }
 0x3c6   : > { %v9852_v3 = vpop.f32.mrf.mxu1 }
 0x3c7   : > { %v13100_v55 = vpop.f32.mrf.mxu0  ;;  %v13103_v17 = vadd.f32 %v9852_v3, %v12962_v15 }
 0x3c8   : > { %v6071_v63 = vpop.f32.mrf.mxu1 }
 0x3c9   : > { %v13105_v34 = vpop.f32.mrf.mxu0  ;;  %v13108_v39 = vadd.f32 %v6071_v63, %v12966_v7 }
 0x3ca   : > { %v9855_v40 = vpop.f32.mrf.mxu1 }
 0x3cb   : > { %v13110_v58 = vpop.f32.mrf.mxu0  ;;  %v13113_v30 = vadd.f32 %v9855_v40, %v12970_v57 }
 0x3cc   : > { %13879 = vst [vmem:[#allocation34_spill] sm:$0xff] %v13110_v58  ;;  %v6081_v49 = vpop.f32.mrf.mxu1 }
 0x3cd   : > { %v13115_v33 = vpop.f32.mrf.mxu0  ;;  %v13118_v11 = vadd.f32 %v6081_v49, %v12974_v38 }
 0x3ce   : > { %13880 = vst [vmem:[#allocation82_spill] sm:$0xff] %v13115_v33  ;;  %v9858_v15 = vpop.f32.mrf.mxu1 }
 0x3cf   : > { %13881 = vst [vmem:[#allocation77_spill] sm:$0xff] %v13118_v11  ;;  %v13120_v56 = vpop.f32.mrf.mxu0  ;;  %v13123_v42 = vadd.f32 %v9858_v15, %v12978_v6 }
 0x3d0   : > { %13882 = vst [vmem:[#allocation14_spill] sm:$0xff] %v13120_v56  ;;  %v6091_v7 = vpop.f32.mrf.mxu1 }
 0x3d1   : > { %13883 = vst [vmem:[#allocation30_spill] sm:$0xff] %v13123_v42  ;;  %v13125_v35 = vpop.f32.mrf.mxu0  ;;  %v13128_v8 = vadd.f32 %v6091_v7, %v12982_v41 }
 0x3d2   : > { %13884 = vst [vmem:[#allocation28_spill] sm:$0xff] %v13125_v35  ;;  %v9861_v57 = vpop.f32.mrf.mxu1 }
 0x3d3   : > { %13885 = vst [vmem:[#allocation85_spill] sm:$0xff] %v13128_v8  ;;  %v13130_v12 = vpop.f32.mrf.mxu0  ;;  %v13133_v43 = vadd.f32 %v9861_v57, %v12986_v61 }
 0x3d4   : > { %13886 = vst [vmem:[#allocation78_spill] sm:$0xff] %v13130_v12  ;;  %v6101_v38 = vpop.f32.mrf.mxu1 }
 0x3d5   : > { %13887 = vst [vmem:[#allocation33_spill] sm:$0xff] %v13133_v43  ;;  %v13135_v44 = vpop.f32.mrf.mxu0  ;;  %v13138_v50 = vadd.f32 %v6101_v38, %v12990_v53 }
 0x3d6   : > { %13888 = vst [vmem:[#allocation37_spill] sm:$0xff] %v13135_v44  ;;  %v9864_v6 = vpop.f32.mrf.mxu1 }
 0x3d7   : > { %13889 = vst [vmem:[#allocation88_spill] sm:$0xff] %v13138_v50  ;;  %v13140_v3 = vpop.f32.mrf.mxu0  ;;  %v13143_v63 = vadd.f32 %v9864_v6, %v12994_v2 }
 0x3d8   : > { %13890 = vst [vmem:[#allocation80_spill] sm:$0xff] %v13140_v3  ;;  %v6111_v41 = vpop.f32.mrf.mxu1 }
 0x3d9   : > { %13891 = vst [vmem:[#allocation36_spill] sm:$0xff] %v13143_v63  ;;  %v13145_v40 = vpop.f32.mrf.mxu0  ;;  %v13148_v49 = vadd.f32 %v6111_v41, %v12998_v37 }
 0x3da   : > { %13892 = vst [vmem:[#allocation35_spill] sm:$0xff] %v13145_v40  ;;  %v9867_v61 = vpop.f32.mrf.mxu1 }
 0x3db   : > { %13893 = vst [vmem:[#allocation91_spill] sm:$0xff] %v13148_v49  ;;  %v13150_v15 = vpop.f32.mrf.mxu0  ;;  %v13153_v7 = vadd.f32 %v9867_v61, %v13002_v10 }
 0x3dc   : > { %13894 = vst [vmem:[#allocation81_spill] sm:$0xff] %v13150_v15  ;;  %v6121_v53 = vpop.f32.mrf.mxu1 }
 0x3dd   : > { %13895 = vst [vmem:[#allocation38_spill] sm:$0xff] %v13153_v7  ;;  %v13155_v57 = vpop.f32.mrf.mxu0  ;;  %v13158_v38 = vadd.f32 %v6121_v53, %v13006_v24 }
 0x3de   : > { %13896 = vst [vmem:[#allocation41_spill] sm:$0xff] %v13155_v57  ;;  %v9870_v2 = vpop.f32.mrf.mxu1 }
 0x3df   : > { %13897 = vst [vmem:[#allocation94_spill] sm:$0xff] %v13158_v38  ;;  %v13160_v6 = vpop.f32.mrf.mxu0  ;;  %v13163_v40 = vadd.f32 %v9870_v2, %v13010_v23 }
 0x3e0   : > { %13898 = vst [vmem:[#allocation83_spill] sm:$0xff] %v13160_v6  ;;  %v6131_v37 = vpop.f32.mrf.mxu1 }
 0x3e1   : > { %13899 = vst [vmem:[#allocation40_spill] sm:$0xff] %v13163_v40  ;;  %v13165_v41 = vpop.f32.mrf.mxu0  ;;  %v13168_v15 = vadd.f32 %v6131_v37, %v13014_v26 }
 0x3e2   : > { %13900 = vst [vmem:[#allocation39_spill] sm:$0xff] %v13165_v41  ;;  %v9873_v10 = vpop.f32.mrf.mxu1 }
 0x3e3   : > { %13901 = vst [vmem:[#allocation97_spill] sm:$0xff] %v13168_v15  ;;  %v13170_v61 = vpop.f32.mrf.mxu0  ;;  %v13173_v57 = vadd.f32 %v9873_v10, %v13019_v19 }
 0x3e4   : > { %13902 = vst [vmem:[#allocation84_spill] sm:$0xff] %v13170_v61  ;;  %v6141_v24 = vpop.f32.mrf.mxu1 }
 0x3e5   : > { %13903 = vst [vmem:[#allocation42_spill] sm:$0xff] %v13173_v57  ;;  %v13175_v53 = vpop.f32.mrf.mxu0  ;;  %v13178_v6 = vadd.f32 %v6141_v24, %v13024_v62 }
 0x3e6   : > { %13904 = vst [vmem:[#allocation45_spill] sm:$0xff] %v13175_v53  ;;  %v9876_v23 = vpop.f32.mrf.mxu1 }
 0x3e7   : > { %13905 = vst [vmem:[#allocation86_spill] sm:$0xff] %v13178_v6  ;;  %v13180_v2 = vpop.f32.mrf.mxu0  ;;  %v13183_v41 = vadd.f32 %v9876_v23, %v13028_v0 }
 0x3e8   : > { %13906 = vst [vmem:[#allocation44_spill] sm:$0xff] %v13180_v2  ;;  %v6151_v26 = vpop.f32.mrf.mxu1 }
 0x3e9   : > { %13907 = vst [vmem:[#allocation43_spill] sm:$0xff] %v13183_v41  ;;  %v13185_v37 = vpop.f32.mrf.mxu0  ;;  %v13188_v61 = vadd.f32 %v6151_v26, %v13032_v21 }
 0x3ea   : > { %13908 = vst [vmem:[#allocation87_spill] sm:$0xff] %v13185_v37  ;;  %v9879_v19 = vpop.f32.mrf.mxu1 }
 0x3eb   : > { %13909 = vst [vmem:[#allocation46_spill] sm:$0xff] %v13188_v61  ;;  %v13190_v10 = vpop.f32.mrf.mxu0  ;;  %v13193_v53 = vadd.f32 %v9879_v19, %v13035_v5 }
 0x3ec   : > { %13910 = vst [vmem:[#allocation49_spill] sm:$0xff] %v13190_v10  ;;  %v6161_v62 = vpop.f32.mrf.mxu1 }
 0x3ed   : > { %13911 = vst [vmem:[#allocation89_spill] sm:$0xff] %v13193_v53  ;;  %v13195_v24 = vpop.f32.mrf.mxu0  ;;  %v13198_v2 = vadd.f32 %v6161_v62, %v13040_v4 }
 0x3ee   : > { %13912 = vst [vmem:[#allocation48_spill] sm:$0xff] %v13195_v24  ;;  %v9934_v0 = vpop.f32.mrf.mxu1 }
 0x3ef   : > { %13913 = vst [vmem:[#allocation47_spill] sm:$0xff] %v13198_v2  ;;  %v9984_v23 = vpop.f32.mrf.mxu0 }
 0x3f0   : > { %v6786_v41 = vpop.f32.mrf.mxu1 }
 0x3f1   : > { %v7173_v6 = vpop.f32.mrf.mxu0 }
 0x3f2   : > { %v9937_v37 = vpop.f32.mrf.mxu1 }
 0x3f3   : > { %v9987_v21 = vpop.f32.mrf.mxu0 }
 0x3f4   : > { %v6796_v57 = vpop.f32.mrf.mxu1 }
 0x3f5   : > { %v13202_v10 = vpop.f32.mrf.mxu0 }
 0x3f6   : > { %v9940_v26 = vpop.f32.mrf.mxu1 }
 0x3f7   : > { %v13208_v24 = vpop.f32.mrf.mxu0 }
 0x3f8   : > { %v13200_v61 = vpop.f32.mrf.mxu1 }
 0x3f9   : > { %v13214_v2 = vpop.f32.mrf.mxu0 }
 0x3fa   : > { %v13204_v5 = vpop.f32.mrf.mxu1 }
 0x3fb   : > { %v13220_v40 = vpop.f32.mrf.mxu0 }
 0x3fc   : > { %v13206_v19 = vpop.f32.mrf.mxu1 }
 0x3fd   : > { %v13226_v49 = vpop.f32.mrf.mxu0 }
 0x3fe   : > { %v13210_v4 = vpop.f32.mrf.mxu1 }
 0x3ff   : > { %v13232_v44 = vpop.f32.mrf.mxu0 }
 0x400   : > { %v13212_v62 = vpop.f32.mrf.mxu1 }
 0x401   : > { %v13238_v43 = vpop.f32.mrf.mxu0 }
 0x402   : > { %v13216_v53 = vpop.f32.mrf.mxu1 }
 0x403   : > { %v13244_v56 = vpop.f32.mrf.mxu0 }
 0x404   : > { %v13218_v15 = vpop.f32.mrf.mxu1 }
 0x406   : > { %v13222_v38 = vpop.f32.mrf.mxu1 }
 0x408   : > { %v13224_v7 = vpop.f32.mrf.mxu1 }
 0x409   : > { %13914 = vst [vmem:[#allocation90_spill] sm:$0xff] %v13224_v7 }
 0x40a   : > { %v13228_v3 = vpop.f32.mrf.mxu1 }
 0x40b   : > { %13915 = vst [vmem:[#allocation50_spill] sm:$0xff] %v13228_v3  ;;  %v13250_v3 = vpop.f32.mrf.mxu0 }
 0x40c   : > { %v13230_v63 = vpop.f32.mrf.mxu1 }
 0x40d   : > { %13916 = vst [vmem:[#allocation53_spill] sm:$0xff] %v13230_v63 }
 0x40e   : > { %v13234_v50 = vpop.f32.mrf.mxu1 }
 0x40f   : > { %13917 = vst [vmem:[#allocation92_spill] sm:$0xff] %v13234_v50  ;;  %v13256_v50 = vpop.f32.mrf.mxu0 }
 0x410   : > { %v13236_v12 = vpop.f32.mrf.mxu1  ;;  %13925 = vst [vmem:[#allocation55_spill] sm:$0xff] %v13256_v50 }
 0x411   : > { %13918 = vst [vmem:[#allocation52_spill] sm:$0xff] %v13236_v12 }
 0x412   : > { %v13240_v35 = vpop.f32.mrf.mxu1 }
 0x413   : > { %13919 = vst [vmem:[#allocation51_spill] sm:$0xff] %v13240_v35  ;;  %v13262_v35 = vpop.f32.mrf.mxu0 }
 0x414   : > { %v13242_v8 = vpop.f32.mrf.mxu1  ;;  %13928 = vst [vmem:[#allocation61_spill] sm:$0xff] %v13262_v35 }
 0x415   : > { %13920 = vst [vmem:[#allocation93_spill] sm:$0xff] %v13242_v8 }
 0x416   : > { %v13246_v42 = vpop.f32.mrf.mxu1 }
 0x417   : > { %13921 = vst [vmem:[#allocation54_spill] sm:$0xff] %v13246_v42  ;;  %v13268_v42 = vpop.f32.mrf.mxu0 }
 0x418   : > { %v13248_v33 = vpop.f32.mrf.mxu1  ;;  %13931 = vst [vmem:[#allocation59_spill] sm:$0xff] %v13268_v42 }
 0x419   : > { %13922 = vst [vmem:[#allocation57_spill] sm:$0xff] %v13248_v33 }
 0x41a   : > { %v13252_v63 = vpop.f32.mrf.mxu1 }
 0x41b   : > { %13923 = vst [vmem:[#allocation95_spill] sm:$0xff] %v13252_v63  ;;  %v6558_v63 = vadd.f32 %v13038_v1, %v13043_v22 }
 0x41c   : > { %v13254_v11 = vpop.f32.mrf.mxu1 }
 0x41d   : > { %13924 = vst [vmem:[#allocation56_spill] sm:$0xff] %v13254_v11  ;;  %v6946_v50 = vadd.f32 %v9934_v0, %v6558_v63 }
 0x41e   : > { %v13258_v12 = vpop.f32.mrf.mxu1 }
 0x41f   : > { %13926 = vst [vmem:[#allocation96_spill] sm:$0xff] %v13258_v12  ;;  %v6557_v12 = vadd.f32 %v13045_v32, %v13048_v60  ;;  %v7333_v1 = vadd.f32 %v9984_v23, %v6946_v50  ;;  %v6562_v32 = vadd.f32 %v13060_v20, %v13063_v27  ;;  %v6566_v23 = vadd.f32 %v13080_v31, %v13083_v51 }
 0x420   : > { %v13260_v7 = vpop.f32.mrf.mxu1 }
 0x421   : > { %13927 = vst [vmem:[#allocation58_spill] sm:$0xff] %v13260_v7  ;;  %v13278_v7 = vpop.f32.mrf.mxu0 }
 0x422   : > { %v13264_v8 = vpop.f32.mrf.mxu1 }
 0x423   : > { %13929 = vst [vmem:[#allocation98_spill] sm:$0xff] %v13264_v8  ;;  %v6945_v8 = vadd.f32 %v6786_v41, %v6557_v12 }
 0x424   : > { %v13266_v58 = vpop.f32.mrf.mxu1 }
 0x425   : > { %13930 = vst [vmem:[#allocation60_spill] sm:$0xff] %v13266_v58  ;;  %v6560_v58 = vadd.f32 %v13050_v28, %v13053_v14  ;;  %v7332_v0 = vadd.f32 %v7173_v6, %v6945_v8  ;;  %v6561_v28 = vadd.f32 %v13065_v54, %v13068_v48  ;;  %v6950_v14 = vadd.f32 %v9940_v26, %v6562_v32 }
 0x426   : > { %v13270_v33 = vpop.f32.mrf.mxu1  ;;  %v6563_v6 = vadd.f32 %v13075_v18, %v13078_v47  ;;  %v6954_v32 = vadd.f32 %v13210_v4, %v6566_v23  ;;  %v13939_v23 = vld [vmem:[#allocation55_spill] sm:$0xff] }
 0x427   : > { %13932 = vst [vmem:[#allocation99_spill] sm:$0xff] %v13270_v33  ;;  %v6559_v33 = vadd.f32 %v13055_v52, %v13058_v25  ;;  %v6948_v22 = vadd.f32 %v9937_v37, %v6560_v58  ;;  %v6564_v58 = vadd.f32 %v13070_v59, %v13073_v46  ;;  %v6949_v48 = vadd.f32 %v13200_v61, %v6561_v28 }
 0x428   : > { %v13274_v11 = vpop.f32.mrf.mxu1  ;;  %v7337_v41 = vadd.f32 %v13208_v24, %v6950_v14  ;;  %v6951_v18 = vadd.f32 %v13206_v19, %v6563_v6  ;;  %v6567_v14 = vadd.f32 %v13095_v16, %v13098_v9 }
 0x429   : > { %13933 = vst [vmem:[#allocation62_spill] sm:$0xff] %v13274_v11  ;;  %v13288_v11 = vpop.f32.mrf.mxu0  ;;  %v6947_v60 = vadd.f32 %v6796_v57, %v6559_v33  ;;  %v7335_v52 = vadd.f32 %v9987_v21, %v6948_v22  ;;  %v6952_v37 = vadd.f32 %v13204_v5, %v6564_v58  ;;  %v7336_v21 = vadd.f32 %v13214_v2, %v6949_v48 }
 0x42a   : > { %v13280_v35 = vpop.f32.mrf.mxu1  ;;  %v6955_v16 = vadd.f32 %v13218_v15, %v6567_v14  ;;  %v6569_v48 = vadd.f32 %v13105_v34, %v13108_v39  ;;  %v13936_v34 = vld [vmem:[#allocation90_spill] sm:$0xff]  ;;  %v13947_v14 = vld [vmem:[#allocation59_spill] sm:$0xff] }
 0x42b   : > { %13934 = vst [vmem:[#allocation65_spill] sm:$0xff] %v13280_v35  ;;  %v13301_v25 = vpop.f32.mrf.mxu0  ;;  %v7334_v54 = vadd.f32 %v13202_v10, %v6947_v60  ;;  %v7339_v22 = vadd.f32 %v13220_v40, %v6952_v37 }
 0x42c   : > { %v13286_v42 = vpop.f32.mrf.mxu1  ;;  %v6957_v39 = vadd.f32 %v13936_v34, %v6569_v48 }
 0x42d   : > { %v13313_v46 = vpop.f32.mrf.mxu0 }
 0x42e   : > { %v10034_v63 = vpop.f32.mrf.mxu1 }
 0x42f   : > { %v7720_v35 = vadd.f32 %v10034_v63, %v7333_v1  ;;  %v6565_v1 = vadd.f32 %v13085_v36, %v13088_v29  ;;  %v13327_v51 = vpop.f32.mrf.mxu0  ;;  %v6568_v63 = vadd.f32 %v13090_v45, %v13093_v13 }
 0x430   : > { %v7560_v12 = vpop.f32.mrf.mxu1 }
 0x431   : > { %vm7752_vm0 = vcmp.ge.f32.partialorder %v7720_v35, 0.0  ;;  %v7784_v20 = vmul.f32 0.1, %v7720_v35  ;;  %v7719_v27 = vadd.f32 %v7560_v12, %v7332_v0  ;;  %v7338_v0 = vadd.f32 %v13226_v49, %v6951_v18  ;;  %v13341_v13 = vpop.f32.mrf.mxu0  ;;  %v13940_v18 = vld [vmem:[#allocation50_spill] sm:$0xff] }
 0x432   : > { %v10037_v33 = vpop.f32.mrf.mxu1  ;;  %v6953_v36 = vadd.f32 %v13212_v62, %v6565_v1  ;;  %v7341_v12 = vadd.f32 %v13232_v44, %v6954_v32  ;;  %v13941_v1 = vld [vmem:[#allocation30_spill] sm:$0xff] }
 0x433   : > { %v7816_v8 = vsel %vm7752_vm0, %v7720_v35, %v7784_v20  ;;  %vm7751_vm8 = vcmp.ge.f32.partialorder %v7719_v27, 0.0  ;;  %v7783_v50 = vmul.f32 0.1, %v7719_v27  ;;  %v7722_v57 = vadd.f32 %v10037_v33, %v7335_v52 }
 0x434   : > { %7848 = vst.msk [vmem:[%s13299_s13 + $0x8] sm:$0xff] %vm416_vm2, %v7816_v8  ;;  %v7570_v59 = vpop.f32.mrf.mxu1  ;;  %v6956_v52 = vadd.f32 %v13216_v53, %v6568_v63  ;;  %v7340_v58 = vadd.f32 %v13238_v43, %v6953_v36 }
 0x435   : > { %v7815_v10 = vsel %vm7751_vm8, %v7719_v27, %v7783_v50  ;;  %vm7754_vm9 = vcmp.ge.f32.partialorder %v7722_v57, 0.0  ;;  %v7786_v35 = vmul.f32 0.1, %v7722_v57  ;;  %v7721_v61 = vadd.f32 %v7570_v59, %v7334_v54 }
 0x436   : > { %7847 = vst.msk [vmem:[%s13299_s13] sm:$0xff] %vm416_vm2, %v7815_v10  ;;  %v10040_v47 = vpop.f32.mrf.mxu1  ;;  %v6570_v27 = vadd.f32 %v13100_v55, %v13103_v17  ;;  %v7343_v33 = vadd.f32 %v13244_v56, %v6956_v52  ;;  %v13355_v17 = vpop.f32.mrf.mxu0  ;;  %v13937_v10 = vld [vmem:[#allocation77_spill] sm:$0xff]  ;;  %v13948_v52 = vld [vmem:[#allocation92_spill] sm:$0xff] }
 0x437   : > { %v7818_v24 = vsel %vm7754_vm9, %v7722_v57, %v7786_v35  ;;  %vm7753_vm10 = vcmp.ge.f32.partialorder %v7721_v61, 0.0  ;;  %v7785_v26 = vmul.f32 0.1, %v7721_v61  ;;  %v7724_v5 = vadd.f32 %v10040_v47, %v7337_v41  ;;  %v13935_v57 = vld [vmem:[#allocation34_spill] sm:$0xff] }
 0x438   : > { %7850 = vst.msk [vmem:[%s13299_s13 + $0x18] sm:$0xff] %vm416_vm2, %v7818_v24  ;;  %v7580_v31 = vpop.f32.mrf.mxu1  ;;  %v6958_v8 = vadd.f32 %v13222_v38, %v6570_v27  ;;  %v6572_v6 = vadd.f32 %v13935_v57, %v13113_v30  ;;  %v7342_v41 = vadd.f32 %v13250_v3, %v6955_v16  ;;  %v13938_v35 = vld [vmem:[#allocation82_spill] sm:$0xff]  ;;  %v13369_v3 = vpop.f32.mrf.mxu0  ;;  %v13949_v16 = vld [vmem:[#allocation33_spill] sm:$0xff] }
 0x439   : > { %v7817_v2 = vsel %vm7753_vm10, %v7721_v61, %v7785_v26  ;;  %vm7756_vm11 = vcmp.ge.f32.partialorder %v7724_v5, 0.0  ;;  %v7788_v19 = vmul.f32 0.1, %v7724_v5  ;;  %v7723_v60 = vadd.f32 %v7580_v31, %v7336_v21  ;;  %v13943_v31 = vld [vmem:[#allocation61_spill] sm:$0xff] }
 0x43a   : > { %7849 = vst.msk [vmem:[%s13299_s13 + $0x10] sm:$0xff] %vm416_vm2, %v7817_v2  ;;  %v10043_v29 = vpop.f32.mrf.mxu1  ;;  %v6571_v61 = vadd.f32 %v13938_v35, %v13937_v10  ;;  %v7345_v21 = vadd.f32 %v13939_v23, %v6958_v8  ;;  %v6960_v47 = vadd.f32 %v13940_v18, %v6572_v6  ;;  %v7344_v2 = vadd.f32 %v13943_v31, %v6957_v39  ;;  %v13956_v10 = vld [vmem:[#allocation80_spill] sm:$0xff]  ;;  %v13957_v23 = vld [vmem:[#allocation93_spill] sm:$0xff] }
 0x43b   : > { %v7820_v40 = vsel %vm7756_vm11, %v7724_v5, %v7788_v19  ;;  %vm7755_vm12 = vcmp.ge.f32.partialorder %v7723_v60, 0.0  ;;  %v7787_v4 = vmul.f32 0.1, %v7723_v60  ;;  %v7726_v28 = vadd.f32 %v10043_v29, %v7339_v22  ;;  %v13942_v22 = vld [vmem:[#allocation14_spill] sm:$0xff]  ;;  %v13944_v19 = vld [vmem:[#allocation53_spill] sm:$0xff] }
 0x43c   : > { %7852 = vst.msk [vmem:[%s13299_s13 + $0x28] sm:$0xff] %vm416_vm2, %v7820_v40  ;;  %v7590_v45 = vpop.f32.mrf.mxu1  ;;  %v6574_v32 = vadd.f32 %v13942_v22, %v13941_v1  ;;  %v13945_v40 = vld [vmem:[#allocation85_spill] sm:$0xff]  ;;  %v13960_v22 = vld [vmem:[#allocation54_spill] sm:$0xff] }
 0x43d   : > { %v7819_v49 = vsel %vm7755_vm12, %v7723_v60, %v7787_v4  ;;  %vm7758_vm13 = vcmp.ge.f32.partialorder %v7726_v28, 0.0  ;;  %v7790_v62 = vmul.f32 0.1, %v7726_v28  ;;  %v7725_v20 = vadd.f32 %v7590_v45, %v7338_v0  ;;  %v13946_v4 = vld [vmem:[#allocation28_spill] sm:$0xff] }
 0x43e   : > { %7851 = vst.msk [vmem:[%s13299_s13 + $0x20] sm:$0xff] %vm416_vm2, %v7819_v49  ;;  %v10046_v9 = vpop.f32.mrf.mxu1  ;;  %v6959_v60 = vadd.f32 %v13944_v19, %v6571_v61  ;;  %v6962_v45 = vadd.f32 %v13948_v52, %v6574_v32  ;;  %v13964_v52 = vld [vmem:[#allocation94_spill] sm:$0xff] }
 0x43f   : > { %v7822_v44 = vsel %vm7758_vm13, %v7726_v28, %v7790_v62  ;;  %vm7757_vm14 = vcmp.ge.f32.partialorder %v7725_v20, 0.0  ;;  %v7789_v53 = vmul.f32 0.1, %v7725_v20  ;;  %v7728_v54 = vadd.f32 %v10046_v9, %v7341_v12  ;;  %v13383_v62 = vpop.f32.mrf.mxu0  ;;  %v13950_v9 = vld [vmem:[#allocation78_spill] sm:$0xff] }
 0x440   : > { %7854 = vst.msk [vmem:[%s13299_s13 + $0x38] sm:$0xff] %vm416_vm2, %v7822_v44  ;;  %v7600_v55 = vpop.f32.mrf.mxu1  ;;  %v6573_v28 = vadd.f32 %v13946_v4, %v13945_v40  ;;  %v7347_v12 = vadd.f32 %v13947_v14, %v6960_v47  ;;  %v6576_v44 = vadd.f32 %v13950_v9, %v13949_v16  ;;  %v7349_v6 = vadd.f32 %v13288_v11, %v6962_v45  ;;  %v13963_v40 = vld [vmem:[#allocation57_spill] sm:$0xff] }
 0x441   : > { %v7821_v43 = vsel %vm7757_vm14, %v7725_v20, %v7789_v53  ;;  %vm7760_vm15 = vcmp.ge.f32.partialorder %v7728_v54, 0.0  ;;  %v7792_v15 = vmul.f32 0.1, %v7728_v54  ;;  %v7727_v50 = vadd.f32 %v7600_v55, %v7340_v58  ;;  %v13397_v39 = vpop.f32.mrf.mxu0  ;;  %v13965_v45 = vld [vmem:[#allocation41_spill] sm:$0xff] }
 0x442   : > { %7853 = vst.msk [vmem:[%s13299_s13 + $0x30] sm:$0xff] %vm416_vm2, %v7821_v43  ;;  %v10049_v56 = vpop.f32.mrf.mxu1  ;;  %v7346_v53 = vadd.f32 %v13278_v7, %v6959_v60 }
 0x443   : > { %v7824_v38 = vsel %vm7760_vm15, %v7728_v54, %v7792_v15  ;;  %vm7759_vm1 = vcmp.ge.f32.partialorder %v7727_v50, 0.0  ;;  %v7791_v37 = vmul.f32 0.1, %v7727_v50  ;;  %v7730_v59 = vadd.f32 %v10049_v56, %v7343_v33  ;;  %v13951_v54 = vld [vmem:[#allocation52_spill] sm:$0xff]  ;;  %v13411_v31 = vpop.f32.mrf.mxu0 }
 0x444   : > { %7856 = vst.msk [vmem:[%s13299_s13 + $0x48] sm:$0xff] %vm416_vm2, %v7824_v38  ;;  %v7610_v30 = vpop.f32.mrf.mxu1  ;;  %v6961_v48 = vadd.f32 %v13951_v54, %v6573_v28  ;;  %v13952_v15 = vld [vmem:[#allocation88_spill] sm:$0xff] }
 0x445   : > { %v7823_v24 = vsel %vm7759_vm1, %v7727_v50, %v7791_v37  ;;  %vm7762_vm3 = vcmp.ge.f32.partialorder %v7730_v59, 0.0  ;;  %v7794_v26 = vmul.f32 0.1, %v7730_v59  ;;  %v7729_v5 = vadd.f32 %v7610_v30, %v7342_v41  ;;  %v13953_v50 = vld [vmem:[#allocation37_spill] sm:$0xff]  ;;  %v13954_v41 = vld [vmem:[#allocation51_spill] sm:$0xff]  ;;  %v10023_v16 = vpop.f32.mrf.mxu0  ;;  %v13967_v54 = vld [vmem:[#allocation40_spill] sm:$0xff] }
 0x446   : > { %7855 = vst.msk [vmem:[%s13299_s13 + $0x40] sm:$0xff] %vm416_vm2, %v7823_v24  ;;  %v10052_v63 = vpop.f32.mrf.mxu1  ;;  %v6575_v57 = vadd.f32 %v13953_v50, %v13952_v15  ;;  %v6964_v34 = vadd.f32 %v13954_v41, %v6576_v44  ;;  %v7348_v61 = vadd.f32 %v13301_v25, %v6961_v48  ;;  %v13958_v24 = vld [vmem:[#allocation91_spill] sm:$0xff] }
 0x447   : > { %v7826_v0 = vsel %vm7762_vm3, %v7730_v59, %v7794_v26  ;;  %vm7761_vm4 = vcmp.ge.f32.partialorder %v7729_v5, 0.0  ;;  %v7793_v36 = vmul.f32 0.1, %v7729_v5  ;;  %v7732_v29 = vadd.f32 %v10052_v63, %v7345_v21  ;;  %v13955_v59 = vld [vmem:[#allocation36_spill] sm:$0xff]  ;;  %v13959_v26 = vld [vmem:[#allocation35_spill] sm:$0xff]  ;;  %v13961_v63 = vld [vmem:[#allocation38_spill] sm:$0xff] }
 0x448   : > { %7858 = vst.msk [vmem:[%s13299_s13 + $0x58] sm:$0xff] %vm416_vm2, %v7826_v0  ;;  %v7620_v49 = vpop.f32.mrf.mxu1  ;;  %v6578_v35 = vadd.f32 %v13956_v10, %v13955_v59  ;;  %v6963_v21 = vadd.f32 %v13957_v23, %v6575_v57  ;;  %v7351_v1 = vadd.f32 %v13313_v46, %v6964_v34  ;;  %v13962_v0 = vld [vmem:[#allocation81_spill] sm:$0xff]  ;;  %v13968_v48 = vld [vmem:[#allocation83_spill] sm:$0xff]  ;;  %v13974_v23 = vld [vmem:[#allocation84_spill] sm:$0xff] }
 0x449   : > { %v7825_v20 = vsel %vm7761_vm4, %v7729_v5, %v7793_v36  ;;  %vm7764_vm5 = vcmp.ge.f32.partialorder %v7732_v29, 0.0  ;;  %v7796_v27 = vmul.f32 0.1, %v7732_v29  ;;  %v7731_v58 = vadd.f32 %v7620_v49, %v7344_v2  ;;  %v13971_v41 = vld [vmem:[#allocation39_spill] sm:$0xff] }
 0x44a   : > { %7857 = vst.msk [vmem:[%s13299_s13 + $0x50] sm:$0xff] %vm416_vm2, %v7825_v20  ;;  %v10055_v33 = vpop.f32.mrf.mxu1  ;;  %v6577_v5 = vadd.f32 %v13959_v26, %v13958_v24  ;;  %v6966_v32 = vadd.f32 %v13960_v22, %v6578_v35  ;;  %v6580_v36 = vadd.f32 %v13962_v0, %v13961_v63  ;;  %v6579_v49 = vadd.f32 %v13965_v45, %v13964_v52  ;;  %v13982_v45 = vld [vmem:[#allocation46_spill] sm:$0xff] }
 0x44b   : > { %v7828_v8 = vsel %vm7764_vm5, %v7732_v29, %v7796_v27  ;;  %vm7763_vm6 = vcmp.ge.f32.partialorder %v7731_v58, 0.0  ;;  %v7795_v55 = vmul.f32 0.1, %v7731_v58  ;;  %v7734_v43 = vadd.f32 %v10055_v33, %v7347_v12  ;;  %v13966_v27 = vld [vmem:[#allocation95_spill] sm:$0xff] }
 0x44c   : > { %7860 = vst.msk [vmem:[%s13299_s13 + $0x68] sm:$0xff] %vm416_vm2, %v7828_v8  ;;  %v7630_v7 = vpop.f32.mrf.mxu1  ;;  %v7350_v29 = vadd.f32 %v13327_v51, %v6963_v21  ;;  %v6965_v4 = vadd.f32 %v13963_v40, %v6577_v5  ;;  %v7353_v20 = vadd.f32 %v13341_v13, %v6966_v32  ;;  %v6582_v33 = vadd.f32 %v13968_v48, %v13967_v54  ;;  %v13976_v5 = vld [vmem:[#allocation86_spill] sm:$0xff]  ;;  %v13985_v48 = vld [vmem:[#allocation89_spill] sm:$0xff] }
 0x44d   : > { %v7827_v56 = vsel %vm7763_vm6, %v7731_v58, %v7795_v55  ;;  %vm7766_vm7 = vcmp.ge.f32.partialorder %v7734_v43, 0.0  ;;  %v7798_v38 = vmul.f32 0.1, %v7734_v43  ;;  %v7733_v37 = vadd.f32 %v7630_v7, %v7346_v53  ;;  %v13969_v55 = vld [vmem:[#allocation56_spill] sm:$0xff] }
 0x44e   : > { %7859 = vst.msk [vmem:[%s13299_s13 + $0x60] sm:$0xff] %vm416_vm2, %v7827_v56  ;;  %v10058_v11 = vpop.f32.mrf.mxu1  ;;  %v6968_v58 = vadd.f32 %v13966_v27, %v6580_v36  ;;  %v7352_v8 = vadd.f32 %v13355_v17, %v6965_v4  ;;  %v13972_v56 = vld [vmem:[#allocation96_spill] sm:$0xff]  ;;  %v13979_v36 = vld [vmem:[#allocation43_spill] sm:$0xff] }
 0x44f   : > { %v7830_v18 = vsel %vm7766_vm7, %v7734_v43, %v7798_v38  ;;  %vm7765_vm0 = vcmp.ge.f32.partialorder %v7733_v37, 0.0  ;;  %v7797_v47 = vmul.f32 0.1, %v7733_v37  ;;  %v7736_v30 = vadd.f32 %v10058_v11, %v7349_v6  ;;  %v13970_v6 = vld [vmem:[#allocation97_spill] sm:$0xff] }
 0x450   : > { %7862 = vst.msk [vmem:[%s13299_s13 + $0x78] sm:$0xff] %vm416_vm2, %v7830_v18  ;;  %v7640_v25 = vpop.f32.mrf.mxu1  ;;  %v6967_v43 = vadd.f32 %v13969_v55, %v6579_v49  ;;  %v6581_v34 = vadd.f32 %v13971_v41, %v13970_v6  ;;  %v7355_v7 = vadd.f32 %v13369_v3, %v6968_v58  ;;  %v6970_v38 = vadd.f32 %v13972_v56, %v6582_v33  ;;  %v13975_v18 = vld [vmem:[#allocation58_spill] sm:$0xff]  ;;  %v13983_v49 = vld [vmem:[#allocation87_spill] sm:$0xff]  ;;  %v13986_v33 = vld [vmem:[#allocation49_spill] sm:$0xff] }
 0x451   : > { %v7829_v2 = vsel %vm7765_vm0, %v7733_v37, %v7797_v47  ;;  %vm7768_vm8 = vcmp.ge.f32.partialorder %v7736_v30, 0.0  ;;  %v7800_v19 = vmul.f32 0.1, %v7736_v30  ;;  %v7735_v60 = vadd.f32 %v7640_v25, %v7348_v61  ;;  %v7303_v37 = vpop.f32.mrf.mxu0  ;;  %v13973_v61 = vld [vmem:[#allocation42_spill] sm:$0xff]  ;;  %v13984_v58 = vld [vmem:[#allocation99_spill] sm:$0xff] }
 0x452   : > { %7861 = vst.msk [vmem:[%s13299_s13 + $0x70] sm:$0xff] %vm416_vm2, %v7829_v2  ;;  %v10061_v46 = vpop.f32.mrf.mxu1  ;;  %v6584_v21 = vadd.f32 %v13974_v23, %v13973_v61  ;;  %v7354_v11 = vadd.f32 %v13383_v62, %v6967_v43  ;;  %v6969_v47 = vadd.f32 %v13975_v18, %v6581_v34  ;;  %v7357_v32 = vadd.f32 %v13397_v39, %v6970_v38  ;;  %v13978_v25 = vld [vmem:[#allocation98_spill] sm:$0xff]  ;;  %v13988_v41 = vld [vmem:[#allocation47_spill] sm:$0xff]  ;;  %v13989_v34 = vld [vmem:[#allocation48_spill] sm:$0xff] }
 0x453   : > { %v7832_v28 = vsel %vm7768_vm8, %v7736_v30, %v7800_v19  ;;  %vm7767_vm9 = vcmp.ge.f32.partialorder %v7735_v60, 0.0  ;;  %v7799_v14 = vmul.f32 0.1, %v7735_v60  ;;  %v7738_v12 = vadd.f32 %v10061_v46, %v7351_v1  ;;  %v13977_v1 = vld [vmem:[#allocation45_spill] sm:$0xff]  ;;  %v10026_v19 = vpop.f32.mrf.mxu0  ;;  %v13981_v46 = vld [vmem:[#allocation60_spill] sm:$0xff]  ;;  %v13987_v43 = vld [vmem:[#allocation62_spill] sm:$0xff] }
 0x454   : > { %7864 = vst.msk [vmem:[%s13299_s13 + $0x88] sm:$0xff] %vm416_vm2, %v7832_v28  ;;  %v7650_v51 = vpop.f32.mrf.mxu1  ;;  %v6583_v22 = vadd.f32 %v13977_v1, %v13976_v5  ;;  %v6972_v2 = vadd.f32 %v13978_v25, %v6584_v21  ;;  %v7356_v4 = vadd.f32 %v13411_v31, %v6969_v47  ;;  %v13990_v38 = vld [vmem:[#allocation65_spill] sm:$0xff] }
 0x455   : > { %v7831_v9 = vsel %vm7767_vm9, %v7735_v60, %v7799_v14  ;;  %vm7770_vm10 = vcmp.ge.f32.partialorder %v7738_v12, 0.0  ;;  %v7802_v44 = vmul.f32 0.1, %v7738_v12  ;;  %v7737_v53 = vadd.f32 %v7650_v51, %v7350_v29  ;;  %v13980_v29 = vld [vmem:[#allocation44_spill] sm:$0xff]  ;;  %v7313_v31 = vpop.f32.mrf.mxu0 }
 0x456   : > { %7863 = vst.msk [vmem:[%s13299_s13 + $0x80] sm:$0xff] %vm416_vm2, %v7831_v9  ;;  %v10064_v13 = vpop.f32.mrf.mxu1  ;;  %v6586_v40 = vadd.f32 %v13980_v29, %v13979_v36  ;;  %v6971_v28 = vadd.f32 %v13981_v46, %v6583_v22  ;;  %v7359_v27 = vadd.f32 %v10023_v16, %v6972_v2 }
 0x457   : > { %v7834_v15 = vsel %vm7770_vm10, %v7738_v12, %v7802_v44  ;;  %vm7769_vm11 = vcmp.ge.f32.partialorder %v7737_v53, 0.0  ;;  %v7801_v50 = vmul.f32 0.1, %v7737_v53  ;;  %v7740_v57 = vadd.f32 %v10064_v13, %v7353_v20 }
 0x458   : > { %7866 = vst.msk [vmem:[%s13299_s13 + $0x98] sm:$0xff] %vm416_vm2, %v7834_v15  ;;  %v7660_v17 = vpop.f32.mrf.mxu1  ;;  %v6585_v20 = vadd.f32 %v13983_v49, %v13982_v45  ;;  %v6974_v51 = vadd.f32 %v13984_v58, %v6586_v40  ;;  %v7358_v55 = vadd.f32 %v7303_v37, %v6971_v28  ;;  %v10029_v15 = vpop.f32.mrf.mxu0 }
 0x459   : > { %v7833_v59 = vsel %vm7769_vm11, %v7737_v53, %v7801_v50  ;;  %vm7772_vm12 = vcmp.ge.f32.partialorder %v7740_v57, 0.0  ;;  %v7804_v10 = vmul.f32 0.1, %v7740_v57  ;;  %v7739_v35 = vadd.f32 %v7660_v17, %v7352_v8 }
 0x45a   : > { %7865 = vst.msk [vmem:[%s13299_s13 + $0x90] sm:$0xff] %vm416_vm2, %v7833_v59  ;;  %v10067_v3 = vpop.f32.mrf.mxu1  ;;  %v6588_v8 = vadd.f32 %v13986_v33, %v13985_v48  ;;  %v6973_v13 = vadd.f32 %v13987_v43, %v6585_v20  ;;  %v7361_v56 = vadd.f32 %v10026_v19, %v6974_v51 }
 0x45b   : > { %v7836_v30 = vsel %vm7772_vm12, %v7740_v57, %v7804_v10  ;;  %vm7771_vm13 = vcmp.ge.f32.partialorder %v7739_v35, 0.0  ;;  %v7803_v24 = vmul.f32 0.1, %v7739_v35  ;;  %v7742_v26 = vadd.f32 %v10067_v3, %v7355_v7 }
 0x45c   : > { %7868 = vst.msk [vmem:[%s13299_s13 + $0xa8] sm:$0xff] %vm416_vm2, %v7836_v30  ;;  %v7670_v62 = vpop.f32.mrf.mxu1  ;;  %v6587_v7 = vadd.f32 %v13989_v34, %v13988_v41  ;;  %v6976_v17 = vadd.f32 %v13990_v38, %v6588_v8  ;;  %v7360_v61 = vadd.f32 %v7313_v31, %v6973_v13 }
 0x45d   : > { %v7835_v60 = vsel %vm7771_vm13, %v7739_v35, %v7803_v24  ;;  %vm7774_vm14 = vcmp.ge.f32.partialorder %v7742_v26, 0.0  ;;  %v7806_v63 = vmul.f32 0.1, %v7742_v26  ;;  %v7741_v0 = vadd.f32 %v7670_v62, %v7354_v11  ;;  %v7323_v11 = vpop.f32.mrf.mxu0 }
 0x45e   : > { %7867 = vst.msk [vmem:[%s13299_s13 + $0xa0] sm:$0xff] %vm416_vm2, %v7835_v60  ;;  %v10070_v39 = vpop.f32.mrf.mxu1  ;;  %v6975_v23 = vadd.f32 %v13286_v42, %v6587_v7  ;;  %v7363_v30 = vadd.f32 %v10029_v15, %v6976_v17 }
 0x45f   : > { %v7838_v14 = vsel %vm7774_vm14, %v7742_v26, %v7806_v63  ;;  %vm7773_vm15 = vcmp.ge.f32.partialorder %v7741_v0, 0.0  ;;  %v7805_v12 = vmul.f32 0.1, %v7741_v0  ;;  %v7744_v52 = vadd.f32 %v10070_v39, %v7357_v32 }
 0x460   : > { %7870 = vst.msk [vmem:[%s13299_s13 + $0xb8] sm:$0xff] %vm416_vm2, %v7838_v14  ;;  %v7680_v9 = vpop.f32.mrf.mxu1  ;;  %v7362_v42 = vadd.f32 %v7323_v11, %v6975_v23 }
 0x461   : > { %v7837_v44 = vsel %vm7773_vm15, %v7741_v0, %v7805_v12  ;;  %vm7776_vm1 = vcmp.ge.f32.partialorder %v7744_v52, 0.0  ;;  %v7808_v53 = vmul.f32 0.1, %v7744_v52  ;;  %v7743_v54 = vadd.f32 %v7680_v9, %v7356_v4 }
 0x462   : > { %7869 = vst.msk [vmem:[%s13299_s13 + $0xb0] sm:$0xff] %vm416_vm2, %v7837_v44  ;;  %v10073_v16 = vpop.f32.mrf.mxu1 }
 0x463   : > { %v7840_v50 = vsel %vm7776_vm1, %v7744_v52, %v7808_v53  ;;  %vm7775_vm3 = vcmp.ge.f32.partialorder %v7743_v54, 0.0  ;;  %v7807_v57 = vmul.f32 0.1, %v7743_v54  ;;  %v7746_v6 = vadd.f32 %v10073_v16, %v7359_v27 }
 0x464   : > { %7872 = vst.msk [vmem:[%s13299_s13 + $0xc8] sm:$0xff] %vm416_vm2, %v7840_v50  ;;  %v7690_v37 = vpop.f32.mrf.mxu1 }
 0x465   : > { %v7839_v59 = vsel %vm7775_vm3, %v7743_v54, %v7807_v57  ;;  %vm7778_vm4 = vcmp.ge.f32.partialorder %v7746_v6, 0.0  ;;  %v7810_v10 = vmul.f32 0.1, %v7746_v6  ;;  %v7745_v35 = vadd.f32 %v7690_v37, %v7358_v55 }
 0x466   : > { %7871 = vst.msk [vmem:[%s13299_s13 + $0xc0] sm:$0xff] %vm416_vm2, %v7839_v59  ;;  %v10076_v21 = vpop.f32.mrf.mxu1 }
 0x467   : > { %v7842_v18 = vsel %vm7778_vm4, %v7746_v6, %v7810_v10  ;;  %vm7777_vm5 = vcmp.ge.f32.partialorder %v7745_v35, 0.0  ;;  %v7809_v47 = vmul.f32 0.1, %v7745_v35  ;;  %v7748_v3 = vadd.f32 %v10076_v21, %v7361_v56 }
 0x468   : > { %7874 = vst.msk [vmem:[%s13299_s13 + $0xd8] sm:$0xff] %vm416_vm2, %v7842_v18  ;;  %v7700_v24 = vpop.f32.mrf.mxu1 }
 0x469   : > { %v7841_v26 = vsel %vm7777_vm5, %v7745_v35, %v7809_v47  ;;  %vm7780_vm6 = vcmp.ge.f32.partialorder %v7748_v3, 0.0  ;;  %v7812_v5 = vmul.f32 0.1, %v7748_v3  ;;  %v7747_v1 = vadd.f32 %v7700_v24, %v7360_v61 }
 0x46a   : > { %7873 = vst.msk [vmem:[%s13299_s13 + $0xd0] sm:$0xff] %vm416_vm2, %v7841_v26  ;;  %v10079_v22 = vpop.f32.mrf.mxu1 }
 0x46b   : > { %v7844_v32 = vsel %vm7780_vm6, %v7748_v3, %v7812_v5  ;;  %vm7779_vm7 = vcmp.ge.f32.partialorder %v7747_v1, 0.0  ;;  %v7811_v25 = vmul.f32 0.1, %v7747_v1  ;;  %v7750_v2 = vadd.f32 %v10079_v22, %v7363_v30 }
 0x46c   : > { %7876 = vst.msk [vmem:[%s13299_s13 + $0xe8] sm:$0xff] %vm416_vm2, %v7844_v32  ;;  %v7710_v62 = vpop.f32.mrf.mxu1 }
 0x46d   : > { %v7843_v19 = vsel %vm7779_vm7, %v7747_v1, %v7811_v25  ;;  %vm7782_vm0 = vcmp.ge.f32.partialorder %v7750_v2, 0.0  ;;  %v7814_v60 = vmul.f32 0.1, %v7750_v2  ;;  %v7749_v63 = vadd.f32 %v7710_v62, %v7362_v42 }
 0x46e   : > { %7875 = vst.msk [vmem:[%s13299_s13 + $0xe0] sm:$0xff] %vm416_vm2, %v7843_v19 }
 0x46f   : > { %v7846_v0 = vsel %vm7782_vm0, %v7750_v2, %v7814_v60  ;;  %vm7781_vm8 = vcmp.ge.f32.partialorder %v7749_v63, 0.0  ;;  %v7813_v36 = vmul.f32 0.1, %v7749_v63 }
 0x470   : > { %7878 = vst.msk [vmem:[%s13299_s13 + $0xf8] sm:$0xff] %vm416_vm2, %v7846_v0 }
 0x471   : > { %v7845_v29 = vsel %vm7781_vm8, %v7749_v63, %v7813_v36 }
 0x472   : > { %7877 = vst.msk [vmem:[%s13299_s13 + $0xf0] sm:$0xff] %vm416_vm2, %v7845_v29 }
 0x473 PF: > { %s16_s21 = sadd.s32 1, %s10099_s21  }
 0x474   : > { %p13_p4 = scmp.ge.s32.totalorder %s16_s21, 4  }
 0x476   :  { %15 = sbr.rel (!%p13_p4) target bundleno = 1 (0x1), region = 98 }

</bundles_post_ra>
